<compile_context>
chip_gen: v6e
topology: v6e:2x2x1
jax: 0.10.0
libtpu: 0.0.40
codegen_flags: <defaults>
</compile_context>

<pallas_src>
import functools

import jax
import jax.numpy as jnp
from jax.experimental import pallas as pl
from jax.experimental.pallas import tpu as pltpu

# Explicit scoped-VMEM budget: raises v5e's 16 MiB default, stays within v7x's 64 MiB physical.
_VMEM_LIMIT = 32 * 1024 * 1024


def _unroll(steps):
    # Bounded partial unroll: full unroll only for short loops; unroll=4 keeps LLO scheduling
    # visibility at realistic sequence lengths without exploding code size / vreg live ranges.
    return steps if steps <= 8 else 4


# ----------------------------- Encoder GRU (whole sequence, one call) -----------------------------
def _encoder_gru_kernel(x_ref,
                        wxr_ref, wxz_ref, wxn_ref,
                        whr_ref, whz_ref, whn_ref,
                        br_ref, bz_ref, bin_ref, bhn_ref,
                        h_out_ref,
                        pr_s, pz_s, pn_s):
    S, Bt, E = x_ref.shape
    H = whr_ref.shape[0]

    # Hoist the x-side gate matmuls OUT of the recurrence: one (S*Bt, E) x (E, H) matmul per
    # gate (good MXU fill), gate biases folded in.  Results staged in VMEM scratch.
    x2 = x_ref[...].reshape(S * Bt, E)
    pr_s[...] = jnp.dot(x2, wxr_ref[...],
                        preferred_element_type=jnp.float32).reshape(S, Bt, H) + br_ref[...]
    pz_s[...] = jnp.dot(x2, wxz_ref[...],
                        preferred_element_type=jnp.float32).reshape(S, Bt, H) + bz_ref[...]
    pn_s[...] = jnp.dot(x2, wxn_ref[...],
                        preferred_element_type=jnp.float32).reshape(S, Bt, H) + bin_ref[...]

    # Only the h-side matmuls stay on the sequential critical path.
    whr, whz, whn = whr_ref[...], whz_ref[...], whn_ref[...]
    b_hn = bhn_ref[...]

    def step(t, h):
        r = jax.nn.sigmoid(pr_s[t] + jnp.dot(h, whr, preferred_element_type=jnp.float32))
        z = jax.nn.sigmoid(pz_s[t] + jnp.dot(h, whz, preferred_element_type=jnp.float32))
        n = jnp.tanh(pn_s[t] + r * (jnp.dot(h, whn, preferred_element_type=jnp.float32) + b_hn))
        return (1.0 - z) * n + z * h

    h0 = jnp.zeros((Bt, H), jnp.float32)
    h_out_ref[...] = jax.lax.fori_loop(0, S, step, h0, unroll=_unroll(S))


def run_encoder(emb_src, p):
    S, Bp, E = emb_src.shape
    H = p["enc_whr"].shape[0]
    nb = 2 if Bp % 16 == 0 else 1        # batch-parallel grid: v7x's 2 TCs split the recurrence
    Bt = Bp // nb
    z2 = lambda b: (0, 0)
    return pl.pallas_call(
        _encoder_gru_kernel,
        out_shape=jax.ShapeDtypeStruct((Bp, H), jnp.float32),
        grid_spec=pltpu.PrefetchScalarGridSpec(
            num_scalar_prefetch=0,
            grid=(nb,),
            in_specs=[
                pl.BlockSpec((S, Bt, E), lambda b: (0, b, 0)),
                pl.BlockSpec((E, H), z2), pl.BlockSpec((E, H), z2), pl.BlockSpec((E, H), z2),
                pl.BlockSpec((H, H), z2), pl.BlockSpec((H, H), z2), pl.BlockSpec((H, H), z2),
                pl.BlockSpec((1, H), z2), pl.BlockSpec((1, H), z2),
                pl.BlockSpec((1, H), z2), pl.BlockSpec((1, H), z2),
            ],
            out_specs=pl.BlockSpec((Bt, H), lambda b: (b, 0)),
            scratch_shapes=[
                pltpu.VMEM((S, Bt, H), jnp.float32),
                pltpu.VMEM((S, Bt, H), jnp.float32),
                pltpu.VMEM((S, Bt, H), jnp.float32),
            ],
        ),
        compiler_params=pltpu.CompilerParams(
            dimension_semantics=("parallel",),
            vmem_limit_bytes=_VMEM_LIMIT),
    )(emb_src,
      p["enc_wxr"], p["enc_wxz"], p["enc_wxn"],
      p["enc_whr"], p["enc_whz"], p["enc_whn"],
      p["enc_br"], p["enc_bz"], p["enc_bin"], p["enc_bhn"])


# ----------------------------- Decoder GRU recurrence (all steps, one call) -----------------------------
def _decoder_gru_kernel(x_ref, ctx_ref,
                        wxr_ref, wxz_ref, wxn_ref,
                        wcr_ref, wcz_ref, wcn_ref,
                        whr_ref, whz_ref, whn_ref,
                        br_ref, bz_ref, bin_ref, bhn_ref,
                        h_all_ref,
                        pr_s, pz_s, pn_s):
    # x_ref: (T_out, Bt, Ed) where x_ref[t] = emb(tgt[t-1]) for t >= 1 (row 0 is a dummy).
    T_out, Bt, Ed = x_ref.shape
    H = whr_ref.shape[0]

    ctx = ctx_ref[...]                        # (Bt, H); also the initial hidden state

    # Time-invariant context contribution to the input-side gates (+ gate biases): ONCE.
    cr = jnp.dot(ctx, wcr_ref[...], preferred_element_type=jnp.float32) + br_ref[...]
    cz = jnp.dot(ctx, wcz_ref[...], preferred_element_type=jnp.float32) + bz_ref[...]
    cn = jnp.dot(ctx, wcn_ref[...], preferred_element_type=jnp.float32) + bin_ref[...]

    # x-side gate matmuls hoisted out of the recurrence: all steps at once, staged in scratch.
    x2 = x_ref[...].reshape(T_out * Bt, Ed)
    pr_s[...] = jnp.dot(x2, wxr_ref[...],
                        preferred_element_type=jnp.float32).reshape(T_out, Bt, H) + cr[None]
    pz_s[...] = jnp.dot(x2, wxz_ref[...],
                        preferred_element_type=jnp.float32).reshape(T_out, Bt, H) + cz[None]
    pn_s[...] = jnp.dot(x2, wxn_ref[...],
                        preferred_element_type=jnp.float32).reshape(T_out, Bt, H) + cn[None]

    whr, whz, whn = whr_ref[...], whz_ref[...], whn_ref[...]
    b_hn = bhn_ref[...]

    # Row 0 is masked out of the logits; keep it deterministic anyway.
    h_all_ref[0] = jnp.zeros((Bt, H), jnp.float32)

    def step(k, h):                           # step k produces hidden for t_out = k + 1
        r = jax.nn.sigmoid(pr_s[k + 1] + jnp.dot(h, whr, preferred_element_type=jnp.float32))
        z = jax.nn.sigmoid(pz_s[k + 1] + jnp.dot(h, whz, preferred_element_type=jnp.float32))
        n = jnp.tanh(pn_s[k + 1]
                     + r * (jnp.dot(h, whn, preferred_element_type=jnp.float32) + b_hn))
        h_new = (1.0 - z) * n + z * h
        h_all_ref[k + 1] = h_new
        return h_new

    jax.lax.fori_loop(0, T_out - 1, step, ctx, unroll=_unroll(T_out - 1))


def run_decoder_gru(emb_full, context, p):
    T_out, Bp, Ed = emb_full.shape
    H = context.shape[-1]
    nb = 2 if Bp % 16 == 0 else 1
    Bt = Bp // nb
    z2 = lambda b: (0, 0)
    return pl.pallas_call(
        _decoder_gru_kernel,
        out_shape=jax.ShapeDtypeStruct((T_out, Bp, H), jnp.float32),
        grid_spec=pltpu.PrefetchScalarGridSpec(
            num_scalar_prefetch=0,
            grid=(nb,),
            in_specs=[
                pl.BlockSpec((T_out, Bt, Ed), lambda b: (0, b, 0)),
                pl.BlockSpec((Bt, H), lambda b: (b, 0)),
                pl.BlockSpec((Ed, H), z2), pl.BlockSpec((Ed, H), z2), pl.BlockSpec((Ed, H), z2),
                pl.BlockSpec((H, H), z2), pl.BlockSpec((H, H), z2), pl.BlockSpec((H, H), z2),
                pl.BlockSpec((H, H), z2), pl.BlockSpec((H, H), z2), pl.BlockSpec((H, H), z2),
                pl.BlockSpec((1, H), z2), pl.BlockSpec((1, H), z2),
                pl.BlockSpec((1, H), z2), pl.BlockSpec((1, H), z2),
            ],
            out_specs=pl.BlockSpec((T_out, Bt, H), lambda b: (0, b, 0)),
            scratch_shapes=[
                pltpu.VMEM((T_out, Bt, H), jnp.float32),
                pltpu.VMEM((T_out, Bt, H), jnp.float32),
                pltpu.VMEM((T_out, Bt, H), jnp.float32),
            ],
        ),
        compiler_params=pltpu.CompilerParams(
            dimension_semantics=("parallel",),
            vmem_limit_bytes=_VMEM_LIMIT),
    )(emb_full, context,
      p["dec_wxr"], p["dec_wxz"], p["dec_wxn"],
      p["dec_wcr"], p["dec_wcz"], p["dec_wcn"],
      p["dec_whr"], p["dec_whz"], p["dec_whn"],
      p["dec_br"], p["dec_bz"], p["dec_bin"], p["dec_bhn"])


# ----------------------------- fc_out: parallel, lane-dense logits kernel -----------------------------
def _logits_kernel(emb_ref, h_ref, ctx_ref, we_ref, wh_ref, wc_ref, b_ref,
                   o_ref, ctx_sc, *, bp):
    i = pl.program_id(1)                      # row-block index (inner, "arbitrary")
    tm, tn = o_ref.shape

    # Context contribution + bias: one (Bp, tn) tile per vocab tile, reused for all row blocks.
    @pl.when(i == 0)
    def _():
        ctx_sc[...] = (jnp.dot(ctx_ref[...].astype(jnp.bfloat16), wc_ref[...],
                               preferred_element_type=jnp.float32) + b_ref[...])

    acc = jnp.dot(emb_ref[...].astype(jnp.bfloat16), we_ref[...],
                  preferred_element_type=jnp.float32)
    acc = acc + jnp.dot(h_ref[...].astype(jnp.bfloat16), wh_ref[...],
                        preferred_element_type=jnp.float32)

    # Rows are (t, b)-flattened with b fastest and tm % bp == 0, so the context tile repeats.
    ctx_tile = jnp.broadcast_to(ctx_sc[...][None], (tm // bp, bp, tn)).reshape(tm, tn)

    # Fold the reference model's outputs[0] == 0 row in here (rows < bp <=> t == 0).
    rows = i * tm + jax.lax.broadcasted_iota(jnp.int32, (tm, 1), 0)
    o_ref[...] = jnp.where(rows >= bp, acc + ctx_tile, 0.0)


def run_logits(emb2, h2, ctx, p, bp):
    Mo, Ed = emb2.shape
    H = h2.shape[1]
    we, wh, wc, b = p["dec_fc_we"], p["dec_fc_wh"], p["dec_fc_wc"], p["dec_fc_b"]
    Vp = we.shape[1]

    # Row tile: multiple of bp (context / t==0 mask alignment) and 128-aligned when possible.
    tm = Mo
    for cand in (512, 256, 128):
        if Mo % cand == 0 and cand % bp == 0:
            tm = cand
            break
    # tn=256 keeps double-buffered (F, tn) weight slabs inside v5e's 16 MiB scoped VMEM.
    tn = 256 if Vp % 256 == 0 else 128

    kernel = functools.partial(_logits_kernel, bp=bp)
    return pl.pallas_call(
        kernel,
        out_shape=jax.ShapeDtypeStruct((Mo, Vp), jnp.float32),
        grid_spec=pltpu.PrefetchScalarGridSpec(
            num_scalar_prefetch=0,
            # Vocab axis OUTER: each weight slab is DMA'd from HBM exactly once; only the
            # small activation row tiles are re-fetched in the inner loop.
            grid=(Vp // tn, Mo // tm),
            in_specs=[
                pl.BlockSpec((tm, Ed), lambda j, i: (i, 0)),
                pl.BlockSpec((tm, H), lambda j, i: (i, 0)),
                pl.BlockSpec((bp, H), lambda j, i: (0, 0)),
                pl.BlockSpec((Ed, tn), lambda j, i: (0, j)),
                pl.BlockSpec((H, tn), lambda j, i: (0, j)),
                pl.BlockSpec((H, tn), lambda j, i: (0, j)),
                pl.BlockSpec((1, tn), lambda j, i: (0, j)),
            ],
            out_specs=pl.BlockSpec((tm, tn), lambda j, i: (i, j)),
            scratch_shapes=[pltpu.VMEM((bp, tn), jnp.float32)],
        ),
        compiler_params=pltpu.CompilerParams(
            # rows axis is "arbitrary": it carries the ctx_sc scratch dependency (i == 0 init).
            dimension_semantics=("parallel", "arbitrary"),
            vmem_limit_bytes=_VMEM_LIMIT),
    )(emb2, h2, ctx, we, wh, wc, b)


# ----------------------------- Full forward (glue) -----------------------------
@jax.jit
def seq2seq_forward(params, src, tgt):
    # teacher_forcing_ratio == 1.0  => decoder input at step t is tgt[t-1].
    T_out, B = tgt.shape
    V = params["dec_emb"].shape[0]            # true (unpadded) vocab size
    H = params["enc_whr"].shape[0]

    # Pad batch to a multiple of 8 (f32 sublane density). Rows are independent -> exact.
    Bp = max(8, ((B + 7) // 8) * 8)
    pad = Bp - B
    srcp = jnp.pad(src, ((0, 0), (0, pad)))
    tgtp = jnp.pad(tgt, ((0, 0), (0, pad)))

    # ---- Encoder (embedding gather is XLA glue; recurrence is one Pallas kernel) ----
    emb_src = params["enc_emb"][srcp]                         # (S, Bp, E)
    context = run_encoder(emb_src, params)                    # (Bp, H); also decoder h0

    # ---- Decoder GRU recurrence: emb_full[t] = emb(tgt[t-1]) for t >= 1 (row 0 is dummy) ----
    emb_full = params["dec_emb"][jnp.roll(tgtp, 1, axis=0)]   # (T_out, Bp, Ed)
    h_full = run_decoder_gru(emb_full, context, params)       # (T_out, Bp, H), row 0 == 0

    # ---- fc_out: split-weight logits kernel (no concat / context broadcast / zero-row concat) ----
    Mo = T_out * Bp
    logits_p = run_logits(emb_full.reshape(Mo, -1), h_full.reshape(Mo, H),
                          context, params, Bp)                # (Mo, Vp), rows for t==0 are 0
    return logits_p.reshape(T_out, Bp, -1)[:, :B, :V]         # drop batch / vocab padding


def init_params(key, input_dim, output_dim, enc_emb_dim, dec_emb_dim, hid_dim):
    H = hid_dim
    s = 0.1
    keys = iter(jax.random.split(key, 40))

    def rnd(shape):
        return s * jax.random.normal(next(keys), shape, jnp.float32)

    params = {
        # embeddings
        "enc_emb": rnd((input_dim, enc_emb_dim)),
        "dec_emb": rnd((output_dim, dec_emb_dim)),
        # Encoder GRU, gate-split & pre-transposed:  x @ (E,H),  h @ (H,H).
        # (With 128-aligned H a fused (H,3H) layout would cut MXU pushes further.)
        "enc_wxr": rnd((enc_emb_dim, H)), "enc_wxz": rnd((enc_emb_dim, H)), "enc_wxn": rnd((enc_emb_dim, H)),
        "enc_whr": rnd((H, H)), "enc_whz": rnd((H, H)), "enc_whn": rnd((H, H)),
        # r/z biases pre-summed (b_ih + b_hh); n gate keeps both halves (r multiplies b_hn).
        "enc_br": rnd((1, H)), "enc_bz": rnd((1, H)),
        "enc_bin": rnd((1, H)), "enc_bhn": rnd((1, H)),
        # Decoder GRU over [emb, context]: input weight split into emb (wx*) / context (wc*) parts.
        "dec_wxr": rnd((dec_emb_dim, H)), "dec_wxz": rnd((dec_emb_dim, H)), "dec_wxn": rnd((dec_emb_dim, H)),
        "dec_wcr": rnd((H, H)), "dec_wcz": rnd((H, H)), "dec_wcn": rnd((H, H)),
        "dec_whr": rnd((H, H)), "dec_whz": rnd((H, H)), "dec_whn": rnd((H, H)),
        "dec_br": rnd((1, H)), "dec_bz": rnd((1, H)),
        "dec_bin": rnd((1, H)), "dec_bhn": rnd((1, H)),
    }
    # fc_out over concat([emb, hidden, context]) split along the feature axis into W_e/W_h/W_c,
    # zero-padded along the vocab axis to a multiple of 128 (lane-dense stores) and stored in
    # bf16 (native MXU path, halves the dominant HBM weight stream). Bias stays f32.
    Vp = ((output_dim + 127) // 128) * 128

    def fc_w(rows):
        w = jnp.zeros((rows, Vp), jnp.float32).at[:, :output_dim].set(rnd((rows, output_dim)))
        return w.astype(jnp.bfloat16)

    params["dec_fc_we"] = fc_w(dec_emb_dim)
    params["dec_fc_wh"] = fc_w(H)
    params["dec_fc_wc"] = fc_w(H)
    params["dec_fc_b"] = jnp.zeros((1, Vp), jnp.float32).at[:, :output_dim].set(
        rnd((1, output_dim)))
    return params


if __name__ == "__main__":
    B = 4
    SRC_LEN = 8
    TGT_LEN = 8
    INPUT_DIM = 64      # source vocab
    OUTPUT_DIM = 64     # target vocab
    ENC_EMB = 16
    DEC_EMB = 16
    HID = 32

    key = jax.random.PRNGKey(0)
    kp, ks, kt = jax.random.split(key, 3)

    params = init_params(kp, INPUT_DIM, OUTPUT_DIM, ENC_EMB, DEC_EMB, HID)
    src = jax.random.randint(ks, (SRC_LEN, B), 0, INPUT_DIM, dtype=jnp.int32)
    tgt = jax.random.randint(kt, (TGT_LEN, B), 0, OUTPUT_DIM, dtype=jnp.int32)

    outputs = seq2seq_forward(params, src, tgt)
    jax.block_until_ready(outputs)
    assert outputs.shape == (TGT_LEN, B, OUTPUT_DIM)
    assert bool(jnp.all(outputs[0] == 0.0))
    print("KERNEL_OK")
</pallas_src>

<mosaic_0001>
module attributes {stable_mosaic.version = 11 : i64} {
  func.func @_logits_kernel(%arg0: i32, %arg1: i32, %arg2: memref<64x16xf32, #tpu.memory_space<vmem>>, %arg3: memref<64x32xf32, #tpu.memory_space<vmem>>, %arg4: memref<8x32xf32, #tpu.memory_space<vmem>>, %arg5: memref<16x128xbf16, #tpu.memory_space<vmem>>, %arg6: memref<32x128xbf16, #tpu.memory_space<vmem>>, %arg7: memref<32x128xbf16, #tpu.memory_space<vmem>>, %arg8: memref<1x128xf32, #tpu.memory_space<vmem>>, %arg9: memref<64x128xf32, #tpu.memory_space<vmem>>, %arg10: memref<8x128xf32, #tpu.memory_space<vmem>>) attributes {dimension_semantics = [#tpu.dimension_semantics<parallel>, #tpu.dimension_semantics<arbitrary>], iteration_bounds = array<i64: 1, 1>, scalar_prefetch = 0 : i64, scratch_operands = 1 : i64, tpu.core_type = #tpu.core_type<tc>, window_params = [{transform_indices = @transform_0, window_bounds = array<i64: 64, 16>}, {transform_indices = @transform_1, window_bounds = array<i64: 64, 32>}, {pipeline_mode = #tpu.pipeline_mode<synchronous>, transform_indices = @transform_2, window_bounds = array<i64: 8, 32>}, {transform_indices = @transform_3, window_bounds = array<i64: 16, 128>}, {transform_indices = @transform_4, window_bounds = array<i64: 32, 128>}, {transform_indices = @transform_5, window_bounds = array<i64: 32, 128>}, {transform_indices = @transform_6, window_bounds = array<i64: 1, 128>}, {transform_indices = @transform_7, window_bounds = array<i64: 64, 128>}]} {
    %c0_i32 = arith.constant 0 : i32
    %0 = arith.cmpi eq, %arg1, %c0_i32 : i32
    %1 = arith.extui %0 : i1 to i32
    %c0_i32_0 = arith.constant 0 : i32
    %2 = arith.cmpi ne, %1, %c0_i32_0 : i32
    scf.if %2 {
      %c0_14 = arith.constant 0 : index
      %c0_15 = arith.constant 0 : index
      %29 = vector.load %arg4[%c0_14, %c0_15] : memref<8x32xf32, #tpu.memory_space<vmem>>, vector<8x32xf32>
      %30 = arith.truncf %29 : vector<8x32xf32> to vector<8x32xbf16>
      %c0_16 = arith.constant 0 : index
      %c0_17 = arith.constant 0 : index
      %31 = vector.load %arg7[%c0_16, %c0_17] : memref<32x128xbf16, #tpu.memory_space<vmem>>, vector<32x128xbf16>
      %cst_18 = arith.constant dense<0.000000e+00> : vector<8x128xf32>
      %32 = tpu.matmul %30, %31, %cst_18 {dimension_numbers = #tpu.dot_dimension_numbers<[1], [0], [0], [1], [0, 0, 1, 1], [], []>} : vector<8x32xbf16>, vector<32x128xbf16>, vector<8x128xf32> -> vector<8x128xf32>
      %c0_19 = arith.constant 0 : index
      %c0_20 = arith.constant 0 : index
      %33 = vector.load %arg8[%c0_19, %c0_20] : memref<1x128xf32, #tpu.memory_space<vmem>>, vector<1x128xf32>
      %34 = vector.broadcast %33 : vector<1x128xf32> to vector<8x128xf32>
      %35 = arith.addf %32, %34 : vector<8x128xf32>
      %c0_21 = arith.constant 0 : index
      %c0_22 = arith.constant 0 : index
      %36 = vector.load %arg10[%c0_21, %c0_22] : memref<8x128xf32, #tpu.memory_space<vmem>>, vector<8x128xf32>
      tpu.vector_store %arg10[%c0_21, %c0_22], %35 {strides = array<i32>} : memref<8x128xf32, #tpu.memory_space<vmem>>, vector<8x128xf32>,
    } else {
    }
    %c0 = arith.constant 0 : index
    %c0_1 = arith.constant 0 : index
    %3 = vector.load %arg2[%c0, %c0_1] : memref<64x16xf32, #tpu.memory_space<vmem>>, vector<64x16xf32>
    %4 = arith.truncf %3 : vector<64x16xf32> to vector<64x16xbf16>
    %c0_2 = arith.constant 0 : index
    %c0_3 = arith.constant 0 : index
    %5 = vector.load %arg5[%c0_2, %c0_3] : memref<16x128xbf16, #tpu.memory_space<vmem>>, vector<16x128xbf16>
    %cst = arith.constant dense<0.000000e+00> : vector<64x128xf32>
    %6 = tpu.matmul %4, %5, %cst {dimension_numbers = #tpu.dot_dimension_numbers<[1], [0], [0], [1], [0, 0, 1, 1], [], []>} : vector<64x16xbf16>, vector<16x128xbf16>, vector<64x128xf32> -> vector<64x128xf32>
    %c0_4 = arith.constant 0 : index
    %c0_5 = arith.constant 0 : index
    %7 = vector.load %arg3[%c0_4, %c0_5] : memref<64x32xf32, #tpu.memory_space<vmem>>, vector<64x32xf32>
    %8 = arith.truncf %7 : vector<64x32xf32> to vector<64x32xbf16>
    %c0_6 = arith.constant 0 : index
    %c0_7 = arith.constant 0 : index
    %9 = vector.load %arg6[%c0_6, %c0_7] : memref<32x128xbf16, #tpu.memory_space<vmem>>, vector<32x128xbf16>
    %cst_8 = arith.constant dense<0.000000e+00> : vector<64x128xf32>
    %10 = tpu.matmul %8, %9, %cst_8 {dimension_numbers = #tpu.dot_dimension_numbers<[1], [0], [0], [1], [0, 0, 1, 1], [], []>} : vector<64x32xbf16>, vector<32x128xbf16>, vector<64x128xf32> -> vector<64x128xf32>
    %11 = arith.addf %6, %10 : vector<64x128xf32>
    %c0_9 = arith.constant 0 : index
    %c0_10 = arith.constant 0 : index
    %12 = vector.load %arg10[%c0_9, %c0_10] : memref<8x128xf32, #tpu.memory_space<vmem>>, vector<8x128xf32>
    %13 = vector.shape_cast %12 : vector<8x128xf32> to vector<1x8x128xf32>
    %14 = vector.shape_cast %13 : vector<1x8x128xf32> to vector<1x8x128xf32>
    %15 = vector.broadcast %14 : vector<1x8x128xf32> to vector<8x8x128xf32>
    %16 = vector.shape_cast %15 : vector<8x8x128xf32> to vector<64x128xf32>
    %c64_i32 = arith.constant 64 : i32
    %17 = arith.muli %arg1, %c64_i32 : i32
    %18 = tpu.iota {dimensions = array<i32: 0>} : vector<64x1xi32>
    %19 = vector.broadcast %17 : i32 to vector<64x1xi32>
    %20 = arith.addi %19, %18 : vector<64x1xi32>
    %c8_i32 = arith.constant 8 : i32
    %21 = vector.broadcast %c8_i32 : i32 to vector<64x1xi32>
    %22 = arith.cmpi sge, %20, %21 : vector<64x1xi32>
    %23 = arith.addf %11, %16 : vector<64x128xf32>
    %cst_11 = arith.constant 0.000000e+00 : f32
    %24 = vector.shape_cast %22 : vector<64x1xi1> to vector<64x1xi1>
    %25 = vector.broadcast %24 : vector<64x1xi1> to vector<64x128xi1>
    %26 = vector.broadcast %cst_11 : f32 to vector<64x128xf32>
    %27 = arith.select %25, %23, %26 : vector<64x128xi1>, vector<64x128xf32>
    %c0_12 = arith.constant 0 : index
    %c0_13 = arith.constant 0 : index
    %28 = vector.load %arg9[%c0_12, %c0_13] : memref<64x128xf32, #tpu.memory_space<vmem>>, vector<64x128xf32>
    tpu.vector_store %arg9[%c0_12, %c0_13], %27 {strides = array<i32>} : memref<64x128xf32, #tpu.memory_space<vmem>>, vector<64x128xf32>,
    return
  }
  func.func @transform_0(%arg0: i32, %arg1: i32) -> (i32, i32) {
    %c0_i32 = arith.constant 0 : i32
    %c0_i32_0 = arith.constant 0 : i32
    return %arg1, %c0_i32 : i32, i32
  }
  func.func @transform_1(%arg0: i32, %arg1: i32) -> (i32, i32) {
    %c0_i32 = arith.constant 0 : i32
    %c0_i32_0 = arith.constant 0 : i32
    return %arg1, %c0_i32 : i32, i32
  }
  func.func @transform_2(%arg0: i32, %arg1: i32) -> (i32, i32) {
    %c0_i32 = arith.constant 0 : i32
    %c0_i32_0 = arith.constant 0 : i32
    %c0_i32_1 = arith.constant 0 : i32
    return %c0_i32, %c0_i32_0 : i32, i32
  }
  func.func @transform_3(%arg0: i32, %arg1: i32) -> (i32, i32) {
    %c0_i32 = arith.constant 0 : i32
    %c0_i32_0 = arith.constant 0 : i32
    return %c0_i32, %arg0 : i32, i32
  }
  func.func @transform_4(%arg0: i32, %arg1: i32) -> (i32, i32) {
    %c0_i32 = arith.constant 0 : i32
    %c0_i32_0 = arith.constant 0 : i32
    return %c0_i32, %arg0 : i32, i32
  }
  func.func @transform_5(%arg0: i32, %arg1: i32) -> (i32, i32) {
    %c0_i32 = arith.constant 0 : i32
    %c0_i32_0 = arith.constant 0 : i32
    return %c0_i32, %arg0 : i32, i32
  }
  func.func @transform_6(%arg0: i32, %arg1: i32) -> (i32, i32) {
    %c0_i32 = arith.constant 0 : i32
    %c0_i32_0 = arith.constant 0 : i32
    return %c0_i32, %arg0 : i32, i32
  }
  func.func @transform_7(%arg0: i32, %arg1: i32) -> (i32, i32) {
    %c0_i32 = arith.constant 0 : i32
    return %arg1, %arg0 : i32, i32
  }
}

module attributes {stable_mosaic.version = 11 : i64} {
  func.func @_encoder_gru_kernel(%arg0: i32, %arg1: memref<8x8x16xf32, #tpu.memory_space<vmem>>, %arg2: memref<16x32xf32, #tpu.memory_space<vmem>>, %arg3: memref<16x32xf32, #tpu.memory_space<vmem>>, %arg4: memref<16x32xf32, #tpu.memory_space<vmem>>, %arg5: memref<32x32xf32, #tpu.memory_space<vmem>>, %arg6: memref<32x32xf32, #tpu.memory_space<vmem>>, %arg7: memref<32x32xf32, #tpu.memory_space<vmem>>, %arg8: memref<1x32xf32, #tpu.memory_space<vmem>>, %arg9: memref<1x32xf32, #tpu.memory_space<vmem>>, %arg10: memref<1x32xf32, #tpu.memory_space<vmem>>, %arg11: memref<1x32xf32, #tpu.memory_space<vmem>>, %arg12: memref<8x32xf32, #tpu.memory_space<vmem>>, %arg13: memref<8x8x32xf32, #tpu.memory_space<vmem>>, %arg14: memref<8x8x32xf32, #tpu.memory_space<vmem>>, %arg15: memref<8x8x32xf32, #tpu.memory_space<vmem>>) attributes {dimension_semantics = [#tpu.dimension_semantics<parallel>], iteration_bounds = array<i64: 1>, scalar_prefetch = 0 : i64, scratch_operands = 3 : i64, tpu.core_type = #tpu.core_type<tc>, window_params = [{transform_indices = @transform_0, window_bounds = array<i64: 8, 8, 16>}, {pipeline_mode = #tpu.pipeline_mode<synchronous>, transform_indices = @transform_1, window_bounds = array<i64: 16, 32>}, {pipeline_mode = #tpu.pipeline_mode<synchronous>, transform_indices = @transform_2, window_bounds = array<i64: 16, 32>}, {pipeline_mode = #tpu.pipeline_mode<synchronous>, transform_indices = @transform_3, window_bounds = array<i64: 16, 32>}, {pipeline_mode = #tpu.pipeline_mode<synchronous>, transform_indices = @transform_4, window_bounds = array<i64: 32, 32>}, {pipeline_mode = #tpu.pipeline_mode<synchronous>, transform_indices = @transform_5, window_bounds = array<i64: 32, 32>}, {pipeline_mode = #tpu.pipeline_mode<synchronous>, transform_indices = @transform_6, window_bounds = array<i64: 32, 32>}, {pipeline_mode = #tpu.pipeline_mode<synchronous>, transform_indices = @transform_7, window_bounds = array<i64: 1, 32>}, {pipeline_mode = #tpu.pipeline_mode<synchronous>, transform_indices = @transform_8, window_bounds = array<i64: 1, 32>}, {pipeline_mode = #tpu.pipeline_mode<synchronous>, transform_indices = @transform_9, window_bounds = array<i64: 1, 32>}, {pipeline_mode = #tpu.pipeline_mode<synchronous>, transform_indices = @transform_10, window_bounds = array<i64: 1, 32>}, {transform_indices = @transform_11, window_bounds = array<i64: 8, 32>}]} {
    %c0 = arith.constant 0 : index
    %c0_0 = arith.constant 0 : index
    %c0_1 = arith.constant 0 : index
    %0 = vector.load %arg1[%c0, %c0_0, %c0_1] : memref<8x8x16xf32, #tpu.memory_space<vmem>>, vector<8x8x16xf32>
    %1 = vector.shape_cast %0 : vector<8x8x16xf32> to vector<64x16xf32>
    %c0_2 = arith.constant 0 : index
    %c0_3 = arith.constant 0 : index
    %2 = vector.load %arg2[%c0_2, %c0_3] : memref<16x32xf32, #tpu.memory_space<vmem>>, vector<16x32xf32>
    %cst = arith.constant dense<0.000000e+00> : vector<64x32xf32>
    %3 = tpu.matmul %1, %2, %cst {dimension_numbers = #tpu.dot_dimension_numbers<[1], [0], [0], [1], [0, 0, 1, 1], [], []>} : vector<64x16xf32>, vector<16x32xf32>, vector<64x32xf32> -> vector<64x32xf32>
    %4 = vector.shape_cast %3 : vector<64x32xf32> to vector<8x8x32xf32>
    %c0_4 = arith.constant 0 : index
    %c0_5 = arith.constant 0 : index
    %5 = vector.load %arg8[%c0_4, %c0_5] : memref<1x32xf32, #tpu.memory_space<vmem>>, vector<1x32xf32>
    %6 = vector.shape_cast %5 : vector<1x32xf32> to vector<1x1x32xf32>
    %7 = vector.broadcast %6 : vector<1x1x32xf32> to vector<8x8x32xf32>
    %8 = arith.addf %4, %7 : vector<8x8x32xf32>
    %c0_6 = arith.constant 0 : index
    %c0_7 = arith.constant 0 : index
    %c0_8 = arith.constant 0 : index
    %9 = vector.load %arg13[%c0_6, %c0_7, %c0_8] : memref<8x8x32xf32, #tpu.memory_space<vmem>>, vector<8x8x32xf32>
    tpu.vector_store %arg13[%c0_6, %c0_7, %c0_8], %8 {strides = array<i32>} : memref<8x8x32xf32, #tpu.memory_space<vmem>>, vector<8x8x32xf32>,
    %c0_9 = arith.constant 0 : index
    %c0_10 = arith.constant 0 : index
    %10 = vector.load %arg3[%c0_9, %c0_10] : memref<16x32xf32, #tpu.memory_space<vmem>>, vector<16x32xf32>
    %cst_11 = arith.constant dense<0.000000e+00> : vector<64x32xf32>
    %11 = tpu.matmul %1, %10, %cst_11 {dimension_numbers = #tpu.dot_dimension_numbers<[1], [0], [0], [1], [0, 0, 1, 1], [], []>} : vector<64x16xf32>, vector<16x32xf32>, vector<64x32xf32> -> vector<64x32xf32>
    %12 = vector.shape_cast %11 : vector<64x32xf32> to vector<8x8x32xf32>
    %c0_12 = arith.constant 0 : index
    %c0_13 = arith.constant 0 : index
    %13 = vector.load %arg9[%c0_12, %c0_13] : memref<1x32xf32, #tpu.memory_space<vmem>>, vector<1x32xf32>
    %14 = vector.shape_cast %13 : vector<1x32xf32> to vector<1x1x32xf32>
    %15 = vector.broadcast %14 : vector<1x1x32xf32> to vector<8x8x32xf32>
    %16 = arith.addf %12, %15 : vector<8x8x32xf32>
    %c0_14 = arith.constant 0 : index
    %c0_15 = arith.constant 0 : index
    %c0_16 = arith.constant 0 : index
    %17 = vector.load %arg14[%c0_14, %c0_15, %c0_16] : memref<8x8x32xf32, #tpu.memory_space<vmem>>, vector<8x8x32xf32>
    tpu.vector_store %arg14[%c0_14, %c0_15, %c0_16], %16 {strides = array<i32>} : memref<8x8x32xf32, #tpu.memory_space<vmem>>, vector<8x8x32xf32>,
    %c0_17 = arith.constant 0 : index
    %c0_18 = arith.constant 0 : index
    %18 = vector.load %arg4[%c0_17, %c0_18] : memref<16x32xf32, #tpu.memory_space<vmem>>, vector<16x32xf32>
    %cst_19 = arith.constant dense<0.000000e+00> : vector<64x32xf32>
    %19 = tpu.matmul %1, %18, %cst_19 {dimension_numbers = #tpu.dot_dimension_numbers<[1], [0], [0], [1], [0, 0, 1, 1], [], []>} : vector<64x16xf32>, vector<16x32xf32>, vector<64x32xf32> -> vector<64x32xf32>
    %20 = vector.shape_cast %19 : vector<64x32xf32> to vector<8x8x32xf32>
    %c0_20 = arith.constant 0 : index
    %c0_21 = arith.constant 0 : index
    %21 = vector.load %arg10[%c0_20, %c0_21] : memref<1x32xf32, #tpu.memory_space<vmem>>, vector<1x32xf32>
    %22 = vector.shape_cast %21 : vector<1x32xf32> to vector<1x1x32xf32>
    %23 = vector.broadcast %22 : vector<1x1x32xf32> to vector<8x8x32xf32>
    %24 = arith.addf %20, %23 : vector<8x8x32xf32>
    %c0_22 = arith.constant 0 : index
    %c0_23 = arith.constant 0 : index
    %c0_24 = arith.constant 0 : index
    %25 = vector.load %arg15[%c0_22, %c0_23, %c0_24] : memref<8x8x32xf32, #tpu.memory_space<vmem>>, vector<8x8x32xf32>
    tpu.vector_store %arg15[%c0_22, %c0_23, %c0_24], %24 {strides = array<i32>} : memref<8x8x32xf32, #tpu.memory_space<vmem>>, vector<8x8x32xf32>,
    %c0_25 = arith.constant 0 : index
    %c0_26 = arith.constant 0 : index
    %26 = vector.load %arg5[%c0_25, %c0_26] : memref<32x32xf32, #tpu.memory_space<vmem>>, vector<32x32xf32>
    %c0_27 = arith.constant 0 : index
    %c0_28 = arith.constant 0 : index
    %27 = vector.load %arg6[%c0_27, %c0_28] : memref<32x32xf32, #tpu.memory_space<vmem>>, vector<32x32xf32>
    %c0_29 = arith.constant 0 : index
    %c0_30 = arith.constant 0 : index
    %28 = vector.load %arg7[%c0_29, %c0_30] : memref<32x32xf32, #tpu.memory_space<vmem>>, vector<32x32xf32>
    %c0_31 = arith.constant 0 : index
    %c0_32 = arith.constant 0 : index
    %29 = vector.load %arg11[%c0_31, %c0_32] : memref<1x32xf32, #tpu.memory_space<vmem>>, vector<1x32xf32>
    %cst_33 = arith.constant 0.000000e+00 : f32
    %30 = vector.broadcast %cst_33 : f32 to vector<8x32xf32>
    %c0_i32 = arith.constant 0 : i32
    %31 = arith.index_cast %c0_i32 : i32 to index
    %c0_34 = arith.constant 0 : index
    %c0_35 = arith.constant 0 : index
    %32 = vector.load %arg13[%31, %c0_34, %c0_35] : memref<8x8x32xf32, #tpu.memory_space<vmem>>, vector<1x8x32xf32>
    %33 = vector.shape_cast %32 : vector<1x8x32xf32> to vector<8x32xf32>
    %cst_36 = arith.constant dense<0.000000e+00> : vector<8x32xf32>
    %34 = tpu.matmul %30, %26, %cst_36 {dimension_numbers = #tpu.dot_dimension_numbers<[1], [0], [0], [1], [0, 0, 1, 1], [], []>} : vector<8x32xf32>, vector<32x32xf32>, vector<8x32xf32> -> vector<8x32xf32>
    %35 = arith.addf %33, %34 : vector<8x32xf32>
    %36 = arith.negf %35 : vector<8x32xf32>
    %37 = math.exp %36 : vector<8x32xf32>
    %cst_37 = arith.constant 1.000000e+00 : f32
    %38 = vector.broadcast %cst_37 : f32 to vector<8x32xf32>
    %39 = arith.addf %38, %37 : vector<8x32xf32>
    %40 = arith.divf %38, %39 : vector<8x32xf32>
    %41 = arith.index_cast %c0_i32 : i32 to index
    %c0_38 = arith.constant 0 : index
    %c0_39 = arith.constant 0 : index
    %42 = vector.load %arg14[%41, %c0_38, %c0_39] : memref<8x8x32xf32, #tpu.memory_space<vmem>>, vector<1x8x32xf32>
    %43 = vector.shape_cast %42 : vector<1x8x32xf32> to vector<8x32xf32>
    %cst_40 = arith.constant dense<0.000000e+00> : vector<8x32xf32>
    %44 = tpu.matmul %30, %27, %cst_40 {dimension_numbers = #tpu.dot_dimension_numbers<[1], [0], [0], [1], [0, 0, 1, 1], [], []>} : vector<8x32xf32>, vector<32x32xf32>, vector<8x32xf32> -> vector<8x32xf32>
    %45 = arith.addf %43, %44 : vector<8x32xf32>
    %46 = arith.negf %45 : vector<8x32xf32>
    %47 = math.exp %46 : vector<8x32xf32>
    %cst_41 = arith.constant 1.000000e+00 : f32
    %48 = vector.broadcast %cst_41 : f32 to vector<8x32xf32>
    %49 = arith.addf %48, %47 : vector<8x32xf32>
    %50 = arith.divf %48, %49 : vector<8x32xf32>
    %51 = arith.index_cast %c0_i32 : i32 to index
    %c0_42 = arith.constant 0 : index
    %c0_43 = arith.constant 0 : index
    %52 = vector.load %arg15[%51, %c0_42, %c0_43] : memref<8x8x32xf32, #tpu.memory_space<vmem>>, vector<1x8x32xf32>
    %53 = vector.shape_cast %52 : vector<1x8x32xf32> to vector<8x32xf32>
    %cst_44 = arith.constant dense<0.000000e+00> : vector<8x32xf32>
    %54 = tpu.matmul %30, %28, %cst_44 {dimension_numbers = #tpu.dot_dimension_numbers<[1], [0], [0], [1], [0, 0, 1, 1], [], []>} : vector<8x32xf32>, vector<32x32xf32>, vector<8x32xf32> -> vector<8x32xf32>
    %55 = vector.broadcast %29 : vector<1x32xf32> to vector<8x32xf32>
    %56 = arith.addf %54, %55 : vector<8x32xf32>
    %57 = arith.mulf %40, %56 : vector<8x32xf32>
    %58 = arith.addf %53, %57 : vector<8x32xf32>
    %59 = math.tanh %58 : vector<8x32xf32>
    %cst_45 = arith.constant 1.000000e+00 : f32
    %60 = vector.broadcast %cst_45 : f32 to vector<8x32xf32>
    %61 = arith.subf %60, %50 : vector<8x32xf32>
    %62 = arith.mulf %61, %59 : vector<8x32xf32>
    %63 = arith.mulf %50, %30 : vector<8x32xf32>
    %64 = arith.addf %62, %63 : vector<8x32xf32>
    %c1_i32 = arith.constant 1 : i32
    %65 = arith.index_cast %c1_i32 : i32 to index
    %c0_46 = arith.constant 0 : index
    %c0_47 = arith.constant 0 : index
    %66 = vector.load %arg13[%65, %c0_46, %c0_47] : memref<8x8x32xf32, #tpu.memory_space<vmem>>, vector<1x8x32xf32>
    %67 = vector.shape_cast %66 : vector<1x8x32xf32> to vector<8x32xf32>
    %cst_48 = arith.constant dense<0.000000e+00> : vector<8x32xf32>
    %68 = tpu.matmul %64, %26, %cst_48 {dimension_numbers = #tpu.dot_dimension_numbers<[1], [0], [0], [1], [0, 0, 1, 1], [], []>} : vector<8x32xf32>, vector<32x32xf32>, vector<8x32xf32> -> vector<8x32xf32>
    %69 = arith.addf %67, %68 : vector<8x32xf32>
    %70 = arith.negf %69 : vector<8x32xf32>
    %71 = math.exp %70 : vector<8x32xf32>
    %cst_49 = arith.constant 1.000000e+00 : f32
    %72 = vector.broadcast %cst_49 : f32 to vector<8x32xf32>
    %73 = arith.addf %72, %71 : vector<8x32xf32>
    %74 = arith.divf %72, %73 : vector<8x32xf32>
    %75 = arith.index_cast %c1_i32 : i32 to index
    %c0_50 = arith.constant 0 : index
    %c0_51 = arith.constant 0 : index
    %76 = vector.load %arg14[%75, %c0_50, %c0_51] : memref<8x8x32xf32, #tpu.memory_space<vmem>>, vector<1x8x32xf32>
    %77 = vector.shape_cast %76 : vector<1x8x32xf32> to vector<8x32xf32>
    %cst_52 = arith.constant dense<0.000000e+00> : vector<8x32xf32>
    %78 = tpu.matmul %64, %27, %cst_52 {dimension_numbers = #tpu.dot_dimension_numbers<[1], [0], [0], [1], [0, 0, 1, 1], [], []>} : vector<8x32xf32>, vector<32x32xf32>, vector<8x32xf32> -> vector<8x32xf32>
    %79 = arith.addf %77, %78 : vector<8x32xf32>
    %80 = arith.negf %79 : vector<8x32xf32>
    %81 = math.exp %80 : vector<8x32xf32>
    %cst_53 = arith.constant 1.000000e+00 : f32
    %82 = vector.broadcast %cst_53 : f32 to vector<8x32xf32>
    %83 = arith.addf %82, %81 : vector<8x32xf32>
    %84 = arith.divf %82, %83 : vector<8x32xf32>
    %85 = arith.index_cast %c1_i32 : i32 to index
    %c0_54 = arith.constant 0 : index
    %c0_55 = arith.constant 0 : index
    %86 = vector.load %arg15[%85, %c0_54, %c0_55] : memref<8x8x32xf32, #tpu.memory_space<vmem>>, vector<1x8x32xf32>
    %87 = vector.shape_cast %86 : vector<1x8x32xf32> to vector<8x32xf32>
    %cst_56 = arith.constant dense<0.000000e+00> : vector<8x32xf32>
    %88 = tpu.matmul %64, %28, %cst_56 {dimension_numbers = #tpu.dot_dimension_numbers<[1], [0], [0], [1], [0, 0, 1, 1], [], []>} : vector<8x32xf32>, vector<32x32xf32>, vector<8x32xf32> -> vector<8x32xf32>
    %89 = vector.broadcast %29 : vector<1x32xf32> to vector<8x32xf32>
    %90 = arith.addf %88, %89 : vector<8x32xf32>
    %91 = arith.mulf %74, %90 : vector<8x32xf32>
    %92 = arith.addf %87, %91 : vector<8x32xf32>
    %93 = math.tanh %92 : vector<8x32xf32>
    %cst_57 = arith.constant 1.000000e+00 : f32
    %94 = vector.broadcast %cst_57 : f32 to vector<8x32xf32>
    %95 = arith.subf %94, %84 : vector<8x32xf32>
    %96 = arith.mulf %95, %93 : vector<8x32xf32>
    %97 = arith.mulf %84, %64 : vector<8x32xf32>
    %98 = arith.addf %96, %97 : vector<8x32xf32>
    %c2_i32 = arith.constant 2 : i32
    %99 = arith.index_cast %c2_i32 : i32 to index
    %c0_58 = arith.constant 0 : index
    %c0_59 = arith.constant 0 : index
    %100 = vector.load %arg13[%99, %c0_58, %c0_59] : memref<8x8x32xf32, #tpu.memory_space<vmem>>, vector<1x8x32xf32>
    %101 = vector.shape_cast %100 : vector<1x8x32xf32> to vector<8x32xf32>
    %cst_60 = arith.constant dense<0.000000e+00> : vector<8x32xf32>
    %102 = tpu.matmul %98, %26, %cst_60 {dimension_numbers = #tpu.dot_dimension_numbers<[1], [0], [0], [1], [0, 0, 1, 1], [], []>} : vector<8x32xf32>, vector<32x32xf32>, vector<8x32xf32> -> vector<8x32xf32>
    %103 = arith.addf %101, %102 : vector<8x32xf32>
    %104 = arith.negf %103 : vector<8x32xf32>
    %105 = math.exp %104 : vector<8x32xf32>
    %cst_61 = arith.constant 1.000000e+00 : f32
    %106 = vector.broadcast %cst_61 : f32 to vector<8x32xf32>
    %107 = arith.addf %106, %105 : vector<8x32xf32>
    %108 = arith.divf %106, %107 : vector<8x32xf32>
    %109 = arith.index_cast %c2_i32 : i32 to index
    %c0_62 = arith.constant 0 : index
    %c0_63 = arith.constant 0 : index
    %110 = vector.load %arg14[%109, %c0_62, %c0_63] : memref<8x8x32xf32, #tpu.memory_space<vmem>>, vector<1x8x32xf32>
    %111 = vector.shape_cast %110 : vector<1x8x32xf32> to vector<8x32xf32>
    %cst_64 = arith.constant dense<0.000000e+00> : vector<8x32xf32>
    %112 = tpu.matmul %98, %27, %cst_64 {dimension_numbers = #tpu.dot_dimension_numbers<[1], [0], [0], [1], [0, 0, 1, 1], [], []>} : vector<8x32xf32>, vector<32x32xf32>, vector<8x32xf32> -> vector<8x32xf32>
    %113 = arith.addf %111, %112 : vector<8x32xf32>
    %114 = arith.negf %113 : vector<8x32xf32>
    %115 = math.exp %114 : vector<8x32xf32>
    %cst_65 = arith.constant 1.000000e+00 : f32
    %116 = vector.broadcast %cst_65 : f32 to vector<8x32xf32>
    %117 = arith.addf %116, %115 : vector<8x32xf32>
    %118 = arith.divf %116, %117 : vector<8x32xf32>
    %119 = arith.index_cast %c2_i32 : i32 to index
    %c0_66 = arith.constant 0 : index
    %c0_67 = arith.constant 0 : index
    %120 = vector.load %arg15[%119, %c0_66, %c0_67] : memref<8x8x32xf32, #tpu.memory_space<vmem>>, vector<1x8x32xf32>
    %121 = vector.shape_cast %120 : vector<1x8x32xf32> to vector<8x32xf32>
    %cst_68 = arith.constant dense<0.000000e+00> : vector<8x32xf32>
    %122 = tpu.matmul %98, %28, %cst_68 {dimension_numbers = #tpu.dot_dimension_numbers<[1], [0], [0], [1], [0, 0, 1, 1], [], []>} : vector<8x32xf32>, vector<32x32xf32>, vector<8x32xf32> -> vector<8x32xf32>
    %123 = vector.broadcast %29 : vector<1x32xf32> to vector<8x32xf32>
    %124 = arith.addf %122, %123 : vector<8x32xf32>
    %125 = arith.mulf %108, %124 : vector<8x32xf32>
    %126 = arith.addf %121, %125 : vector<8x32xf32>
    %127 = math.tanh %126 : vector<8x32xf32>
    %cst_69 = arith.constant 1.000000e+00 : f32
    %128 = vector.broadcast %cst_69 : f32 to vector<8x32xf32>
    %129 = arith.subf %128, %118 : vector<8x32xf32>
    %130 = arith.mulf %129, %127 : vector<8x32xf32>
    %131 = arith.mulf %118, %98 : vector<8x32xf32>
    %132 = arith.addf %130, %131 : vector<8x32xf32>
    %c3_i32 = arith.constant 3 : i32
    %133 = arith.index_cast %c3_i32 : i32 to index
    %c0_70 = arith.constant 0 : index
    %c0_71 = arith.constant 0 : index
    %134 = vector.load %arg13[%133, %c0_70, %c0_71] : memref<8x8x32xf32, #tpu.memory_space<vmem>>, vector<1x8x32xf32>
    %135 = vector.shape_cast %134 : vector<1x8x32xf32> to vector<8x32xf32>
    %cst_72 = arith.constant dense<0.000000e+00> : vector<8x32xf32>
    %136 = tpu.matmul %132, %26, %cst_72 {dimension_numbers = #tpu.dot_dimension_numbers<[1], [0], [0], [1], [0, 0, 1, 1], [], []>} : vector<8x32xf32>, vector<32x32xf32>, vector<8x32xf32> -> vector<8x32xf32>
    %137 = arith.addf %135, %136 : vector<8x32xf32>
    %138 = arith.negf %137 : vector<8x32xf32>
    %139 = math.exp %138 : vector<8x32xf32>
    %cst_73 = arith.constant 1.000000e+00 : f32
    %140 = vector.broadcast %cst_73 : f32 to vector<8x32xf32>
    %141 = arith.addf %140, %139 : vector<8x32xf32>
    %142 = arith.divf %140, %141 : vector<8x32xf32>
    %143 = arith.index_cast %c3_i32 : i32 to index
    %c0_74 = arith.constant 0 : index
    %c0_75 = arith.constant 0 : index
    %144 = vector.load %arg14[%143, %c0_74, %c0_75] : memref<8x8x32xf32, #tpu.memory_space<vmem>>, vector<1x8x32xf32>
    %145 = vector.shape_cast %144 : vector<1x8x32xf32> to vector<8x32xf32>
    %cst_76 = arith.constant dense<0.000000e+00> : vector<8x32xf32>
    %146 = tpu.matmul %132, %27, %cst_76 {dimension_numbers = #tpu.dot_dimension_numbers<[1], [0], [0], [1], [0, 0, 1, 1], [], []>} : vector<8x32xf32>, vector<32x32xf32>, vector<8x32xf32> -> vector<8x32xf32>
    %147 = arith.addf %145, %146 : vector<8x32xf32>
    %148 = arith.negf %147 : vector<8x32xf32>
    %149 = math.exp %148 : vector<8x32xf32>
    %cst_77 = arith.constant 1.000000e+00 : f32
    %150 = vector.broadcast %cst_77 : f32 to vector<8x32xf32>
    %151 = arith.addf %150, %149 : vector<8x32xf32>
    %152 = arith.divf %150, %151 : vector<8x32xf32>
    %153 = arith.index_cast %c3_i32 : i32 to index
    %c0_78 = arith.constant 0 : index
    %c0_79 = arith.constant 0 : index
    %154 = vector.load %arg15[%153, %c0_78, %c0_79] : memref<8x8x32xf32, #tpu.memory_space<vmem>>, vector<1x8x32xf32>
    %155 = vector.shape_cast %154 : vector<1x8x32xf32> to vector<8x32xf32>
    %cst_80 = arith.constant dense<0.000000e+00> : vector<8x32xf32>
    %156 = tpu.matmul %132, %28, %cst_80 {dimension_numbers = #tpu.dot_dimension_numbers<[1], [0], [0], [1], [0, 0, 1, 1], [], []>} : vector<8x32xf32>, vector<32x32xf32>, vector<8x32xf32> -> vector<8x32xf32>
    %157 = vector.broadcast %29 : vector<1x32xf32> to vector<8x32xf32>
    %158 = arith.addf %156, %157 : vector<8x32xf32>
    %159 = arith.mulf %142, %158 : vector<8x32xf32>
    %160 = arith.addf %155, %159 : vector<8x32xf32>
    %161 = math.tanh %160 : vector<8x32xf32>
    %cst_81 = arith.constant 1.000000e+00 : f32
    %162 = vector.broadcast %cst_81 : f32 to vector<8x32xf32>
    %163 = arith.subf %162, %152 : vector<8x32xf32>
    %164 = arith.mulf %163, %161 : vector<8x32xf32>
    %165 = arith.mulf %152, %132 : vector<8x32xf32>
    %166 = arith.addf %164, %165 : vector<8x32xf32>
    %c4_i32 = arith.constant 4 : i32
    %167 = arith.index_cast %c4_i32 : i32 to index
    %c0_82 = arith.constant 0 : index
    %c0_83 = arith.constant 0 : index
    %168 = vector.load %arg13[%167, %c0_82, %c0_83] : memref<8x8x32xf32, #tpu.memory_space<vmem>>, vector<1x8x32xf32>
    %169 = vector.shape_cast %168 : vector<1x8x32xf32> to vector<8x32xf32>
    %cst_84 = arith.constant dense<0.000000e+00> : vector<8x32xf32>
    %170 = tpu.matmul %166, %26, %cst_84 {dimension_numbers = #tpu.dot_dimension_numbers<[1], [0], [0], [1], [0, 0, 1, 1], [], []>} : vector<8x32xf32>, vector<32x32xf32>, vector<8x32xf32> -> vector<8x32xf32>
    %171 = arith.addf %169, %170 : vector<8x32xf32>
    %172 = arith.negf %171 : vector<8x32xf32>
    %173 = math.exp %172 : vector<8x32xf32>
    %cst_85 = arith.constant 1.000000e+00 : f32
    %174 = vector.broadcast %cst_85 : f32 to vector<8x32xf32>
    %175 = arith.addf %174, %173 : vector<8x32xf32>
    %176 = arith.divf %174, %175 : vector<8x32xf32>
    %177 = arith.index_cast %c4_i32 : i32 to index
    %c0_86 = arith.constant 0 : index
    %c0_87 = arith.constant 0 : index
    %178 = vector.load %arg14[%177, %c0_86, %c0_87] : memref<8x8x32xf32, #tpu.memory_space<vmem>>, vector<1x8x32xf32>
    %179 = vector.shape_cast %178 : vector<1x8x32xf32> to vector<8x32xf32>
    %cst_88 = arith.constant dense<0.000000e+00> : vector<8x32xf32>
    %180 = tpu.matmul %166, %27, %cst_88 {dimension_numbers = #tpu.dot_dimension_numbers<[1], [0], [0], [1], [0, 0, 1, 1], [], []>} : vector<8x32xf32>, vector<32x32xf32>, vector<8x32xf32> -> vector<8x32xf32>
    %181 = arith.addf %179, %180 : vector<8x32xf32>
    %182 = arith.negf %181 : vector<8x32xf32>
    %183 = math.exp %182 : vector<8x32xf32>
    %cst_89 = arith.constant 1.000000e+00 : f32
    %184 = vector.broadcast %cst_89 : f32 to vector<8x32xf32>
    %185 = arith.addf %184, %183 : vector<8x32xf32>
    %186 = arith.divf %184, %185 : vector<8x32xf32>
    %187 = arith.index_cast %c4_i32 : i32 to index
    %c0_90 = arith.constant 0 : index
    %c0_91 = arith.constant 0 : index
    %188 = vector.load %arg15[%187, %c0_90, %c0_91] : memref<8x8x32xf32, #tpu.memory_space<vmem>>, vector<1x8x32xf32>
    %189 = vector.shape_cast %188 : vector<1x8x32xf32> to vector<8x32xf32>
    %cst_92 = arith.constant dense<0.000000e+00> : vector<8x32xf32>
    %190 = tpu.matmul %166, %28, %cst_92 {dimension_numbers = #tpu.dot_dimension_numbers<[1], [0], [0], [1], [0, 0, 1, 1], [], []>} : vector<8x32xf32>, vector<32x32xf32>, vector<8x32xf32> -> vector<8x32xf32>
    %191 = vector.broadcast %29 : vector<1x32xf32> to vector<8x32xf32>
    %192 = arith.addf %190, %191 : vector<8x32xf32>
    %193 = arith.mulf %176, %192 : vector<8x32xf32>
    %194 = arith.addf %189, %193 : vector<8x32xf32>
    %195 = math.tanh %194 : vector<8x32xf32>
    %cst_93 = arith.constant 1.000000e+00 : f32
    %196 = vector.broadcast %cst_93 : f32 to vector<8x32xf32>
    %197 = arith.subf %196, %186 : vector<8x32xf32>
    %198 = arith.mulf %197, %195 : vector<8x32xf32>
    %199 = arith.mulf %186, %166 : vector<8x32xf32>
    %200 = arith.addf %198, %199 : vector<8x32xf32>
    %c5_i32 = arith.constant 5 : i32
    %201 = arith.index_cast %c5_i32 : i32 to index
    %c0_94 = arith.constant 0 : index
    %c0_95 = arith.constant 0 : index
    %202 = vector.load %arg13[%201, %c0_94, %c0_95] : memref<8x8x32xf32, #tpu.memory_space<vmem>>, vector<1x8x32xf32>
    %203 = vector.shape_cast %202 : vector<1x8x32xf32> to vector<8x32xf32>
    %cst_96 = arith.constant dense<0.000000e+00> : vector<8x32xf32>
    %204 = tpu.matmul %200, %26, %cst_96 {dimension_numbers = #tpu.dot_dimension_numbers<[1], [0], [0], [1], [0, 0, 1, 1], [], []>} : vector<8x32xf32>, vector<32x32xf32>, vector<8x32xf32> -> vector<8x32xf32>
    %205 = arith.addf %203, %204 : vector<8x32xf32>
    %206 = arith.negf %205 : vector<8x32xf32>
    %207 = math.exp %206 : vector<8x32xf32>
    %cst_97 = arith.constant 1.000000e+00 : f32
    %208 = vector.broadcast %cst_97 : f32 to vector<8x32xf32>
    %209 = arith.addf %208, %207 : vector<8x32xf32>
    %210 = arith.divf %208, %209 : vector<8x32xf32>
    %211 = arith.index_cast %c5_i32 : i32 to index
    %c0_98 = arith.constant 0 : index
    %c0_99 = arith.constant 0 : index
    %212 = vector.load %arg14[%211, %c0_98, %c0_99] : memref<8x8x32xf32, #tpu.memory_space<vmem>>, vector<1x8x32xf32>
    %213 = vector.shape_cast %212 : vector<1x8x32xf32> to vector<8x32xf32>
    %cst_100 = arith.constant dense<0.000000e+00> : vector<8x32xf32>
    %214 = tpu.matmul %200, %27, %cst_100 {dimension_numbers = #tpu.dot_dimension_numbers<[1], [0], [0], [1], [0, 0, 1, 1], [], []>} : vector<8x32xf32>, vector<32x32xf32>, vector<8x32xf32> -> vector<8x32xf32>
    %215 = arith.addf %213, %214 : vector<8x32xf32>
    %216 = arith.negf %215 : vector<8x32xf32>
    %217 = math.exp %216 : vector<8x32xf32>
    %cst_101 = arith.constant 1.000000e+00 : f32
    %218 = vector.broadcast %cst_101 : f32 to vector<8x32xf32>
    %219 = arith.addf %218, %217 : vector<8x32xf32>
    %220 = arith.divf %218, %219 : vector<8x32xf32>
    %221 = arith.index_cast %c5_i32 : i32 to index
    %c0_102 = arith.constant 0 : index
    %c0_103 = arith.constant 0 : index
    %222 = vector.load %arg15[%221, %c0_102, %c0_103] : memref<8x8x32xf32, #tpu.memory_space<vmem>>, vector<1x8x32xf32>
    %223 = vector.shape_cast %222 : vector<1x8x32xf32> to vector<8x32xf32>
    %cst_104 = arith.constant dense<0.000000e+00> : vector<8x32xf32>
    %224 = tpu.matmul %200, %28, %cst_104 {dimension_numbers = #tpu.dot_dimension_numbers<[1], [0], [0], [1], [0, 0, 1, 1], [], []>} : vector<8x32xf32>, vector<32x32xf32>, vector<8x32xf32> -> vector<8x32xf32>
    %225 = vector.broadcast %29 : vector<1x32xf32> to vector<8x32xf32>
    %226 = arith.addf %224, %225 : vector<8x32xf32>
    %227 = arith.mulf %210, %226 : vector<8x32xf32>
    %228 = arith.addf %223, %227 : vector<8x32xf32>
    %229 = math.tanh %228 : vector<8x32xf32>
    %cst_105 = arith.constant 1.000000e+00 : f32
    %230 = vector.broadcast %cst_105 : f32 to vector<8x32xf32>
    %231 = arith.subf %230, %220 : vector<8x32xf32>
    %232 = arith.mulf %231, %229 : vector<8x32xf32>
    %233 = arith.mulf %220, %200 : vector<8x32xf32>
    %234 = arith.addf %232, %233 : vector<8x32xf32>
    %c6_i32 = arith.constant 6 : i32
    %235 = arith.index_cast %c6_i32 : i32 to index
    %c0_106 = arith.constant 0 : index
    %c0_107 = arith.constant 0 : index
    %236 = vector.load %arg13[%235, %c0_106, %c0_107] : memref<8x8x32xf32, #tpu.memory_space<vmem>>, vector<1x8x32xf32>
    %237 = vector.shape_cast %236 : vector<1x8x32xf32> to vector<8x32xf32>
    %cst_108 = arith.constant dense<0.000000e+00> : vector<8x32xf32>
    %238 = tpu.matmul %234, %26, %cst_108 {dimension_numbers = #tpu.dot_dimension_numbers<[1], [0], [0], [1], [0, 0, 1, 1], [], []>} : vector<8x32xf32>, vector<32x32xf32>, vector<8x32xf32> -> vector<8x32xf32>
    %239 = arith.addf %237, %238 : vector<8x32xf32>
    %240 = arith.negf %239 : vector<8x32xf32>
    %241 = math.exp %240 : vector<8x32xf32>
    %cst_109 = arith.constant 1.000000e+00 : f32
    %242 = vector.broadcast %cst_109 : f32 to vector<8x32xf32>
    %243 = arith.addf %242, %241 : vector<8x32xf32>
    %244 = arith.divf %242, %243 : vector<8x32xf32>
    %245 = arith.index_cast %c6_i32 : i32 to index
    %c0_110 = arith.constant 0 : index
    %c0_111 = arith.constant 0 : index
    %246 = vector.load %arg14[%245, %c0_110, %c0_111] : memref<8x8x32xf32, #tpu.memory_space<vmem>>, vector<1x8x32xf32>
    %247 = vector.shape_cast %246 : vector<1x8x32xf32> to vector<8x32xf32>
    %cst_112 = arith.constant dense<0.000000e+00> : vector<8x32xf32>
    %248 = tpu.matmul %234, %27, %cst_112 {dimension_numbers = #tpu.dot_dimension_numbers<[1], [0], [0], [1], [0, 0, 1, 1], [], []>} : vector<8x32xf32>, vector<32x32xf32>, vector<8x32xf32> -> vector<8x32xf32>
    %249 = arith.addf %247, %248 : vector<8x32xf32>
    %250 = arith.negf %249 : vector<8x32xf32>
    %251 = math.exp %250 : vector<8x32xf32>
    %cst_113 = arith.constant 1.000000e+00 : f32
    %252 = vector.broadcast %cst_113 : f32 to vector<8x32xf32>
    %253 = arith.addf %252, %251 : vector<8x32xf32>
    %254 = arith.divf %252, %253 : vector<8x32xf32>
    %255 = arith.index_cast %c6_i32 : i32 to index
    %c0_114 = arith.constant 0 : index
    %c0_115 = arith.constant 0 : index
    %256 = vector.load %arg15[%255, %c0_114, %c0_115] : memref<8x8x32xf32, #tpu.memory_space<vmem>>, vector<1x8x32xf32>
    %257 = vector.shape_cast %256 : vector<1x8x32xf32> to vector<8x32xf32>
    %cst_116 = arith.constant dense<0.000000e+00> : vector<8x32xf32>
    %258 = tpu.matmul %234, %28, %cst_116 {dimension_numbers = #tpu.dot_dimension_numbers<[1], [0], [0], [1], [0, 0, 1, 1], [], []>} : vector<8x32xf32>, vector<32x32xf32>, vector<8x32xf32> -> vector<8x32xf32>
    %259 = vector.broadcast %29 : vector<1x32xf32> to vector<8x32xf32>
    %260 = arith.addf %258, %259 : vector<8x32xf32>
    %261 = arith.mulf %244, %260 : vector<8x32xf32>
    %262 = arith.addf %257, %261 : vector<8x32xf32>
    %263 = math.tanh %262 : vector<8x32xf32>
    %cst_117 = arith.constant 1.000000e+00 : f32
    %264 = vector.broadcast %cst_117 : f32 to vector<8x32xf32>
    %265 = arith.subf %264, %254 : vector<8x32xf32>
    %266 = arith.mulf %265, %263 : vector<8x32xf32>
    %267 = arith.mulf %254, %234 : vector<8x32xf32>
    %268 = arith.addf %266, %267 : vector<8x32xf32>
    %c7_i32 = arith.constant 7 : i32
    %269 = arith.index_cast %c7_i32 : i32 to index
    %c0_118 = arith.constant 0 : index
    %c0_119 = arith.constant 0 : index
    %270 = vector.load %arg13[%269, %c0_118, %c0_119] : memref<8x8x32xf32, #tpu.memory_space<vmem>>, vector<1x8x32xf32>
    %271 = vector.shape_cast %270 : vector<1x8x32xf32> to vector<8x32xf32>
    %cst_120 = arith.constant dense<0.000000e+00> : vector<8x32xf32>
    %272 = tpu.matmul %268, %26, %cst_120 {dimension_numbers = #tpu.dot_dimension_numbers<[1], [0], [0], [1], [0, 0, 1, 1], [], []>} : vector<8x32xf32>, vector<32x32xf32>, vector<8x32xf32> -> vector<8x32xf32>
    %273 = arith.addf %271, %272 : vector<8x32xf32>
    %274 = arith.negf %273 : vector<8x32xf32>
    %275 = math.exp %274 : vector<8x32xf32>
    %cst_121 = arith.constant 1.000000e+00 : f32
    %276 = vector.broadcast %cst_121 : f32 to vector<8x32xf32>
    %277 = arith.addf %276, %275 : vector<8x32xf32>
    %278 = arith.divf %276, %277 : vector<8x32xf32>
    %279 = arith.index_cast %c7_i32 : i32 to index
    %c0_122 = arith.constant 0 : index
    %c0_123 = arith.constant 0 : index
    %280 = vector.load %arg14[%279, %c0_122, %c0_123] : memref<8x8x32xf32, #tpu.memory_space<vmem>>, vector<1x8x32xf32>
    %281 = vector.shape_cast %280 : vector<1x8x32xf32> to vector<8x32xf32>
    %cst_124 = arith.constant dense<0.000000e+00> : vector<8x32xf32>
    %282 = tpu.matmul %268, %27, %cst_124 {dimension_numbers = #tpu.dot_dimension_numbers<[1], [0], [0], [1], [0, 0, 1, 1], [], []>} : vector<8x32xf32>, vector<32x32xf32>, vector<8x32xf32> -> vector<8x32xf32>
    %283 = arith.addf %281, %282 : vector<8x32xf32>
    %284 = arith.negf %283 : vector<8x32xf32>
    %285 = math.exp %284 : vector<8x32xf32>
    %cst_125 = arith.constant 1.000000e+00 : f32
    %286 = vector.broadcast %cst_125 : f32 to vector<8x32xf32>
    %287 = arith.addf %286, %285 : vector<8x32xf32>
    %288 = arith.divf %286, %287 : vector<8x32xf32>
    %289 = arith.index_cast %c7_i32 : i32 to index
    %c0_126 = arith.constant 0 : index
    %c0_127 = arith.constant 0 : index
    %290 = vector.load %arg15[%289, %c0_126, %c0_127] : memref<8x8x32xf32, #tpu.memory_space<vmem>>, vector<1x8x32xf32>
    %291 = vector.shape_cast %290 : vector<1x8x32xf32> to vector<8x32xf32>
    %cst_128 = arith.constant dense<0.000000e+00> : vector<8x32xf32>
    %292 = tpu.matmul %268, %28, %cst_128 {dimension_numbers = #tpu.dot_dimension_numbers<[1], [0], [0], [1], [0, 0, 1, 1], [], []>} : vector<8x32xf32>, vector<32x32xf32>, vector<8x32xf32> -> vector<8x32xf32>
    %293 = vector.broadcast %29 : vector<1x32xf32> to vector<8x32xf32>
    %294 = arith.addf %292, %293 : vector<8x32xf32>
    %295 = arith.mulf %278, %294 : vector<8x32xf32>
    %296 = arith.addf %291, %295 : vector<8x32xf32>
    %297 = math.tanh %296 : vector<8x32xf32>
    %cst_129 = arith.constant 1.000000e+00 : f32
    %298 = vector.broadcast %cst_129 : f32 to vector<8x32xf32>
    %299 = arith.subf %298, %288 : vector<8x32xf32>
    %300 = arith.mulf %299, %297 : vector<8x32xf32>
    %301 = arith.mulf %288, %268 : vector<8x32xf32>
    %302 = arith.addf %300, %301 : vector<8x32xf32>
    %c8_i32 = arith.constant 8 : i32
    %c0_130 = arith.constant 0 : index
    %c0_131 = arith.constant 0 : index
    %303 = vector.load %arg12[%c0_130, %c0_131] : memref<8x32xf32, #tpu.memory_space<vmem>>, vector<8x32xf32>
    tpu.vector_store %arg12[%c0_130, %c0_131], %302 {strides = array<i32>} : memref<8x32xf32, #tpu.memory_space<vmem>>, vector<8x32xf32>,
    return
  }
  func.func @transform_0(%arg0: i32) -> (i32, i32, i32) {
    %c0_i32 = arith.constant 0 : i32
    %c0_i32_0 = arith.constant 0 : i32
    %c0_i32_1 = arith.constant 0 : i32
    return %c0_i32, %arg0, %c0_i32_0 : i32, i32, i32
  }
  func.func @transform_1(%arg0: i32) -> (i32, i32) {
    %c0_i32 = arith.constant 0 : i32
    %c0_i32_0 = arith.constant 0 : i32
    %c0_i32_1 = arith.constant 0 : i32
    return %c0_i32, %c0_i32_0 : i32, i32
  }
  func.func @transform_2(%arg0: i32) -> (i32, i32) {
    %c0_i32 = arith.constant 0 : i32
    %c0_i32_0 = arith.constant 0 : i32
    %c0_i32_1 = arith.constant 0 : i32
    return %c0_i32, %c0_i32_0 : i32, i32
  }
  func.func @transform_3(%arg0: i32) -> (i32, i32) {
    %c0_i32 = arith.constant 0 : i32
    %c0_i32_0 = arith.constant 0 : i32
    %c0_i32_1 = arith.constant 0 : i32
    return %c0_i32, %c0_i32_0 : i32, i32
  }
  func.func @transform_4(%arg0: i32) -> (i32, i32) {
    %c0_i32 = arith.constant 0 : i32
    %c0_i32_0 = arith.constant 0 : i32
    %c0_i32_1 = arith.constant 0 : i32
    return %c0_i32, %c0_i32_0 : i32, i32
  }
  func.func @transform_5(%arg0: i32) -> (i32, i32) {
    %c0_i32 = arith.constant 0 : i32
    %c0_i32_0 = arith.constant 0 : i32
    %c0_i32_1 = arith.constant 0 : i32
    return %c0_i32, %c0_i32_0 : i32, i32
  }
  func.func @transform_6(%arg0: i32) -> (i32, i32) {
    %c0_i32 = arith.constant 0 : i32
    %c0_i32_0 = arith.constant 0 : i32
    %c0_i32_1 = arith.constant 0 : i32
    return %c0_i32, %c0_i32_0 : i32, i32
  }
  func.func @transform_7(%arg0: i32) -> (i32, i32) {
    %c0_i32 = arith.constant 0 : i32
    %c0_i32_0 = arith.constant 0 : i32
    %c0_i32_1 = arith.constant 0 : i32
    return %c0_i32, %c0_i32_0 : i32, i32
  }
  func.func @transform_8(%arg0: i32) -> (i32, i32) {
    %c0_i32 = arith.constant 0 : i32
    %c0_i32_0 = arith.constant 0 : i32
    %c0_i32_1 = arith.constant 0 : i32
    return %c0_i32, %c0_i32_0 : i32, i32
  }
  func.func @transform_9(%arg0: i32) -> (i32, i32) {
    %c0_i32 = arith.constant 0 : i32
    %c0_i32_0 = arith.constant 0 : i32
    %c0_i32_1 = arith.constant 0 : i32
    return %c0_i32, %c0_i32_0 : i32, i32
  }
  func.func @transform_10(%arg0: i32) -> (i32, i32) {
    %c0_i32 = arith.constant 0 : i32
    %c0_i32_0 = arith.constant 0 : i32
    %c0_i32_1 = arith.constant 0 : i32
    return %c0_i32, %c0_i32_0 : i32, i32
  }
  func.func @transform_11(%arg0: i32) -> (i32, i32) {
    %c0_i32 = arith.constant 0 : i32
    %c0_i32_0 = arith.constant 0 : i32
    return %arg0, %c0_i32 : i32, i32
  }
}

module attributes {stable_mosaic.version = 11 : i64} {
  func.func @_decoder_gru_kernel(%arg0: i32, %arg1: memref<8x8x16xf32, #tpu.memory_space<vmem>>, %arg2: memref<8x32xf32, #tpu.memory_space<vmem>>, %arg3: memref<16x32xf32, #tpu.memory_space<vmem>>, %arg4: memref<16x32xf32, #tpu.memory_space<vmem>>, %arg5: memref<16x32xf32, #tpu.memory_space<vmem>>, %arg6: memref<32x32xf32, #tpu.memory_space<vmem>>, %arg7: memref<32x32xf32, #tpu.memory_space<vmem>>, %arg8: memref<32x32xf32, #tpu.memory_space<vmem>>, %arg9: memref<32x32xf32, #tpu.memory_space<vmem>>, %arg10: memref<32x32xf32, #tpu.memory_space<vmem>>, %arg11: memref<32x32xf32, #tpu.memory_space<vmem>>, %arg12: memref<1x32xf32, #tpu.memory_space<vmem>>, %arg13: memref<1x32xf32, #tpu.memory_space<vmem>>, %arg14: memref<1x32xf32, #tpu.memory_space<vmem>>, %arg15: memref<1x32xf32, #tpu.memory_space<vmem>>, %arg16: memref<8x8x32xf32, #tpu.memory_space<vmem>>, %arg17: memref<8x8x32xf32, #tpu.memory_space<vmem>>, %arg18: memref<8x8x32xf32, #tpu.memory_space<vmem>>, %arg19: memref<8x8x32xf32, #tpu.memory_space<vmem>>) attributes {dimension_semantics = [#tpu.dimension_semantics<parallel>], iteration_bounds = array<i64: 1>, scalar_prefetch = 0 : i64, scratch_operands = 3 : i64, tpu.core_type = #tpu.core_type<tc>, window_params = [{transform_indices = @transform_0, window_bounds = array<i64: 8, 8, 16>}, {transform_indices = @transform_1, window_bounds = array<i64: 8, 32>}, {pipeline_mode = #tpu.pipeline_mode<synchronous>, transform_indices = @transform_2, window_bounds = array<i64: 16, 32>}, {pipeline_mode = #tpu.pipeline_mode<synchronous>, transform_indices = @transform_3, window_bounds = array<i64: 16, 32>}, {pipeline_mode = #tpu.pipeline_mode<synchronous>, transform_indices = @transform_4, window_bounds = array<i64: 16, 32>}, {pipeline_mode = #tpu.pipeline_mode<synchronous>, transform_indices = @transform_5, window_bounds = array<i64: 32, 32>}, {pipeline_mode = #tpu.pipeline_mode<synchronous>, transform_indices = @transform_6, window_bounds = array<i64: 32, 32>}, {pipeline_mode = #tpu.pipeline_mode<synchronous>, transform_indices = @transform_7, window_bounds = array<i64: 32, 32>}, {pipeline_mode = #tpu.pipeline_mode<synchronous>, transform_indices = @transform_8, window_bounds = array<i64: 32, 32>}, {pipeline_mode = #tpu.pipeline_mode<synchronous>, transform_indices = @transform_9, window_bounds = array<i64: 32, 32>}, {pipeline_mode = #tpu.pipeline_mode<synchronous>, transform_indices = @transform_10, window_bounds = array<i64: 32, 32>}, {pipeline_mode = #tpu.pipeline_mode<synchronous>, transform_indices = @transform_11, window_bounds = array<i64: 1, 32>}, {pipeline_mode = #tpu.pipeline_mode<synchronous>, transform_indices = @transform_12, window_bounds = array<i64: 1, 32>}, {pipeline_mode = #tpu.pipeline_mode<synchronous>, transform_indices = @transform_13, window_bounds = array<i64: 1, 32>}, {pipeline_mode = #tpu.pipeline_mode<synchronous>, transform_indices = @transform_14, window_bounds = array<i64: 1, 32>}, {transform_indices = @transform_15, window_bounds = array<i64: 8, 8, 32>}]} {
    %c0 = arith.constant 0 : index
    %c0_0 = arith.constant 0 : index
    %0 = vector.load %arg2[%c0, %c0_0] : memref<8x32xf32, #tpu.memory_space<vmem>>, vector<8x32xf32>
    %c0_1 = arith.constant 0 : index
    %c0_2 = arith.constant 0 : index
    %1 = vector.load %arg6[%c0_1, %c0_2] : memref<32x32xf32, #tpu.memory_space<vmem>>, vector<32x32xf32>
    %cst = arith.constant dense<0.000000e+00> : vector<8x32xf32>
    %2 = tpu.matmul %0, %1, %cst {dimension_numbers = #tpu.dot_dimension_numbers<[1], [0], [0], [1], [0, 0, 1, 1], [], []>} : vector<8x32xf32>, vector<32x32xf32>, vector<8x32xf32> -> vector<8x32xf32>
    %c0_3 = arith.constant 0 : index
    %c0_4 = arith.constant 0 : index
    %3 = vector.load %arg12[%c0_3, %c0_4] : memref<1x32xf32, #tpu.memory_space<vmem>>, vector<1x32xf32>
    %4 = vector.broadcast %3 : vector<1x32xf32> to vector<8x32xf32>
    %5 = arith.addf %2, %4 : vector<8x32xf32>
    %c0_5 = arith.constant 0 : index
    %c0_6 = arith.constant 0 : index
    %6 = vector.load %arg7[%c0_5, %c0_6] : memref<32x32xf32, #tpu.memory_space<vmem>>, vector<32x32xf32>
    %cst_7 = arith.constant dense<0.000000e+00> : vector<8x32xf32>
    %7 = tpu.matmul %0, %6, %cst_7 {dimension_numbers = #tpu.dot_dimension_numbers<[1], [0], [0], [1], [0, 0, 1, 1], [], []>} : vector<8x32xf32>, vector<32x32xf32>, vector<8x32xf32> -> vector<8x32xf32>
    %c0_8 = arith.constant 0 : index
    %c0_9 = arith.constant 0 : index
    %8 = vector.load %arg13[%c0_8, %c0_9] : memref<1x32xf32, #tpu.memory_space<vmem>>, vector<1x32xf32>
    %9 = vector.broadcast %8 : vector<1x32xf32> to vector<8x32xf32>
    %10 = arith.addf %7, %9 : vector<8x32xf32>
    %c0_10 = arith.constant 0 : index
    %c0_11 = arith.constant 0 : index
    %11 = vector.load %arg8[%c0_10, %c0_11] : memref<32x32xf32, #tpu.memory_space<vmem>>, vector<32x32xf32>
    %cst_12 = arith.constant dense<0.000000e+00> : vector<8x32xf32>
    %12 = tpu.matmul %0, %11, %cst_12 {dimension_numbers = #tpu.dot_dimension_numbers<[1], [0], [0], [1], [0, 0, 1, 1], [], []>} : vector<8x32xf32>, vector<32x32xf32>, vector<8x32xf32> -> vector<8x32xf32>
    %c0_13 = arith.constant 0 : index
    %c0_14 = arith.constant 0 : index
    %13 = vector.load %arg14[%c0_13, %c0_14] : memref<1x32xf32, #tpu.memory_space<vmem>>, vector<1x32xf32>
    %14 = vector.broadcast %13 : vector<1x32xf32> to vector<8x32xf32>
    %15 = arith.addf %12, %14 : vector<8x32xf32>
    %c0_15 = arith.constant 0 : index
    %c0_16 = arith.constant 0 : index
    %c0_17 = arith.constant 0 : index
    %16 = vector.load %arg1[%c0_15, %c0_16, %c0_17] : memref<8x8x16xf32, #tpu.memory_space<vmem>>, vector<8x8x16xf32>
    %17 = vector.shape_cast %16 : vector<8x8x16xf32> to vector<64x16xf32>
    %c0_18 = arith.constant 0 : index
    %c0_19 = arith.constant 0 : index
    %18 = vector.load %arg3[%c0_18, %c0_19] : memref<16x32xf32, #tpu.memory_space<vmem>>, vector<16x32xf32>
    %cst_20 = arith.constant dense<0.000000e+00> : vector<64x32xf32>
    %19 = tpu.matmul %17, %18, %cst_20 {dimension_numbers = #tpu.dot_dimension_numbers<[1], [0], [0], [1], [0, 0, 1, 1], [], []>} : vector<64x16xf32>, vector<16x32xf32>, vector<64x32xf32> -> vector<64x32xf32>
    %20 = vector.shape_cast %19 : vector<64x32xf32> to vector<8x8x32xf32>
    %21 = vector.shape_cast %5 : vector<8x32xf32> to vector<1x8x32xf32>
    %22 = vector.broadcast %21 : vector<1x8x32xf32> to vector<8x8x32xf32>
    %23 = arith.addf %20, %22 : vector<8x8x32xf32>
    %c0_21 = arith.constant 0 : index
    %c0_22 = arith.constant 0 : index
    %c0_23 = arith.constant 0 : index
    %24 = vector.load %arg17[%c0_21, %c0_22, %c0_23] : memref<8x8x32xf32, #tpu.memory_space<vmem>>, vector<8x8x32xf32>
    tpu.vector_store %arg17[%c0_21, %c0_22, %c0_23], %23 {strides = array<i32>} : memref<8x8x32xf32, #tpu.memory_space<vmem>>, vector<8x8x32xf32>,
    %c0_24 = arith.constant 0 : index
    %c0_25 = arith.constant 0 : index
    %25 = vector.load %arg4[%c0_24, %c0_25] : memref<16x32xf32, #tpu.memory_space<vmem>>, vector<16x32xf32>
    %cst_26 = arith.constant dense<0.000000e+00> : vector<64x32xf32>
    %26 = tpu.matmul %17, %25, %cst_26 {dimension_numbers = #tpu.dot_dimension_numbers<[1], [0], [0], [1], [0, 0, 1, 1], [], []>} : vector<64x16xf32>, vector<16x32xf32>, vector<64x32xf32> -> vector<64x32xf32>
    %27 = vector.shape_cast %26 : vector<64x32xf32> to vector<8x8x32xf32>
    %28 = vector.shape_cast %10 : vector<8x32xf32> to vector<1x8x32xf32>
    %29 = vector.broadcast %28 : vector<1x8x32xf32> to vector<8x8x32xf32>
    %30 = arith.addf %27, %29 : vector<8x8x32xf32>
    %c0_27 = arith.constant 0 : index
    %c0_28 = arith.constant 0 : index
    %c0_29 = arith.constant 0 : index
    %31 = vector.load %arg18[%c0_27, %c0_28, %c0_29] : memref<8x8x32xf32, #tpu.memory_space<vmem>>, vector<8x8x32xf32>
    tpu.vector_store %arg18[%c0_27, %c0_28, %c0_29], %30 {strides = array<i32>} : memref<8x8x32xf32, #tpu.memory_space<vmem>>, vector<8x8x32xf32>,
    %c0_30 = arith.constant 0 : index
    %c0_31 = arith.constant 0 : index
    %32 = vector.load %arg5[%c0_30, %c0_31] : memref<16x32xf32, #tpu.memory_space<vmem>>, vector<16x32xf32>
    %cst_32 = arith.constant dense<0.000000e+00> : vector<64x32xf32>
    %33 = tpu.matmul %17, %32, %cst_32 {dimension_numbers = #tpu.dot_dimension_numbers<[1], [0], [0], [1], [0, 0, 1, 1], [], []>} : vector<64x16xf32>, vector<16x32xf32>, vector<64x32xf32> -> vector<64x32xf32>
    %34 = vector.shape_cast %33 : vector<64x32xf32> to vector<8x8x32xf32>
    %35 = vector.shape_cast %15 : vector<8x32xf32> to vector<1x8x32xf32>
    %36 = vector.broadcast %35 : vector<1x8x32xf32> to vector<8x8x32xf32>
    %37 = arith.addf %34, %36 : vector<8x8x32xf32>
    %c0_33 = arith.constant 0 : index
    %c0_34 = arith.constant 0 : index
    %c0_35 = arith.constant 0 : index
    %38 = vector.load %arg19[%c0_33, %c0_34, %c0_35] : memref<8x8x32xf32, #tpu.memory_space<vmem>>, vector<8x8x32xf32>
    tpu.vector_store %arg19[%c0_33, %c0_34, %c0_35], %37 {strides = array<i32>} : memref<8x8x32xf32, #tpu.memory_space<vmem>>, vector<8x8x32xf32>,
    %c0_36 = arith.constant 0 : index
    %c0_37 = arith.constant 0 : index
    %39 = vector.load %arg9[%c0_36, %c0_37] : memref<32x32xf32, #tpu.memory_space<vmem>>, vector<32x32xf32>
    %c0_38 = arith.constant 0 : index
    %c0_39 = arith.constant 0 : index
    %40 = vector.load %arg10[%c0_38, %c0_39] : memref<32x32xf32, #tpu.memory_space<vmem>>, vector<32x32xf32>
    %c0_40 = arith.constant 0 : index
    %c0_41 = arith.constant 0 : index
    %41 = vector.load %arg11[%c0_40, %c0_41] : memref<32x32xf32, #tpu.memory_space<vmem>>, vector<32x32xf32>
    %c0_42 = arith.constant 0 : index
    %c0_43 = arith.constant 0 : index
    %42 = vector.load %arg15[%c0_42, %c0_43] : memref<1x32xf32, #tpu.memory_space<vmem>>, vector<1x32xf32>
    %cst_44 = arith.constant 0.000000e+00 : f32
    %43 = vector.broadcast %cst_44 : f32 to vector<8x32xf32>
    %c0_45 = arith.constant 0 : index
    %c0_46 = arith.constant 0 : index
    %c0_47 = arith.constant 0 : index
    %44 = vector.load %arg16[%c0_45, %c0_46, %c0_47] : memref<8x8x32xf32, #tpu.memory_space<vmem>>, vector<1x8x32xf32>
    %45 = vector.shape_cast %44 : vector<1x8x32xf32> to vector<8x32xf32>
    %46 = vector.shape_cast %43 : vector<8x32xf32> to vector<1x8x32xf32>
    tpu.vector_store %arg16[%c0_45, %c0_46, %c0_47], %46 {strides = array<i32>} : memref<8x8x32xf32, #tpu.memory_space<vmem>>, vector<1x8x32xf32>,
    %c0_i32 = arith.constant 0 : i32
    %c1_i32 = arith.constant 1 : i32
    %47 = arith.addi %c0_i32, %c1_i32 : i32
    %48 = arith.index_cast %47 : i32 to index
    %c0_48 = arith.constant 0 : index
    %c0_49 = arith.constant 0 : index
    %49 = vector.load %arg17[%48, %c0_48, %c0_49] : memref<8x8x32xf32, #tpu.memory_space<vmem>>, vector<1x8x32xf32>
    %50 = vector.shape_cast %49 : vector<1x8x32xf32> to vector<8x32xf32>
    %cst_50 = arith.constant dense<0.000000e+00> : vector<8x32xf32>
    %51 = tpu.matmul %0, %39, %cst_50 {dimension_numbers = #tpu.dot_dimension_numbers<[1], [0], [0], [1], [0, 0, 1, 1], [], []>} : vector<8x32xf32>, vector<32x32xf32>, vector<8x32xf32> -> vector<8x32xf32>
    %52 = arith.addf %50, %51 : vector<8x32xf32>
    %53 = arith.negf %52 : vector<8x32xf32>
    %54 = math.exp %53 : vector<8x32xf32>
    %cst_51 = arith.constant 1.000000e+00 : f32
    %55 = vector.broadcast %cst_51 : f32 to vector<8x32xf32>
    %56 = arith.addf %55, %54 : vector<8x32xf32>
    %57 = arith.divf %55, %56 : vector<8x32xf32>
    %c1_i32_52 = arith.constant 1 : i32
    %58 = arith.addi %c0_i32, %c1_i32_52 : i32
    %59 = arith.index_cast %58 : i32 to index
    %c0_53 = arith.constant 0 : index
    %c0_54 = arith.constant 0 : index
    %60 = vector.load %arg18[%59, %c0_53, %c0_54] : memref<8x8x32xf32, #tpu.memory_space<vmem>>, vector<1x8x32xf32>
    %61 = vector.shape_cast %60 : vector<1x8x32xf32> to vector<8x32xf32>
    %cst_55 = arith.constant dense<0.000000e+00> : vector<8x32xf32>
    %62 = tpu.matmul %0, %40, %cst_55 {dimension_numbers = #tpu.dot_dimension_numbers<[1], [0], [0], [1], [0, 0, 1, 1], [], []>} : vector<8x32xf32>, vector<32x32xf32>, vector<8x32xf32> -> vector<8x32xf32>
    %63 = arith.addf %61, %62 : vector<8x32xf32>
    %64 = arith.negf %63 : vector<8x32xf32>
    %65 = math.exp %64 : vector<8x32xf32>
    %cst_56 = arith.constant 1.000000e+00 : f32
    %66 = vector.broadcast %cst_56 : f32 to vector<8x32xf32>
    %67 = arith.addf %66, %65 : vector<8x32xf32>
    %68 = arith.divf %66, %67 : vector<8x32xf32>
    %c1_i32_57 = arith.constant 1 : i32
    %69 = arith.addi %c0_i32, %c1_i32_57 : i32
    %70 = arith.index_cast %69 : i32 to index
    %c0_58 = arith.constant 0 : index
    %c0_59 = arith.constant 0 : index
    %71 = vector.load %arg19[%70, %c0_58, %c0_59] : memref<8x8x32xf32, #tpu.memory_space<vmem>>, vector<1x8x32xf32>
    %72 = vector.shape_cast %71 : vector<1x8x32xf32> to vector<8x32xf32>
    %cst_60 = arith.constant dense<0.000000e+00> : vector<8x32xf32>
    %73 = tpu.matmul %0, %41, %cst_60 {dimension_numbers = #tpu.dot_dimension_numbers<[1], [0], [0], [1], [0, 0, 1, 1], [], []>} : vector<8x32xf32>, vector<32x32xf32>, vector<8x32xf32> -> vector<8x32xf32>
    %74 = vector.broadcast %42 : vector<1x32xf32> to vector<8x32xf32>
    %75 = arith.addf %73, %74 : vector<8x32xf32>
    %76 = arith.mulf %57, %75 : vector<8x32xf32>
    %77 = arith.addf %72, %76 : vector<8x32xf32>
    %78 = math.tanh %77 : vector<8x32xf32>
    %cst_61 = arith.constant 1.000000e+00 : f32
    %79 = vector.broadcast %cst_61 : f32 to vector<8x32xf32>
    %80 = arith.subf %79, %68 : vector<8x32xf32>
    %81 = arith.mulf %80, %78 : vector<8x32xf32>
    %82 = arith.mulf %68, %0 : vector<8x32xf32>
    %83 = arith.addf %81, %82 : vector<8x32xf32>
    %c1_i32_62 = arith.constant 1 : i32
    %84 = arith.addi %c0_i32, %c1_i32_62 : i32
    %85 = arith.index_cast %84 : i32 to index
    %c0_63 = arith.constant 0 : index
    %c0_64 = arith.constant 0 : index
    %86 = vector.load %arg16[%85, %c0_63, %c0_64] : memref<8x8x32xf32, #tpu.memory_space<vmem>>, vector<1x8x32xf32>
    %87 = vector.shape_cast %86 : vector<1x8x32xf32> to vector<8x32xf32>
    %88 = vector.shape_cast %83 : vector<8x32xf32> to vector<1x8x32xf32>
    tpu.vector_store %arg16[%85, %c0_63, %c0_64], %88 {strides = array<i32>} : memref<8x8x32xf32, #tpu.memory_space<vmem>>, vector<1x8x32xf32>,
    %c1_i32_65 = arith.constant 1 : i32
    %c1_i32_66 = arith.constant 1 : i32
    %89 = arith.addi %c1_i32_65, %c1_i32_66 : i32
    %90 = arith.index_cast %89 : i32 to index
    %c0_67 = arith.constant 0 : index
    %c0_68 = arith.constant 0 : index
    %91 = vector.load %arg17[%90, %c0_67, %c0_68] : memref<8x8x32xf32, #tpu.memory_space<vmem>>, vector<1x8x32xf32>
    %92 = vector.shape_cast %91 : vector<1x8x32xf32> to vector<8x32xf32>
    %cst_69 = arith.constant dense<0.000000e+00> : vector<8x32xf32>
    %93 = tpu.matmul %83, %39, %cst_69 {dimension_numbers = #tpu.dot_dimension_numbers<[1], [0], [0], [1], [0, 0, 1, 1], [], []>} : vector<8x32xf32>, vector<32x32xf32>, vector<8x32xf32> -> vector<8x32xf32>
    %94 = arith.addf %92, %93 : vector<8x32xf32>
    %95 = arith.negf %94 : vector<8x32xf32>
    %96 = math.exp %95 : vector<8x32xf32>
    %cst_70 = arith.constant 1.000000e+00 : f32
    %97 = vector.broadcast %cst_70 : f32 to vector<8x32xf32>
    %98 = arith.addf %97, %96 : vector<8x32xf32>
    %99 = arith.divf %97, %98 : vector<8x32xf32>
    %c1_i32_71 = arith.constant 1 : i32
    %100 = arith.addi %c1_i32_65, %c1_i32_71 : i32
    %101 = arith.index_cast %100 : i32 to index
    %c0_72 = arith.constant 0 : index
    %c0_73 = arith.constant 0 : index
    %102 = vector.load %arg18[%101, %c0_72, %c0_73] : memref<8x8x32xf32, #tpu.memory_space<vmem>>, vector<1x8x32xf32>
    %103 = vector.shape_cast %102 : vector<1x8x32xf32> to vector<8x32xf32>
    %cst_74 = arith.constant dense<0.000000e+00> : vector<8x32xf32>
    %104 = tpu.matmul %83, %40, %cst_74 {dimension_numbers = #tpu.dot_dimension_numbers<[1], [0], [0], [1], [0, 0, 1, 1], [], []>} : vector<8x32xf32>, vector<32x32xf32>, vector<8x32xf32> -> vector<8x32xf32>
    %105 = arith.addf %103, %104 : vector<8x32xf32>
    %106 = arith.negf %105 : vector<8x32xf32>
    %107 = math.exp %106 : vector<8x32xf32>
    %cst_75 = arith.constant 1.000000e+00 : f32
    %108 = vector.broadcast %cst_75 : f32 to vector<8x32xf32>
    %109 = arith.addf %108, %107 : vector<8x32xf32>
    %110 = arith.divf %108, %109 : vector<8x32xf32>
    %c1_i32_76 = arith.constant 1 : i32
    %111 = arith.addi %c1_i32_65, %c1_i32_76 : i32
    %112 = arith.index_cast %111 : i32 to index
    %c0_77 = arith.constant 0 : index
    %c0_78 = arith.constant 0 : index
    %113 = vector.load %arg19[%112, %c0_77, %c0_78] : memref<8x8x32xf32, #tpu.memory_space<vmem>>, vector<1x8x32xf32>
    %114 = vector.shape_cast %113 : vector<1x8x32xf32> to vector<8x32xf32>
    %cst_79 = arith.constant dense<0.000000e+00> : vector<8x32xf32>
    %115 = tpu.matmul %83, %41, %cst_79 {dimension_numbers = #tpu.dot_dimension_numbers<[1], [0], [0], [1], [0, 0, 1, 1], [], []>} : vector<8x32xf32>, vector<32x32xf32>, vector<8x32xf32> -> vector<8x32xf32>
    %116 = vector.broadcast %42 : vector<1x32xf32> to vector<8x32xf32>
    %117 = arith.addf %115, %116 : vector<8x32xf32>
    %118 = arith.mulf %99, %117 : vector<8x32xf32>
    %119 = arith.addf %114, %118 : vector<8x32xf32>
    %120 = math.tanh %119 : vector<8x32xf32>
    %cst_80 = arith.constant 1.000000e+00 : f32
    %121 = vector.broadcast %cst_80 : f32 to vector<8x32xf32>
    %122 = arith.subf %121, %110 : vector<8x32xf32>
    %123 = arith.mulf %122, %120 : vector<8x32xf32>
    %124 = arith.mulf %110, %83 : vector<8x32xf32>
    %125 = arith.addf %123, %124 : vector<8x32xf32>
    %c1_i32_81 = arith.constant 1 : i32
    %126 = arith.addi %c1_i32_65, %c1_i32_81 : i32
    %127 = arith.index_cast %126 : i32 to index
    %c0_82 = arith.constant 0 : index
    %c0_83 = arith.constant 0 : index
    %128 = vector.load %arg16[%127, %c0_82, %c0_83] : memref<8x8x32xf32, #tpu.memory_space<vmem>>, vector<1x8x32xf32>
    %129 = vector.shape_cast %128 : vector<1x8x32xf32> to vector<8x32xf32>
    %130 = vector.shape_cast %125 : vector<8x32xf32> to vector<1x8x32xf32>
    tpu.vector_store %arg16[%127, %c0_82, %c0_83], %130 {strides = array<i32>} : memref<8x8x32xf32, #tpu.memory_space<vmem>>, vector<1x8x32xf32>,
    %c2_i32 = arith.constant 2 : i32
    %c1_i32_84 = arith.constant 1 : i32
    %131 = arith.addi %c2_i32, %c1_i32_84 : i32
    %132 = arith.index_cast %131 : i32 to index
    %c0_85 = arith.constant 0 : index
    %c0_86 = arith.constant 0 : index
    %133 = vector.load %arg17[%132, %c0_85, %c0_86] : memref<8x8x32xf32, #tpu.memory_space<vmem>>, vector<1x8x32xf32>
    %134 = vector.shape_cast %133 : vector<1x8x32xf32> to vector<8x32xf32>
    %cst_87 = arith.constant dense<0.000000e+00> : vector<8x32xf32>
    %135 = tpu.matmul %125, %39, %cst_87 {dimension_numbers = #tpu.dot_dimension_numbers<[1], [0], [0], [1], [0, 0, 1, 1], [], []>} : vector<8x32xf32>, vector<32x32xf32>, vector<8x32xf32> -> vector<8x32xf32>
    %136 = arith.addf %134, %135 : vector<8x32xf32>
    %137 = arith.negf %136 : vector<8x32xf32>
    %138 = math.exp %137 : vector<8x32xf32>
    %cst_88 = arith.constant 1.000000e+00 : f32
    %139 = vector.broadcast %cst_88 : f32 to vector<8x32xf32>
    %140 = arith.addf %139, %138 : vector<8x32xf32>
    %141 = arith.divf %139, %140 : vector<8x32xf32>
    %c1_i32_89 = arith.constant 1 : i32
    %142 = arith.addi %c2_i32, %c1_i32_89 : i32
    %143 = arith.index_cast %142 : i32 to index
    %c0_90 = arith.constant 0 : index
    %c0_91 = arith.constant 0 : index
    %144 = vector.load %arg18[%143, %c0_90, %c0_91] : memref<8x8x32xf32, #tpu.memory_space<vmem>>, vector<1x8x32xf32>
    %145 = vector.shape_cast %144 : vector<1x8x32xf32> to vector<8x32xf32>
    %cst_92 = arith.constant dense<0.000000e+00> : vector<8x32xf32>
    %146 = tpu.matmul %125, %40, %cst_92 {dimension_numbers = #tpu.dot_dimension_numbers<[1], [0], [0], [1], [0, 0, 1, 1], [], []>} : vector<8x32xf32>, vector<32x32xf32>, vector<8x32xf32> -> vector<8x32xf32>
    %147 = arith.addf %145, %146 : vector<8x32xf32>
    %148 = arith.negf %147 : vector<8x32xf32>
    %149 = math.exp %148 : vector<8x32xf32>
    %cst_93 = arith.constant 1.000000e+00 : f32
    %150 = vector.broadcast %cst_93 : f32 to vector<8x32xf32>
    %151 = arith.addf %150, %149 : vector<8x32xf32>
    %152 = arith.divf %150, %151 : vector<8x32xf32>
    %c1_i32_94 = arith.constant 1 : i32
    %153 = arith.addi %c2_i32, %c1_i32_94 : i32
    %154 = arith.index_cast %153 : i32 to index
    %c0_95 = arith.constant 0 : index
    %c0_96 = arith.constant 0 : index
    %155 = vector.load %arg19[%154, %c0_95, %c0_96] : memref<8x8x32xf32, #tpu.memory_space<vmem>>, vector<1x8x32xf32>
    %156 = vector.shape_cast %155 : vector<1x8x32xf32> to vector<8x32xf32>
    %cst_97 = arith.constant dense<0.000000e+00> : vector<8x32xf32>
    %157 = tpu.matmul %125, %41, %cst_97 {dimension_numbers = #tpu.dot_dimension_numbers<[1], [0], [0], [1], [0, 0, 1, 1], [], []>} : vector<8x32xf32>, vector<32x32xf32>, vector<8x32xf32> -> vector<8x32xf32>
    %158 = vector.broadcast %42 : vector<1x32xf32> to vector<8x32xf32>
    %159 = arith.addf %157, %158 : vector<8x32xf32>
    %160 = arith.mulf %141, %159 : vector<8x32xf32>
    %161 = arith.addf %156, %160 : vector<8x32xf32>
    %162 = math.tanh %161 : vector<8x32xf32>
    %cst_98 = arith.constant 1.000000e+00 : f32
    %163 = vector.broadcast %cst_98 : f32 to vector<8x32xf32>
    %164 = arith.subf %163, %152 : vector<8x32xf32>
    %165 = arith.mulf %164, %162 : vector<8x32xf32>
    %166 = arith.mulf %152, %125 : vector<8x32xf32>
    %167 = arith.addf %165, %166 : vector<8x32xf32>
    %c1_i32_99 = arith.constant 1 : i32
    %168 = arith.addi %c2_i32, %c1_i32_99 : i32
    %169 = arith.index_cast %168 : i32 to index
    %c0_100 = arith.constant 0 : index
    %c0_101 = arith.constant 0 : index
    %170 = vector.load %arg16[%169, %c0_100, %c0_101] : memref<8x8x32xf32, #tpu.memory_space<vmem>>, vector<1x8x32xf32>
    %171 = vector.shape_cast %170 : vector<1x8x32xf32> to vector<8x32xf32>
    %172 = vector.shape_cast %167 : vector<8x32xf32> to vector<1x8x32xf32>
    tpu.vector_store %arg16[%169, %c0_100, %c0_101], %172 {strides = array<i32>} : memref<8x8x32xf32, #tpu.memory_space<vmem>>, vector<1x8x32xf32>,
    %c3_i32 = arith.constant 3 : i32
    %c1_i32_102 = arith.constant 1 : i32
    %173 = arith.addi %c3_i32, %c1_i32_102 : i32
    %174 = arith.index_cast %173 : i32 to index
    %c0_103 = arith.constant 0 : index
    %c0_104 = arith.constant 0 : index
    %175 = vector.load %arg17[%174, %c0_103, %c0_104] : memref<8x8x32xf32, #tpu.memory_space<vmem>>, vector<1x8x32xf32>
    %176 = vector.shape_cast %175 : vector<1x8x32xf32> to vector<8x32xf32>
    %cst_105 = arith.constant dense<0.000000e+00> : vector<8x32xf32>
    %177 = tpu.matmul %167, %39, %cst_105 {dimension_numbers = #tpu.dot_dimension_numbers<[1], [0], [0], [1], [0, 0, 1, 1], [], []>} : vector<8x32xf32>, vector<32x32xf32>, vector<8x32xf32> -> vector<8x32xf32>
    %178 = arith.addf %176, %177 : vector<8x32xf32>
    %179 = arith.negf %178 : vector<8x32xf32>
    %180 = math.exp %179 : vector<8x32xf32>
    %cst_106 = arith.constant 1.000000e+00 : f32
    %181 = vector.broadcast %cst_106 : f32 to vector<8x32xf32>
    %182 = arith.addf %181, %180 : vector<8x32xf32>
    %183 = arith.divf %181, %182 : vector<8x32xf32>
    %c1_i32_107 = arith.constant 1 : i32
    %184 = arith.addi %c3_i32, %c1_i32_107 : i32
    %185 = arith.index_cast %184 : i32 to index
    %c0_108 = arith.constant 0 : index
    %c0_109 = arith.constant 0 : index
    %186 = vector.load %arg18[%185, %c0_108, %c0_109] : memref<8x8x32xf32, #tpu.memory_space<vmem>>, vector<1x8x32xf32>
    %187 = vector.shape_cast %186 : vector<1x8x32xf32> to vector<8x32xf32>
    %cst_110 = arith.constant dense<0.000000e+00> : vector<8x32xf32>
    %188 = tpu.matmul %167, %40, %cst_110 {dimension_numbers = #tpu.dot_dimension_numbers<[1], [0], [0], [1], [0, 0, 1, 1], [], []>} : vector<8x32xf32>, vector<32x32xf32>, vector<8x32xf32> -> vector<8x32xf32>
    %189 = arith.addf %187, %188 : vector<8x32xf32>
    %190 = arith.negf %189 : vector<8x32xf32>
    %191 = math.exp %190 : vector<8x32xf32>
    %cst_111 = arith.constant 1.000000e+00 : f32
    %192 = vector.broadcast %cst_111 : f32 to vector<8x32xf32>
    %193 = arith.addf %192, %191 : vector<8x32xf32>
    %194 = arith.divf %192, %193 : vector<8x32xf32>
    %c1_i32_112 = arith.constant 1 : i32
    %195 = arith.addi %c3_i32, %c1_i32_112 : i32
    %196 = arith.index_cast %195 : i32 to index
    %c0_113 = arith.constant 0 : index
    %c0_114 = arith.constant 0 : index
    %197 = vector.load %arg19[%196, %c0_113, %c0_114] : memref<8x8x32xf32, #tpu.memory_space<vmem>>, vector<1x8x32xf32>
    %198 = vector.shape_cast %197 : vector<1x8x32xf32> to vector<8x32xf32>
    %cst_115 = arith.constant dense<0.000000e+00> : vector<8x32xf32>
    %199 = tpu.matmul %167, %41, %cst_115 {dimension_numbers = #tpu.dot_dimension_numbers<[1], [0], [0], [1], [0, 0, 1, 1], [], []>} : vector<8x32xf32>, vector<32x32xf32>, vector<8x32xf32> -> vector<8x32xf32>
    %200 = vector.broadcast %42 : vector<1x32xf32> to vector<8x32xf32>
    %201 = arith.addf %199, %200 : vector<8x32xf32>
    %202 = arith.mulf %183, %201 : vector<8x32xf32>
    %203 = arith.addf %198, %202 : vector<8x32xf32>
    %204 = math.tanh %203 : vector<8x32xf32>
    %cst_116 = arith.constant 1.000000e+00 : f32
    %205 = vector.broadcast %cst_116 : f32 to vector<8x32xf32>
    %206 = arith.subf %205, %194 : vector<8x32xf32>
    %207 = arith.mulf %206, %204 : vector<8x32xf32>
    %208 = arith.mulf %194, %167 : vector<8x32xf32>
    %209 = arith.addf %207, %208 : vector<8x32xf32>
    %c1_i32_117 = arith.constant 1 : i32
    %210 = arith.addi %c3_i32, %c1_i32_117 : i32
    %211 = arith.index_cast %210 : i32 to index
    %c0_118 = arith.constant 0 : index
    %c0_119 = arith.constant 0 : index
    %212 = vector.load %arg16[%211, %c0_118, %c0_119] : memref<8x8x32xf32, #tpu.memory_space<vmem>>, vector<1x8x32xf32>
    %213 = vector.shape_cast %212 : vector<1x8x32xf32> to vector<8x32xf32>
    %214 = vector.shape_cast %209 : vector<8x32xf32> to vector<1x8x32xf32>
    tpu.vector_store %arg16[%211, %c0_118, %c0_119], %214 {strides = array<i32>} : memref<8x8x32xf32, #tpu.memory_space<vmem>>, vector<1x8x32xf32>,
    %c4_i32 = arith.constant 4 : i32
    %c1_i32_120 = arith.constant 1 : i32
    %215 = arith.addi %c4_i32, %c1_i32_120 : i32
    %216 = arith.index_cast %215 : i32 to index
    %c0_121 = arith.constant 0 : index
    %c0_122 = arith.constant 0 : index
    %217 = vector.load %arg17[%216, %c0_121, %c0_122] : memref<8x8x32xf32, #tpu.memory_space<vmem>>, vector<1x8x32xf32>
    %218 = vector.shape_cast %217 : vector<1x8x32xf32> to vector<8x32xf32>
    %cst_123 = arith.constant dense<0.000000e+00> : vector<8x32xf32>
    %219 = tpu.matmul %209, %39, %cst_123 {dimension_numbers = #tpu.dot_dimension_numbers<[1], [0], [0], [1], [0, 0, 1, 1], [], []>} : vector<8x32xf32>, vector<32x32xf32>, vector<8x32xf32> -> vector<8x32xf32>
    %220 = arith.addf %218, %219 : vector<8x32xf32>
    %221 = arith.negf %220 : vector<8x32xf32>
    %222 = math.exp %221 : vector<8x32xf32>
    %cst_124 = arith.constant 1.000000e+00 : f32
    %223 = vector.broadcast %cst_124 : f32 to vector<8x32xf32>
    %224 = arith.addf %223, %222 : vector<8x32xf32>
    %225 = arith.divf %223, %224 : vector<8x32xf32>
    %c1_i32_125 = arith.constant 1 : i32
    %226 = arith.addi %c4_i32, %c1_i32_125 : i32
    %227 = arith.index_cast %226 : i32 to index
    %c0_126 = arith.constant 0 : index
    %c0_127 = arith.constant 0 : index
    %228 = vector.load %arg18[%227, %c0_126, %c0_127] : memref<8x8x32xf32, #tpu.memory_space<vmem>>, vector<1x8x32xf32>
    %229 = vector.shape_cast %228 : vector<1x8x32xf32> to vector<8x32xf32>
    %cst_128 = arith.constant dense<0.000000e+00> : vector<8x32xf32>
    %230 = tpu.matmul %209, %40, %cst_128 {dimension_numbers = #tpu.dot_dimension_numbers<[1], [0], [0], [1], [0, 0, 1, 1], [], []>} : vector<8x32xf32>, vector<32x32xf32>, vector<8x32xf32> -> vector<8x32xf32>
    %231 = arith.addf %229, %230 : vector<8x32xf32>
    %232 = arith.negf %231 : vector<8x32xf32>
    %233 = math.exp %232 : vector<8x32xf32>
    %cst_129 = arith.constant 1.000000e+00 : f32
    %234 = vector.broadcast %cst_129 : f32 to vector<8x32xf32>
    %235 = arith.addf %234, %233 : vector<8x32xf32>
    %236 = arith.divf %234, %235 : vector<8x32xf32>
    %c1_i32_130 = arith.constant 1 : i32
    %237 = arith.addi %c4_i32, %c1_i32_130 : i32
    %238 = arith.index_cast %237 : i32 to index
    %c0_131 = arith.constant 0 : index
    %c0_132 = arith.constant 0 : index
    %239 = vector.load %arg19[%238, %c0_131, %c0_132] : memref<8x8x32xf32, #tpu.memory_space<vmem>>, vector<1x8x32xf32>
    %240 = vector.shape_cast %239 : vector<1x8x32xf32> to vector<8x32xf32>
    %cst_133 = arith.constant dense<0.000000e+00> : vector<8x32xf32>
    %241 = tpu.matmul %209, %41, %cst_133 {dimension_numbers = #tpu.dot_dimension_numbers<[1], [0], [0], [1], [0, 0, 1, 1], [], []>} : vector<8x32xf32>, vector<32x32xf32>, vector<8x32xf32> -> vector<8x32xf32>
    %242 = vector.broadcast %42 : vector<1x32xf32> to vector<8x32xf32>
    %243 = arith.addf %241, %242 : vector<8x32xf32>
    %244 = arith.mulf %225, %243 : vector<8x32xf32>
    %245 = arith.addf %240, %244 : vector<8x32xf32>
    %246 = math.tanh %245 : vector<8x32xf32>
    %cst_134 = arith.constant 1.000000e+00 : f32
    %247 = vector.broadcast %cst_134 : f32 to vector<8x32xf32>
    %248 = arith.subf %247, %236 : vector<8x32xf32>
    %249 = arith.mulf %248, %246 : vector<8x32xf32>
    %250 = arith.mulf %236, %209 : vector<8x32xf32>
    %251 = arith.addf %249, %250 : vector<8x32xf32>
    %c1_i32_135 = arith.constant 1 : i32
    %252 = arith.addi %c4_i32, %c1_i32_135 : i32
    %253 = arith.index_cast %252 : i32 to index
    %c0_136 = arith.constant 0 : index
    %c0_137 = arith.constant 0 : index
    %254 = vector.load %arg16[%253, %c0_136, %c0_137] : memref<8x8x32xf32, #tpu.memory_space<vmem>>, vector<1x8x32xf32>
    %255 = vector.shape_cast %254 : vector<1x8x32xf32> to vector<8x32xf32>
    %256 = vector.shape_cast %251 : vector<8x32xf32> to vector<1x8x32xf32>
    tpu.vector_store %arg16[%253, %c0_136, %c0_137], %256 {strides = array<i32>} : memref<8x8x32xf32, #tpu.memory_space<vmem>>, vector<1x8x32xf32>,
    %c5_i32 = arith.constant 5 : i32
    %c1_i32_138 = arith.constant 1 : i32
    %257 = arith.addi %c5_i32, %c1_i32_138 : i32
    %258 = arith.index_cast %257 : i32 to index
    %c0_139 = arith.constant 0 : index
    %c0_140 = arith.constant 0 : index
    %259 = vector.load %arg17[%258, %c0_139, %c0_140] : memref<8x8x32xf32, #tpu.memory_space<vmem>>, vector<1x8x32xf32>
    %260 = vector.shape_cast %259 : vector<1x8x32xf32> to vector<8x32xf32>
    %cst_141 = arith.constant dense<0.000000e+00> : vector<8x32xf32>
    %261 = tpu.matmul %251, %39, %cst_141 {dimension_numbers = #tpu.dot_dimension_numbers<[1], [0], [0], [1], [0, 0, 1, 1], [], []>} : vector<8x32xf32>, vector<32x32xf32>, vector<8x32xf32> -> vector<8x32xf32>
    %262 = arith.addf %260, %261 : vector<8x32xf32>
    %263 = arith.negf %262 : vector<8x32xf32>
    %264 = math.exp %263 : vector<8x32xf32>
    %cst_142 = arith.constant 1.000000e+00 : f32
    %265 = vector.broadcast %cst_142 : f32 to vector<8x32xf32>
    %266 = arith.addf %265, %264 : vector<8x32xf32>
    %267 = arith.divf %265, %266 : vector<8x32xf32>
    %c1_i32_143 = arith.constant 1 : i32
    %268 = arith.addi %c5_i32, %c1_i32_143 : i32
    %269 = arith.index_cast %268 : i32 to index
    %c0_144 = arith.constant 0 : index
    %c0_145 = arith.constant 0 : index
    %270 = vector.load %arg18[%269, %c0_144, %c0_145] : memref<8x8x32xf32, #tpu.memory_space<vmem>>, vector<1x8x32xf32>
    %271 = vector.shape_cast %270 : vector<1x8x32xf32> to vector<8x32xf32>
    %cst_146 = arith.constant dense<0.000000e+00> : vector<8x32xf32>
    %272 = tpu.matmul %251, %40, %cst_146 {dimension_numbers = #tpu.dot_dimension_numbers<[1], [0], [0], [1], [0, 0, 1, 1], [], []>} : vector<8x32xf32>, vector<32x32xf32>, vector<8x32xf32> -> vector<8x32xf32>
    %273 = arith.addf %271, %272 : vector<8x32xf32>
    %274 = arith.negf %273 : vector<8x32xf32>
    %275 = math.exp %274 : vector<8x32xf32>
    %cst_147 = arith.constant 1.000000e+00 : f32
    %276 = vector.broadcast %cst_147 : f32 to vector<8x32xf32>
    %277 = arith.addf %276, %275 : vector<8x32xf32>
    %278 = arith.divf %276, %277 : vector<8x32xf32>
    %c1_i32_148 = arith.constant 1 : i32
    %279 = arith.addi %c5_i32, %c1_i32_148 : i32
    %280 = arith.index_cast %279 : i32 to index
    %c0_149 = arith.constant 0 : index
    %c0_150 = arith.constant 0 : index
    %281 = vector.load %arg19[%280, %c0_149, %c0_150] : memref<8x8x32xf32, #tpu.memory_space<vmem>>, vector<1x8x32xf32>
    %282 = vector.shape_cast %281 : vector<1x8x32xf32> to vector<8x32xf32>
    %cst_151 = arith.constant dense<0.000000e+00> : vector<8x32xf32>
    %283 = tpu.matmul %251, %41, %cst_151 {dimension_numbers = #tpu.dot_dimension_numbers<[1], [0], [0], [1], [0, 0, 1, 1], [], []>} : vector<8x32xf32>, vector<32x32xf32>, vector<8x32xf32> -> vector<8x32xf32>
    %284 = vector.broadcast %42 : vector<1x32xf32> to vector<8x32xf32>
    %285 = arith.addf %283, %284 : vector<8x32xf32>
    %286 = arith.mulf %267, %285 : vector<8x32xf32>
    %287 = arith.addf %282, %286 : vector<8x32xf32>
    %288 = math.tanh %287 : vector<8x32xf32>
    %cst_152 = arith.constant 1.000000e+00 : f32
    %289 = vector.broadcast %cst_152 : f32 to vector<8x32xf32>
    %290 = arith.subf %289, %278 : vector<8x32xf32>
    %291 = arith.mulf %290, %288 : vector<8x32xf32>
    %292 = arith.mulf %278, %251 : vector<8x32xf32>
    %293 = arith.addf %291, %292 : vector<8x32xf32>
    %c1_i32_153 = arith.constant 1 : i32
    %294 = arith.addi %c5_i32, %c1_i32_153 : i32
    %295 = arith.index_cast %294 : i32 to index
    %c0_154 = arith.constant 0 : index
    %c0_155 = arith.constant 0 : index
    %296 = vector.load %arg16[%295, %c0_154, %c0_155] : memref<8x8x32xf32, #tpu.memory_space<vmem>>, vector<1x8x32xf32>
    %297 = vector.shape_cast %296 : vector<1x8x32xf32> to vector<8x32xf32>
    %298 = vector.shape_cast %293 : vector<8x32xf32> to vector<1x8x32xf32>
    tpu.vector_store %arg16[%295, %c0_154, %c0_155], %298 {strides = array<i32>} : memref<8x8x32xf32, #tpu.memory_space<vmem>>, vector<1x8x32xf32>,
    %c6_i32 = arith.constant 6 : i32
    %c1_i32_156 = arith.constant 1 : i32
    %299 = arith.addi %c6_i32, %c1_i32_156 : i32
    %300 = arith.index_cast %299 : i32 to index
    %c0_157 = arith.constant 0 : index
    %c0_158 = arith.constant 0 : index
    %301 = vector.load %arg17[%300, %c0_157, %c0_158] : memref<8x8x32xf32, #tpu.memory_space<vmem>>, vector<1x8x32xf32>
    %302 = vector.shape_cast %301 : vector<1x8x32xf32> to vector<8x32xf32>
    %cst_159 = arith.constant dense<0.000000e+00> : vector<8x32xf32>
    %303 = tpu.matmul %293, %39, %cst_159 {dimension_numbers = #tpu.dot_dimension_numbers<[1], [0], [0], [1], [0, 0, 1, 1], [], []>} : vector<8x32xf32>, vector<32x32xf32>, vector<8x32xf32> -> vector<8x32xf32>
    %304 = arith.addf %302, %303 : vector<8x32xf32>
    %305 = arith.negf %304 : vector<8x32xf32>
    %306 = math.exp %305 : vector<8x32xf32>
    %cst_160 = arith.constant 1.000000e+00 : f32
    %307 = vector.broadcast %cst_160 : f32 to vector<8x32xf32>
    %308 = arith.addf %307, %306 : vector<8x32xf32>
    %309 = arith.divf %307, %308 : vector<8x32xf32>
    %c1_i32_161 = arith.constant 1 : i32
    %310 = arith.addi %c6_i32, %c1_i32_161 : i32
    %311 = arith.index_cast %310 : i32 to index
    %c0_162 = arith.constant 0 : index
    %c0_163 = arith.constant 0 : index
    %312 = vector.load %arg18[%311, %c0_162, %c0_163] : memref<8x8x32xf32, #tpu.memory_space<vmem>>, vector<1x8x32xf32>
    %313 = vector.shape_cast %312 : vector<1x8x32xf32> to vector<8x32xf32>
    %cst_164 = arith.constant dense<0.000000e+00> : vector<8x32xf32>
    %314 = tpu.matmul %293, %40, %cst_164 {dimension_numbers = #tpu.dot_dimension_numbers<[1], [0], [0], [1], [0, 0, 1, 1], [], []>} : vector<8x32xf32>, vector<32x32xf32>, vector<8x32xf32> -> vector<8x32xf32>
    %315 = arith.addf %313, %314 : vector<8x32xf32>
    %316 = arith.negf %315 : vector<8x32xf32>
    %317 = math.exp %316 : vector<8x32xf32>
    %cst_165 = arith.constant 1.000000e+00 : f32
    %318 = vector.broadcast %cst_165 : f32 to vector<8x32xf32>
    %319 = arith.addf %318, %317 : vector<8x32xf32>
    %320 = arith.divf %318, %319 : vector<8x32xf32>
    %c1_i32_166 = arith.constant 1 : i32
    %321 = arith.addi %c6_i32, %c1_i32_166 : i32
    %322 = arith.index_cast %321 : i32 to index
    %c0_167 = arith.constant 0 : index
    %c0_168 = arith.constant 0 : index
    %323 = vector.load %arg19[%322, %c0_167, %c0_168] : memref<8x8x32xf32, #tpu.memory_space<vmem>>, vector<1x8x32xf32>
    %324 = vector.shape_cast %323 : vector<1x8x32xf32> to vector<8x32xf32>
    %cst_169 = arith.constant dense<0.000000e+00> : vector<8x32xf32>
    %325 = tpu.matmul %293, %41, %cst_169 {dimension_numbers = #tpu.dot_dimension_numbers<[1], [0], [0], [1], [0, 0, 1, 1], [], []>} : vector<8x32xf32>, vector<32x32xf32>, vector<8x32xf32> -> vector<8x32xf32>
    %326 = vector.broadcast %42 : vector<1x32xf32> to vector<8x32xf32>
    %327 = arith.addf %325, %326 : vector<8x32xf32>
    %328 = arith.mulf %309, %327 : vector<8x32xf32>
    %329 = arith.addf %324, %328 : vector<8x32xf32>
    %330 = math.tanh %329 : vector<8x32xf32>
    %cst_170 = arith.constant 1.000000e+00 : f32
    %331 = vector.broadcast %cst_170 : f32 to vector<8x32xf32>
    %332 = arith.subf %331, %320 : vector<8x32xf32>
    %333 = arith.mulf %332, %330 : vector<8x32xf32>
    %334 = arith.mulf %320, %293 : vector<8x32xf32>
    %335 = arith.addf %333, %334 : vector<8x32xf32>
    %c1_i32_171 = arith.constant 1 : i32
    %336 = arith.addi %c6_i32, %c1_i32_171 : i32
    %337 = arith.index_cast %336 : i32 to index
    %c0_172 = arith.constant 0 : index
    %c0_173 = arith.constant 0 : index
    %338 = vector.load %arg16[%337, %c0_172, %c0_173] : memref<8x8x32xf32, #tpu.memory_space<vmem>>, vector<1x8x32xf32>
    %339 = vector.shape_cast %338 : vector<1x8x32xf32> to vector<8x32xf32>
    %340 = vector.shape_cast %335 : vector<8x32xf32> to vector<1x8x32xf32>
    tpu.vector_store %arg16[%337, %c0_172, %c0_173], %340 {strides = array<i32>} : memref<8x8x32xf32, #tpu.memory_space<vmem>>, vector<1x8x32xf32>,
    %c7_i32 = arith.constant 7 : i32
    return
  }
  func.func @transform_0(%arg0: i32) -> (i32, i32, i32) {
    %c0_i32 = arith.constant 0 : i32
    %c0_i32_0 = arith.constant 0 : i32
    %c0_i32_1 = arith.constant 0 : i32
    return %c0_i32, %arg0, %c0_i32_0 : i32, i32, i32
  }
  func.func @transform_1(%arg0: i32) -> (i32, i32) {
    %c0_i32 = arith.constant 0 : i32
    %c0_i32_0 = arith.constant 0 : i32
    return %arg0, %c0_i32 : i32, i32
  }
  func.func @transform_2(%arg0: i32) -> (i32, i32) {
    %c0_i32 = arith.constant 0 : i32
    %c0_i32_0 = arith.constant 0 : i32
    %c0_i32_1 = arith.constant 0 : i32
    return %c0_i32, %c0_i32_0 : i32, i32
  }
  func.func @transform_3(%arg0: i32) -> (i32, i32) {
    %c0_i32 = arith.constant 0 : i32
    %c0_i32_0 = arith.constant 0 : i32
    %c0_i32_1 = arith.constant 0 : i32
    return %c0_i32, %c0_i32_0 : i32, i32
  }
  func.func @transform_4(%arg0: i32) -> (i32, i32) {
    %c0_i32 = arith.constant 0 : i32
    %c0_i32_0 = arith.constant 0 : i32
    %c0_i32_1 = arith.constant 0 : i32
    return %c0_i32, %c0_i32_0 : i32, i32
  }
  func.func @transform_5(%arg0: i32) -> (i32, i32) {
    %c0_i32 = arith.constant 0 : i32
    %c0_i32_0 = arith.constant 0 : i32
    %c0_i32_1 = arith.constant 0 : i32
    return %c0_i32, %c0_i32_0 : i32, i32
  }
  func.func @transform_6(%arg0: i32) -> (i32, i32) {
    %c0_i32 = arith.constant 0 : i32
    %c0_i32_0 = arith.constant 0 : i32
    %c0_i32_1 = arith.constant 0 : i32
    return %c0_i32, %c0_i32_0 : i32, i32
  }
  func.func @transform_7(%arg0: i32) -> (i32, i32) {
    %c0_i32 = arith.constant 0 : i32
    %c0_i32_0 = arith.constant 0 : i32
    %c0_i32_1 = arith.constant 0 : i32
    return %c0_i32, %c0_i32_0 : i32, i32
  }
  func.func @transform_8(%arg0: i32) -> (i32, i32) {
    %c0_i32 = arith.constant 0 : i32
    %c0_i32_0 = arith.constant 0 : i32
    %c0_i32_1 = arith.constant 0 : i32
    return %c0_i32, %c0_i32_0 : i32, i32
  }
  func.func @transform_9(%arg0: i32) -> (i32, i32) {
    %c0_i32 = arith.constant 0 : i32
    %c0_i32_0 = arith.constant 0 : i32
    %c0_i32_1 = arith.constant 0 : i32
    return %c0_i32, %c0_i32_0 : i32, i32
  }
  func.func @transform_10(%arg0: i32) -> (i32, i32) {
    %c0_i32 = arith.constant 0 : i32
    %c0_i32_0 = arith.constant 0 : i32
    %c0_i32_1 = arith.constant 0 : i32
    return %c0_i32, %c0_i32_0 : i32, i32
  }
  func.func @transform_11(%arg0: i32) -> (i32, i32) {
    %c0_i32 = arith.constant 0 : i32
    %c0_i32_0 = arith.constant 0 : i32
    %c0_i32_1 = arith.constant 0 : i32
    return %c0_i32, %c0_i32_0 : i32, i32
  }
  func.func @transform_12(%arg0: i32) -> (i32, i32) {
    %c0_i32 = arith.constant 0 : i32
    %c0_i32_0 = arith.constant 0 : i32
    %c0_i32_1 = arith.constant 0 : i32
    return %c0_i32, %c0_i32_0 : i32, i32
  }
  func.func @transform_13(%arg0: i32) -> (i32, i32) {
    %c0_i32 = arith.constant 0 : i32
    %c0_i32_0 = arith.constant 0 : i32
    %c0_i32_1 = arith.constant 0 : i32
    return %c0_i32, %c0_i32_0 : i32, i32
  }
  func.func @transform_14(%arg0: i32) -> (i32, i32) {
    %c0_i32 = arith.constant 0 : i32
    %c0_i32_0 = arith.constant 0 : i32
    %c0_i32_1 = arith.constant 0 : i32
    return %c0_i32, %c0_i32_0 : i32, i32
  }
  func.func @transform_15(%arg0: i32) -> (i32, i32, i32) {
    %c0_i32 = arith.constant 0 : i32
    %c0_i32_0 = arith.constant 0 : i32
    %c0_i32_1 = arith.constant 0 : i32
    return %c0_i32, %arg0, %c0_i32_0 : i32, i32, i32
  }
}

</mosaic_0001>

<bundles_post_ra>
// kernel: seq2seq_forward.5
= control target key start
LH: loop header
LB: loop body
LE: loop exit
PB: predicated region body
PF: predicated region fallthrough
CT: control target
= control target key end

     0   :  { %v443_v0 = vmov 0.0   ;;  %vm444_vm0 = vmmov 0   ;;  %vm56_vm1 = vcmask 261120   ;;  %vm227_vm2 = vcmask 130048   ;;  %s587_s7 = inlined_call_operand.vmem [shape: f32[64,128], index: 7, kind: output, shape index: {}]   ;;  %s588_s5 = inlined_call_operand.vmem [shape: bf16[32,128], index: 5, kind: input, shape index: {}]   ;;  %s589_s4 = inlined_call_operand.vmem [shape: bf16[32,128], index: 4, kind: input, shape index: {}]   ;;  %s590_s2 = inlined_call_operand.vmem [shape: f32[8,32], index: 2, kind: input, shape index: {}]   ;;  %s591_s3 = inlined_call_operand.vmem [shape: bf16[16,128], index: 3, kind: input, shape index: {}]   ;;  %s592_s1 = inlined_call_operand.vmem [shape: f32[64,32], index: 1, kind: input, shape index: {}]   ;;  %s593_s0 = inlined_call_operand.vmem [shape: f32[64,16], index: 0, kind: input, shape index: {}]   ;;  %s594_s6 = inlined_call_operand.vmem [shape: f32[1,128], index: 6, kind: input, shape index: {}]  }
   0x1   :  { %406 = vmatprep.subr.bf16.mxu0 %v443_v0  ;;  %365 = vst [vmem:[%s587_s7] sm:$0xff] %v443_v0  ;;  %v438_v1 = vld [vmem:[%s588_s5 + $0x8] sm:$0xff]   ;;  %410 = vmatprep.mubr.msk.bf16.mxu0 %vm444_vm0, %v443_v0  ;;  %v440_v3 = vld [vmem:[%s588_s5] sm:$0xff]   ;;  %v117_v11 = vld [vmem:[%s592_s1 + $0x10] sm:$0xff] }
   0x2   :  { %v439_v2 = vld [vmem:[%s589_s4 + $0x8] sm:$0xff]   ;;  %407 = vmatpush3.bf16.msra.mxu0 %v438_v1  ;;  %v441_v4 = vld [vmem:[%s589_s4] sm:$0xff]   ;;  %v118_v12 = vld [vmem:[%s592_s1 + $0x18] sm:$0xff] }
   0x3   :  { %414 = vmatprep.subr.bf16.mxu1 %v439_v2  ;;  %408 = vmatprep.subr.bf16.mxu0 %v443_v0  ;;  %v31_v5 = vld [vmem:[%s590_s2] sm:$0xff]  ;;  %v116_v9 = vld [vmem:[%s592_s1 + $0x8] sm:$0xff]  ;;  %v124_v14 = vpack.c.bf16 %v118_v12, %v117_v11  ;;  %v103_v20 = vld [vmem:[%s593_s0 + $0x10] sm:$0xff] }
   0x4   :  { %415 = vmatpush3.bf16.msra.mxu1 %v439_v2  ;;  %v32_v6 = vpack.c.bf16 %v31_v5, %v31_v5  ;;  %v442_v7 = vld [vmem:[%s591_s3] sm:$0xff]   ;;  %v102_v15 = vld [vmem:[%s593_s0 + $0x8] sm:$0xff]  ;;  %v104_v21 = vld [vmem:[%s593_s0 + $0x18] sm:$0xff] }
   0x5   :  { %416 = vmatprep.subr.bf16.mxu1 %v441_v4  ;;  %v115_v8 = vld [vmem:[%s592_s1] sm:$0xff]  ;;  %v120_v18 = vld [vmem:[%s592_s1 + $0x28] sm:$0xff]  ;;  %v121_v24 = vld [vmem:[%s592_s1 + $0x30] sm:$0xff]  ;;  %v110_v26 = vpack.c.bf16 %v104_v21, %v103_v20 }
   0x6   :  { %409 = vmatpush3.bf16.msra.mxu0 %v440_v3  ;;  %v123_v10 = vpack.c.bf16 %v116_v9, %v115_v8  ;;  %v101_v13 = vld [vmem:[%s593_s0] sm:$0xff]  ;;  %v106_v23 = vld [vmem:[%s593_s0 + $0x28] sm:$0xff]  ;;  %v122_v25 = vld [vmem:[%s592_s1 + $0x38] sm:$0xff] }
   0x7   :  { %426 = vmatprep.subr.bf16.mxu0 %v442_v7  ;;  %v109_v16 = vpack.c.bf16 %v102_v15, %v101_v13  ;;  %v119_v17 = vld [vmem:[%s592_s1 + $0x20] sm:$0xff]  ;;  %v126_v28 = vpack.c.bf16 %v122_v25, %v121_v24  ;;  %v107_v29 = vld [vmem:[%s593_s0 + $0x30] sm:$0xff]  ;;  %v108_v30 = vld [vmem:[%s593_s0 + $0x38] sm:$0xff] }
   0x8   :  { %417 = vmatpush3.bf16.msra.mxu1 %v441_v4  ;;  %418 = vmatprep.mubr.msk.bf16.mxu1 %vm56_vm1, %v123_v10  ;;  %v125_v19 = vpack.c.bf16 %v120_v18, %v119_v17  ;;  %v105_v22 = vld [vmem:[%s593_s0 + $0x20] sm:$0xff]  ;;  %v112_v31 = vpack.c.bf16 %v108_v30, %v107_v29 }
   0x9   :  { %411 = vmatmul.mubr.msk.bf16.vlgmr.msra.gmra.mxu0 %vm56_vm1, %v32_v6  ;;  %v111_v27 = vpack.c.bf16 %v106_v23, %v105_v22  ;;  %v377_v37 = vld [vmem:[%s594_s6] ss:$0 sm:$0xff] }
   0xa   :  { %427 = vmatpush3.bf16.msra.mxu0 %v442_v7  ;;  %428 = vmatprep.mubr.msk.bf16.mxu0 %vm227_vm2, %v109_v16 }
   0xb   :  { %419 = vmatmul.mubr.msk.bf16.vlgmr.msra.gmra.mxu1 %vm56_vm1, %v124_v14 }
   0xc   :  { %422 = vmatprep.mubr.msk.bf16.mxu1 %vm56_vm1, %v125_v19 }
  0x11   :  { %429 = vmatmul.mubr.msk.bf16.vlgmr.msra.gmra.mxu0 %vm227_vm2, %v110_v26 }
  0x12   :  { %432 = vmatprep.mubr.msk.bf16.mxu0 %vm227_vm2, %v111_v27 }
  0x13   :  { %423 = vmatmul.mubr.msk.bf16.gmra.mxu1 %vm56_vm1, %v126_v28 }
  0x19   :  { %433 = vmatmul.mubr.msk.bf16.gmra.mxu0 %vm227_vm2, %v112_v31 }
  0xc9   :  { %v94_v32 = vpop.f32.mrf.mxu0 }
  0xca   :  { %v95_v42 = vadd.f32 %v377_v37, %v94_v32 }
  0xcb   :  { %v412_v33 = vpop.f32.mrf.mxu0  ;;  %v420_v34 = vpop.f32.mrf.mxu1 }
  0xcd   :  { %v97_v35 = vpop.f32.mrf.mxu0  ;;  %v190_v36 = vpop.f32.mrf.mxu1 }
  0xcf   :  { %v413_v38 = vpop.f32.mrf.mxu0  ;;  %v421_v39 = vpop.f32.mrf.mxu1 }
  0xd1   :  { %v430_v40 = vpop.f32.mrf.mxu0  ;;  %v193_v41 = vpop.f32.mrf.mxu1 }
  0xd2   :  { %v283_v43 = vadd.f32 %v430_v40, %v420_v34 }
  0xd3   :  { %v274_v44 = vpop.f32.mrf.mxu0  ;;  %v424_v45 = vpop.f32.mrf.mxu1 }
  0xd4   :  { %v335_v46 = vadd.f32 %v283_v43, %v95_v42 }
  0xd5   :  { %v431_v47 = vpop.f32.mrf.mxu0  ;;  %v206_v49 = vpop.f32.mrf.mxu1 }
  0xd6   :  { %367 = vst [vmem:[%s587_s7 + $0x10] sm:$0xff] %v335_v46  ;;  %v286_v48 = vadd.f32 %v431_v47, %v421_v39 }
  0xd7   :  { %v277_v50 = vpop.f32.mrf.mxu0  ;;  %v425_v56 = vpop.f32.mrf.mxu1 }
  0xd8   :  { %v336_v51 = vadd.f32 %v286_v48, %v95_v42  ;;  %v278_v52 = vadd.f32 %v277_v50, %v193_v41 }
  0xd9   :  { %v434_v53 = vpop.f32.mrf.mxu0  ;;  %v209_v63 = vpop.f32.mrf.mxu1 }
  0xda   :  { %368 = vst [vmem:[%s587_s7 + $0x18] sm:$0xff] %v336_v51  ;;  %v334_v54 = vadd.f32 %v278_v52, %v95_v42  ;;  %v299_v55 = vadd.f32 %v434_v53, %v424_v45 }
  0xdb   :  { %v290_v57 = vpop.f32.mrf.mxu0 }
  0xdc   :  { %366 = vst [vmem:[%s587_s7 + $0x8] sm:$0xff] %v334_v54  ;;  %v339_v58 = vadd.f32 %v299_v55, %v95_v42  ;;  %v291_v59 = vadd.f32 %v290_v57, %v206_v49 }
  0xdd   :  { %v435_v60 = vpop.f32.mrf.mxu0 }
  0xde   :  { %371 = vst [vmem:[%s587_s7 + $0x30] sm:$0xff] %v339_v58  ;;  %v337_v61 = vadd.f32 %v291_v59, %v95_v42  ;;  %v302_v62 = vadd.f32 %v435_v60, %v425_v56 }
  0xdf   :  { %v293_v0 = vpop.f32.mrf.mxu0 }
  0xe0   :  { %369 = vst [vmem:[%s587_s7 + $0x20] sm:$0xff] %v337_v61  ;;  %v340_v1 = vadd.f32 %v302_v62, %v95_v42  ;;  %v294_v2 = vadd.f32 %v293_v0, %v209_v63 }
  0xe2   :  { %372 = vst [vmem:[%s587_s7 + $0x38] sm:$0xff] %v340_v1  ;;  %v338_v3 = vadd.f32 %v294_v2, %v95_v42 }
  0xe4   :  { %370 = vst [vmem:[%s587_s7 + $0x28] sm:$0xff] %v338_v3 }

// kernel: seq2seq_forward.3
= control target key start
LH: loop header
LB: loop body
LE: loop exit
PB: predicated region body
PF: predicated region fallthrough
CT: control target
= control target key end

     0   :  { %vm48_vm0 = vcmask 130048   ;;  %v3020_v8 = vmov 0.0   ;;  %vm3021_vm1 = vmmov 0   ;;  %vm193_vm2 = vcmask 261120   ;;  %s3559_s2 = inlined_call_operand.vmem [shape: f32[16,32], index: 2, kind: input, shape index: {}]   ;;  %s3560_s1 = inlined_call_operand.vmem [shape: f32[16,32], index: 1, kind: input, shape index: {}]   ;;  %s3561_s0 = inlined_call_operand.vmem [shape: f32[8,8,16], index: 0, kind: input, shape index: {}]   ;;  %s3562_s4 = inlined_call_operand.vmem [shape: f32[32,32], index: 4, kind: input, shape index: {}]   ;;  %s3563_s3 = inlined_call_operand.vmem [shape: f32[16,32], index: 3, kind: input, shape index: {}]   ;;  %s3564_s5 = inlined_call_operand.vmem [shape: f32[32,32], index: 5, kind: input, shape index: {}]   ;;  %s3565_s6 = inlined_call_operand.vmem [shape: f32[32,32], index: 6, kind: input, shape index: {}]   ;;  %s3566_s8 = inlined_call_operand.vmem [shape: f32[1,32], index: 8, kind: input, shape index: {}]   ;;  %s3567_s7 = inlined_call_operand.vmem [shape: f32[1,32], index: 7, kind: input, shape index: {}]   ;;  %s3568_s9 = inlined_call_operand.vmem [shape: f32[1,32], index: 9, kind: input, shape index: {}]   ;;  %s3569_s10 = inlined_call_operand.vmem [shape: f32[1,32], index: 10, kind: input, shape index: {}]   ;;  %s3570_s11 = inlined_call_operand.vmem [shape: f32[8,32], index: 11, kind: output, shape index: {}]  }
   0x1   :  { %v203_v0 = vld [vmem:[%s3559_s2 + $0x8] sm:$0xff]  ;;  %v202_v1 = vld [vmem:[%s3559_s2] sm:$0xff]  ;;  %v3109_v6 = vld [vmem:[%s3562_s4 + $0x18] sm:$0xff] }
   0x2   :  { %v47_v2 = vld [vmem:[%s3560_s1 + $0x8] sm:$0xff]  ;;  %2634 = vmatprep.subr.mxu1 %v203_v0  ;;  %v3094_v3 = vld [vmem:[%s3561_s0] sm:$0xff]  ;;  %v3114_v7 = vld [vmem:[%s3561_s0 + $0x10] sm:$0xff] }
   0x3   :  { %2618 = vmatprep.subr.mxu0 %v47_v2  ;;  %v46_v4 = vld [vmem:[%s3560_s1] sm:$0xff]  ;;  %2635 = vmatpush3.msra.mxu1 %v203_v0  ;;  %v3104_v5 = vld [vmem:[%s3561_s0 + $0x8] sm:$0xff]  ;;  %v41_v9 = vld [vmem:[%s3561_s0 + $0x18] sm:$0xff] }
   0x4   :  { %2638 = vmatprep.mubr.msk.f32.mxu1 %vm48_vm0, %v3094_v3  ;;  %2636 = vmatprep.subr.mxu1 %v202_v1  ;;  %v333_v10 = vld [vmem:[%s3563_s3 + $0x8] sm:$0xff]  ;;  %v3133_v11 = vld [vmem:[%s3562_s4 + $0x10] sm:$0xff]  ;;  %v42_v12 = vld [vmem:[%s3561_s0 + $0x20] sm:$0xff] }
   0x5   :  { %2619 = vmatpush3.msra.mxu0 %v47_v2  ;;  %2637 = vmatpush3.msra.mxu1 %v202_v1  ;;  %v3145_v13 = vld [vmem:[%s3562_s4 + $0x8] sm:$0xff]  ;;  %v44_v15 = vld [vmem:[%s3561_s0 + $0x30] sm:$0xff]  ;;  %v3159_v16 = vld [vmem:[%s3562_s4] sm:$0xff] }
   0x6   :  { %2620 = vmatprep.subr.mxu0 %v46_v4  ;;  %2639 = vmatmul.mubr.msk.f32.vlgmr.msra.gmra.mxu1 %vm48_vm0, %v3104_v5  ;;  %v43_v14 = vld [vmem:[%s3561_s0 + $0x28] sm:$0xff]  ;;  %v332_v17 = vld [vmem:[%s3563_s3] sm:$0xff]  ;;  %v45_v18 = vld [vmem:[%s3561_s0 + $0x38] sm:$0xff] }
   0x7   :  { %2666 = vmatprep.subr.mxu1 %v3020_v8  ;;  %2621 = vmatpush3.msra.mxu0 %v46_v4  ;;  %v3184_v19 = vld [vmem:[%s3564_s5 + $0x18] sm:$0xff]  ;;  %v3192_v20 = vld [vmem:[%s3564_s5 + $0x10] sm:$0xff]  ;;  %v3201_v21 = vld [vmem:[%s3564_s5 + $0x8] sm:$0xff] }
   0x8   :  { %2667 = vmatpush3.msra.mxu1 %v3109_v6  ;;  %2622 = vmatprep.mubr.msk.f32.mxu0 %vm48_vm0, %v3094_v3  ;;  %v3211_v22 = vld [vmem:[%s3564_s5] sm:$0xff]  ;;  %v3216_v23 = vld [vmem:[%s3565_s6 + $0x18] sm:$0xff]  ;;  %v3230_v24 = vld [vmem:[%s3565_s6 + $0x10] sm:$0xff] }
   0x9   :  { %2641 = vmatprep.mubr.msk.f32.mxu1 %vm48_vm0, %v3114_v7  ;;  %2623 = vmatmul.mubr.msk.f32.vlgmr.msra.gmra.mxu0 %vm48_vm0, %v3104_v5  ;;  %v3238_v25 = vld [vmem:[%s3565_s6 + $0x8] sm:$0xff]  ;;  %v3247_v26 = vld [vmem:[%s3565_s6] sm:$0xff] }
   0xa   :  { %2668 = vmatprep.subr.mxu1 %v3020_v8  ;;  %2642 = vmatmul.mubr.msk.f32.gmra.mxu1 %vm48_vm0, %v41_v9  ;;  %v2420_v27 = vld [vmem:[%s3566_s8] ss:$0 sm:$0xff] }
   0xb   :  { %2650 = vmatprep.subr.mxu0 %v333_v10  ;;  %2669 = vmatpush3.msra.mxu1 %v3133_v11  ;;  %v2411_v30 = vld [vmem:[%s3567_s7] ss:$0 sm:$0xff] }
   0xc   :  { %2644 = vmatprep.mubr.msk.f32.mxu1 %vm48_vm0, %v42_v12  ;;  %2670 = vmatprep.subr.mxu1 %v3020_v8  ;;  %v2429_v1 = vld [vmem:[%s3568_s9] ss:$0 sm:$0xff] }
   0xd   :  { %2651 = vmatpush3.msra.mxu0 %v333_v10  ;;  %2671 = vmatpush3.msra.mxu1 %v3145_v13 }
   0xe   :  { %2625 = vmatprep.mubr.msk.f32.mxu0 %vm48_vm0, %v3114_v7  ;;  %2645 = vmatmul.mubr.msk.f32.gmra.mxu1 %vm48_vm0, %v43_v14 }
   0xf   :  { %2672 = vmatprep.subr.mxu1 %v3020_v8  ;;  %2647 = vmatprep.mubr.msk.f32.mxu1 %vm48_vm0, %v44_v15 }
  0x10   :  { %2673 = vmatpush3.msra.mxu1 %v3159_v16  ;;  %2626 = vmatmul.mubr.msk.f32.gmra.mxu0 %vm48_vm0, %v41_v9 }
  0x11   :  { %2677 = vmatprep.subr.mxu1 %v3020_v8  ;;  %2628 = vmatprep.mubr.msk.f32.mxu0 %vm48_vm0, %v42_v12 }
  0x12   :  { %2652 = vmatprep.subr.mxu0 %v332_v17  ;;  %2648 = vmatmul.mubr.msk.f32.gmra.mxu1 %vm48_vm0, %v45_v18 }
  0x13   :  { %2653 = vmatpush3.msra.mxu0 %v332_v17  ;;  %2674 = vmatprep.mubr.msk.f32.mxu1 %vm3021_vm1, %v3020_v8 }
  0x14   :  { %2688 = vmatprep.subr.mxu0 %v3020_v8  ;;  %2629 = vmatmul.mubr.msk.f32.gmra.mxu0 %vm48_vm0, %v43_v14 }
  0x15   :  { %2631 = vmatprep.mubr.msk.f32.mxu0 %vm48_vm0, %v44_v15 }
  0x16   :  { %2675 = vmatmul.mubr.f32.vlgmr.msra.gmra.mxu1 %v3020_v8 }
  0x17   :  { %2678 = vmatpush3.msra.mxu1 %v3184_v19  ;;  %2685 = vmatprep.mubr.msk.f32.mxu1 %vm3021_vm1, %v3020_v8 }
  0x18   :  { %2679 = vmatprep.subr.mxu1 %v3020_v8  ;;  %2632 = vmatmul.mubr.msk.f32.gmra.mxu0 %vm48_vm0, %v45_v18 }
  0x19   :  { %2680 = vmatpush3.msra.mxu1 %v3192_v20  ;;  %2654 = vmatprep.mubr.msk.f32.mxu0 %vm48_vm0, %v3094_v3 }
  0x1a   :  { %2681 = vmatprep.subr.mxu1 %v3020_v8 }
  0x1b   :  { %2682 = vmatpush3.msra.mxu1 %v3201_v21 }
  0x1c   :  { %2683 = vmatprep.subr.mxu1 %v3020_v8  ;;  %2655 = vmatmul.mubr.msk.f32.vlgmr.msra.gmra.mxu0 %vm48_vm0, %v3104_v5 }
  0x1d   :  { %2684 = vmatpush3.msra.mxu1 %v3211_v22  ;;  %2689 = vmatpush3.msra.mxu0 %v3216_v23 }
  0x1e   :  { %2686 = vmatmul.mubr.f32.vlgmr.msra.gmra.mxu1 %v3020_v8  ;;  %2657 = vmatprep.mubr.msk.f32.mxu0 %vm48_vm0, %v3114_v7 }
  0x1f   :  { %2690 = vmatprep.subr.mxu0 %v3020_v8  ;;  %2699 = vmatprep.subr.mxu1 %v3020_v8 }
  0x20   :  { %2658 = vmatmul.mubr.msk.f32.gmra.mxu0 %vm48_vm0, %v41_v9  ;;  %2700 = vmatpush3.msra.mxu1 %v3109_v6 }
  0x21   :  { %2691 = vmatpush3.msra.mxu0 %v3230_v24  ;;  %2660 = vmatprep.mubr.msk.f32.mxu0 %vm48_vm0, %v42_v12 }
  0x22   :  { %2692 = vmatprep.subr.mxu0 %v3020_v8  ;;  %2701 = vmatprep.subr.mxu1 %v3020_v8 }
  0x23   :  { %2693 = vmatpush3.msra.mxu0 %v3238_v25  ;;  %2702 = vmatpush3.msra.mxu1 %v3133_v11 }
  0x24   :  { %2661 = vmatmul.mubr.msk.f32.gmra.mxu0 %vm48_vm0, %v43_v14  ;;  %2694 = vmatprep.subr.mxu0 %v3020_v8 }
  0x25   :  { %2663 = vmatprep.mubr.msk.f32.mxu0 %vm48_vm0, %v44_v15  ;;  %2695 = vmatpush3.msra.mxu0 %v3247_v26 }
  0x26   :  { %2710 = vmatprep.subr.mxu0 %v3020_v8  ;;  %2703 = vmatprep.subr.mxu1 %v3020_v8 }
  0x27   :  { %2704 = vmatpush3.msra.mxu1 %v3145_v13  ;;  %2707 = vmatprep.mubr.msk.f32.mxu1 %vm3021_vm1, %v3020_v8 }
  0x28   :  { %2664 = vmatmul.mubr.msk.f32.gmra.mxu0 %vm48_vm0, %v45_v18  ;;  %2705 = vmatprep.subr.mxu1 %v3020_v8 }
  0x29   :  { %2696 = vmatprep.mubr.msk.f32.mxu0 %vm3021_vm1, %v3020_v8  ;;  %2706 = vmatpush3.msra.mxu1 %v3159_v16 }
  0x2a   :  { %2721 = vmatprep.subr.mxu1 %v3020_v8 }
  0x2c   :  { %2697 = vmatmul.mubr.f32.vlgmr.msra.gmra.mxu0 %v3020_v8 }
  0x2d   :  { %2711 = vmatpush3.msra.mxu0 %v3184_v19  ;;  %2718 = vmatprep.mubr.msk.f32.mxu0 %vm3021_vm1, %v3020_v8 }
  0x2e   :  { %2712 = vmatprep.subr.mxu0 %v3020_v8 }
  0x2f   :  { %2713 = vmatpush3.msra.mxu0 %v3192_v20 }
  0x30   :  { %2714 = vmatprep.subr.mxu0 %v3020_v8 }
  0x31   :  { %2715 = vmatpush3.msra.mxu0 %v3201_v21 }
  0x32   :  { %2716 = vmatprep.subr.mxu0 %v3020_v8 }
  0x33   :  { %2717 = vmatpush3.msra.mxu0 %v3211_v22 }
  0x34   :  { %2732 = vmatprep.subr.mxu0 %v3020_v8 }
  0xc6   :  { %v2640_v28 = vpop.f32.mrf.mxu1 }
  0xc7   :  { %v317_v29 = vadd.f32 %v2640_v28, %v2420_v27 }
  0xc8   :  { %v270_v31 = vpop.f32.mrf.mxu1 }
  0xc9   :  { %325 = vst.msk [vmem:[#allocation3 + $0x8] sm:$0xff] %vm193_vm2, %v317_v29  ;;  %v316_v32 = vadd.f32 %v2420_v27, %v270_v31  ;;  %v2624_v33 = vpop.f32.mrf.mxu0 }
  0xca   :  { %v186_v34 = vadd.f32 %v2624_v33, %v2411_v30  ;;  %v2643_v35 = vpop.f32.mrf.mxu1 }
  0xcb   :  { %324 = vst.msk [vmem:[#allocation3] sm:$0xff] %vm193_vm2, %v316_v32  ;;  %v319_v36 = vadd.f32 %v2643_v35, %v2420_v27  ;;  %v139_v37 = vpop.f32.mrf.mxu0 }
  0xcc   :  { %195 = vst.msk [vmem:[#allocation2 + $0x8] sm:$0xff] %vm193_vm2, %v186_v34  ;;  %v185_v38 = vadd.f32 %v2411_v30, %v139_v37  ;;  %v280_v39 = vpop.f32.mrf.mxu1 }
  0xcd   :  { %327 = vst.msk [vmem:[#allocation3 + $0x18] sm:$0xff] %vm193_vm2, %v319_v36  ;;  %v318_v40 = vadd.f32 %v2420_v27, %v280_v39 }
  0xce   :  { %194 = vst.msk [vmem:[#allocation2] sm:$0xff] %vm193_vm2, %v185_v38  ;;  %v2646_v41 = vpop.f32.mrf.mxu1 }
  0xcf   :  { %326 = vst.msk [vmem:[#allocation3 + $0x10] sm:$0xff] %vm193_vm2, %v318_v40  ;;  %v321_v42 = vadd.f32 %v2646_v41, %v2420_v27 }
  0xd0   :  { %v290_v43 = vpop.f32.mrf.mxu1  ;;  %v2627_v44 = vpop.f32.mrf.mxu0 }
  0xd1   :  { %329 = vst.msk [vmem:[#allocation3 + $0x28] sm:$0xff] %vm193_vm2, %v321_v42  ;;  %v320_v45 = vadd.f32 %v2420_v27, %v290_v43  ;;  %v188_v46 = vadd.f32 %v2627_v44, %v2411_v30  ;;  %v3314_v42 = vld [vmem:[%s3569_s10] ss:$0 sm:$0xff] }
  0xd2   :  { %v2649_v47 = vpop.f32.mrf.mxu1  ;;  %v149_v48 = vpop.f32.mrf.mxu0  ;;  %v556_v5 = vld [vmem:[#allocation3] sm:$0xff] }
  0xd3   :  { %328 = vst.msk [vmem:[#allocation3 + $0x20] sm:$0xff] %vm193_vm2, %v320_v45  ;;  %v323_v49 = vadd.f32 %v2649_v47, %v2420_v27  ;;  %197 = vst.msk [vmem:[#allocation2 + $0x18] sm:$0xff] %vm193_vm2, %v188_v46  ;;  %v187_v50 = vadd.f32 %v2411_v30, %v149_v48 }
  0xd4   :  { %v300_v51 = vpop.f32.mrf.mxu1  ;;  %v2630_v52 = vpop.f32.mrf.mxu0 }
  0xd5   :  { %331 = vst.msk [vmem:[#allocation3 + $0x38] sm:$0xff] %vm193_vm2, %v323_v49  ;;  %v322_v53 = vadd.f32 %v2420_v27, %v300_v51  ;;  %196 = vst.msk [vmem:[#allocation2 + $0x10] sm:$0xff] %vm193_vm2, %v187_v50  ;;  %v190_v54 = vadd.f32 %v2630_v52, %v2411_v30  ;;  %v475_v55 = vld [vmem:[#allocation2] sm:$0xff] }
  0xd6   :  { %v545_v56 = vpop.f32.mrf.mxu1  ;;  %v159_v57 = vpop.f32.mrf.mxu0 }
  0xd7   :  { %330 = vst.msk [vmem:[#allocation3 + $0x30] sm:$0xff] %vm193_vm2, %v322_v53  ;;  %v549_v58 = vadd.f32 %v545_v56, %v475_v55  ;;  %199 = vst.msk [vmem:[#allocation2 + $0x28] sm:$0xff] %vm193_vm2, %v190_v54  ;;  %v189_v59 = vadd.f32 %v2411_v30, %v159_v57  ;;  %v719_v55 = vld [vmem:[#allocation2 + $0x8] sm:$0xff] }
  0xd8   :  { %v2676_v60 = vpop.f32.mrf.mxu1  ;;  %v2633_v61 = vpop.f32.mrf.mxu0 }
  0xd9   :  { %v2430_v62 = vmul.f32 -1.442695, %v549_v58  ;;  %198 = vst.msk [vmem:[#allocation2 + $0x20] sm:$0xff] %vm193_vm2, %v189_v59  ;;  %v192_v63 = vadd.f32 %v2633_v61, %v2411_v30 }
  0xda   :  { %v169_v0 = vpop.f32.mrf.mxu0 }
  0xdb   :  { %2932 = vpow2.f32 %v2430_v62  ;;  %201 = vst.msk [vmem:[#allocation2 + $0x38] sm:$0xff] %vm193_vm2, %v192_v63  ;;  %v191_v2 = vadd.f32 %v2411_v30, %v169_v0  ;;  %v801_v62 = vld [vmem:[#allocation3 + $0x8] sm:$0xff] }
  0xdc   :  { %v2656_v3 = vpop.f32.mrf.mxu0 }
  0xdd   :  { %200 = vst.msk [vmem:[#allocation2 + $0x30] sm:$0xff] %vm193_vm2, %v191_v2  ;;  %v447_v4 = vadd.f32 %v2656_v3, %v2429_v1 }
  0xde   :  { %v623_v7 = vpop.f32.mrf.mxu1  ;;  %v400_v9 = vpop.f32.mrf.mxu0 }
  0xdf   :  { %v627_v10 = vadd.f32 %v623_v7, %v556_v5  ;;  %455 = vst.msk [vmem:[#allocation4 + $0x8] sm:$0xff] %vm193_vm2, %v447_v4  ;;  %v446_v12 = vadd.f32 %v2429_v1, %v400_v9 }
  0xe0   :  { %v2687_v14 = vpop.f32.mrf.mxu1  ;;  %v2659_v15 = vpop.f32.mrf.mxu0 }
  0xe1   :  { %v2431_v17 = vmul.f32 -1.442695, %v627_v10  ;;  %454 = vst.msk [vmem:[#allocation4] sm:$0xff] %vm193_vm2, %v446_v12  ;;  %v449_v18 = vadd.f32 %v2659_v15, %v2429_v1 }
  0xe2   :  { %v410_v27 = vpop.f32.mrf.mxu0 }
  0xe3   :  { %457 = vst.msk [vmem:[#allocation4 + $0x18] sm:$0xff] %vm193_vm2, %v449_v18  ;;  %v448_v28 = vadd.f32 %v2429_v1, %v410_v27  ;;  %2934 = vpow2.f32 %v2431_v17 }
  0xe4   :  { %v2662_v29 = vpop.f32.mrf.mxu0 }
  0xe5   :  { %456 = vst.msk [vmem:[#allocation4 + $0x10] sm:$0xff] %vm193_vm2, %v448_v28  ;;  %v451_v30 = vadd.f32 %v2662_v29, %v2429_v1 }
  0xe6   :  { %v420_v31 = vpop.f32.mrf.mxu0  ;;  %v880_v14 = vld [vmem:[#allocation4 + $0x8] sm:$0xff] }
  0xe7   :  { %459 = vst.msk [vmem:[#allocation4 + $0x28] sm:$0xff] %vm193_vm2, %v451_v30  ;;  %v450_v32 = vadd.f32 %v2429_v1, %v420_v31  ;;  %v959_v31 = vld [vmem:[#allocation2 + $0x10] sm:$0xff] }
  0xe8   :  { %v2933_v33 = vpop.eup %2932  ;;  %v2665_v34 = vpop.f32.mrf.mxu0  ;;  %v634_v47 = vld [vmem:[#allocation4] sm:$0xff] }
  0xe9   :  { %v553_v35 = vadd.f32 1.0, %v2933_v33  ;;  %458 = vst.msk [vmem:[#allocation4 + $0x20] sm:$0xff] %vm193_vm2, %v450_v32  ;;  %v453_v36 = vadd.f32 %v2665_v34, %v2429_v1 }
  0xea   :  { %v430_v37 = vpop.f32.mrf.mxu0 }
  0xeb   :  { %2936 = vrcp.f32 %v553_v35  ;;  %461 = vst.msk [vmem:[#allocation4 + $0x38] sm:$0xff] %vm193_vm2, %v453_v36  ;;  %v452_v38 = vadd.f32 %v2429_v1, %v430_v37 }
  0xec   :  { %v707_v39 = vpop.f32.mrf.mxu0 }
  0xed   :  { %460 = vst.msk [vmem:[#allocation4 + $0x30] sm:$0xff] %vm193_vm2, %v452_v38  ;;  %v708_v44 = vadd.f32 %v3314_v42, %v707_v39  ;;  %v1041_v38 = vld [vmem:[#allocation3 + $0x10] sm:$0xff] }
  0xee   :  { %v2698_v40 = vpop.f32.mrf.mxu0 }
  0xf0   :  { %v2935_v41 = vpop.eup %2934 }
  0xf1   :  { %v631_v43 = vadd.f32 1.0, %v2935_v41 }
  0xf3   :  { %2938 = vrcp.f32 %v631_v43 }
  0xf8   :  { %v2937_v45 = vpop.eup %2936 }
  0xf9   :  { %v711_v46 = vmul.f32 %v2937_v45, %v708_v44 }
  0xfb   :  { %v712_v48 = vadd.f32 %v711_v46, %v634_v47 }
  0xfd   :  { %2940 = vtanh.f32 %v712_v48 }
 0x100   :  { %v2939_v49 = vpop.eup %2938 }
 0x101   :  { %v714_v50 = vsub.f32 1.0, %v2939_v49  ;;  %v716_v53 = vmul.f32 0.0, %v2939_v49 }
 0x10a   :  { %v2941_v51 = vpop.eup %2940 }
 0x10b   :  { %v715_v52 = vmul.f32 %v2941_v51, %v714_v50  ;;  %v1120_v51 = vld [vmem:[#allocation4 + $0x10] sm:$0xff] }
 0x10d   :  { %v717_v54 = vadd.f32 %v716_v53, %v715_v52 }
 0x10f   :  { %2708 = vmatmul.mubr.msk.f32.vlgmr.msra.gmra.mxu1 %vm193_vm2, %v717_v54  ;;  %2719 = vmatmul.mubr.msk.f32.vlgmr.msra.gmra.mxu0 %vm193_vm2, %v717_v54 }
 0x110   :  { %2722 = vmatpush3.msra.mxu1 %v3216_v23  ;;  %2729 = vmatprep.mubr.msk.f32.mxu1 %vm3021_vm1, %v3020_v8 }
 0x111   :  { %2723 = vmatprep.subr.mxu1 %v3020_v8  ;;  %2733 = vmatpush3.msra.mxu0 %v3109_v6 }
 0x112   :  { %2724 = vmatpush3.msra.mxu1 %v3230_v24  ;;  %2734 = vmatprep.subr.mxu0 %v3020_v8 }
 0x113   :  { %2725 = vmatprep.subr.mxu1 %v3020_v8  ;;  %2735 = vmatpush3.msra.mxu0 %v3133_v11 }
 0x114   :  { %2726 = vmatpush3.msra.mxu1 %v3238_v25  ;;  %2736 = vmatprep.subr.mxu0 %v3020_v8 }
 0x115   :  { %2727 = vmatprep.subr.mxu1 %v3020_v8  ;;  %2737 = vmatpush3.msra.mxu0 %v3145_v13 }
 0x116   :  { %2728 = vmatpush3.msra.mxu1 %v3247_v26  ;;  %2738 = vmatprep.subr.mxu0 %v3020_v8 }
 0x117   :  { %2730 = vmatmul.mubr.msk.f32.vlgmr.msra.gmra.mxu1 %vm193_vm2, %v717_v54  ;;  %2743 = vmatprep.subr.mxu1 %v3020_v8 }
 0x118   :  { %2744 = vmatpush3.msra.mxu1 %v3184_v19  ;;  %2739 = vmatpush3.msra.mxu0 %v3159_v16 }
 0x119   :  { %2745 = vmatprep.subr.mxu1 %v3020_v8  ;;  %2740 = vmatprep.mubr.msk.f32.mxu0 %vm3021_vm1, %v3020_v8 }
 0x11a   :  { %2746 = vmatpush3.msra.mxu1 %v3192_v20  ;;  %2751 = vmatprep.mubr.msk.f32.mxu1 %vm3021_vm1, %v3020_v8 }
 0x11b   :  { %2747 = vmatprep.subr.mxu1 %v3020_v8  ;;  %2754 = vmatprep.subr.mxu0 %v3020_v8 }
 0x11c   :  { %2748 = vmatpush3.msra.mxu1 %v3201_v21 }
 0x11d   :  { %2749 = vmatprep.subr.mxu1 %v3020_v8 }
 0x11e   :  { %2750 = vmatpush3.msra.mxu1 %v3211_v22 }
 0x11f   :  { %2765 = vmatprep.subr.mxu1 %v3020_v8 }
 0x1cf   :  { %v789_v56 = vpop.f32.mrf.mxu1  ;;  %v868_v57 = vpop.f32.mrf.mxu0 }
 0x1d0   :  { %v793_v58 = vadd.f32 %v789_v56, %v719_v55  ;;  %v872_v63 = vadd.f32 %v868_v57, %v801_v62 }
 0x1d1   :  { %v2709_v59 = vpop.f32.mrf.mxu1  ;;  %v2720_v60 = vpop.f32.mrf.mxu0 }
 0x1d2   :  { %v2434_v61 = vmul.f32 -1.442695, %v793_v58  ;;  %v2436_v2 = vmul.f32 -1.442695, %v872_v63  ;;  %v1199_v59 = vld [vmem:[#allocation2 + $0x18] sm:$0xff] }
 0x1d4   :  { %2942 = vpow2.f32 %v2434_v61 }
 0x1d5   :  { %2944 = vpow2.f32 %v2436_v2  ;;  %v1281_v2 = vld [vmem:[#allocation3 + $0x18] sm:$0xff] }
 0x1d7   :  { %v947_v0 = vpop.f32.mrf.mxu1 }
 0x1d8   :  { %v948_v9 = vadd.f32 %v3314_v42, %v947_v0 }
 0x1d9   :  { %v2731_v1 = vpop.f32.mrf.mxu1 }
 0x1e1   :  { %v2943_v3 = vpop.eup %2942 }
 0x1e2   :  { %v797_v4 = vadd.f32 1.0, %v2943_v3  ;;  %v2945_v5 = vpop.eup %2944 }
 0x1e3   :  { %v876_v7 = vadd.f32 1.0, %v2945_v5 }
 0x1e4   :  { %2946 = vrcp.f32 %v797_v4 }
 0x1e5   :  { %2948 = vrcp.f32 %v876_v7 }
 0x1f1   :  { %v2947_v10 = vpop.eup %2946 }
 0x1f2   :  { %v951_v12 = vmul.f32 %v2947_v10, %v948_v9  ;;  %v2949_v17 = vpop.eup %2948 }
 0x1f3   :  { %v954_v18 = vsub.f32 1.0, %v2949_v17  ;;  %v956_v29 = vmul.f32 %v2949_v17, %v717_v54 }
 0x1f4   :  { %v952_v15 = vadd.f32 %v951_v12, %v880_v14 }
 0x1f6   :  { %2950 = vtanh.f32 %v952_v15 }
 0x203   :  { %v2951_v27 = vpop.eup %2950 }
 0x204   :  { %v955_v28 = vmul.f32 %v2951_v27, %v954_v18  ;;  %v1360_v27 = vld [vmem:[#allocation4 + $0x18] sm:$0xff] }
 0x206   :  { %v957_v30 = vadd.f32 %v956_v29, %v955_v28 }
 0x208   :  { %2741 = vmatmul.mubr.msk.f32.vlgmr.msra.gmra.mxu0 %vm193_vm2, %v957_v30  ;;  %2752 = vmatmul.mubr.msk.f32.vlgmr.msra.gmra.mxu1 %vm193_vm2, %v957_v30 }
 0x209   :  { %2755 = vmatpush3.msra.mxu0 %v3216_v23  ;;  %2762 = vmatprep.mubr.msk.f32.mxu0 %vm3021_vm1, %v3020_v8 }
 0x20a   :  { %2756 = vmatprep.subr.mxu0 %v3020_v8  ;;  %2766 = vmatpush3.msra.mxu1 %v3109_v6 }
 0x20b   :  { %2757 = vmatpush3.msra.mxu0 %v3230_v24  ;;  %2767 = vmatprep.subr.mxu1 %v3020_v8 }
 0x20c   :  { %2758 = vmatprep.subr.mxu0 %v3020_v8  ;;  %2768 = vmatpush3.msra.mxu1 %v3133_v11 }
 0x20d   :  { %2759 = vmatpush3.msra.mxu0 %v3238_v25  ;;  %2769 = vmatprep.subr.mxu1 %v3020_v8 }
 0x20e   :  { %2760 = vmatprep.subr.mxu0 %v3020_v8  ;;  %2770 = vmatpush3.msra.mxu1 %v3145_v13 }
 0x20f   :  { %2761 = vmatpush3.msra.mxu0 %v3247_v26  ;;  %2771 = vmatprep.subr.mxu1 %v3020_v8 }
 0x210   :  { %2763 = vmatmul.mubr.msk.f32.vlgmr.msra.gmra.mxu0 %vm193_vm2, %v957_v30  ;;  %2776 = vmatprep.subr.mxu0 %v3020_v8 }
 0x211   :  { %2777 = vmatpush3.msra.mxu0 %v3184_v19  ;;  %2772 = vmatpush3.msra.mxu1 %v3159_v16 }
 0x212   :  { %2778 = vmatprep.subr.mxu0 %v3020_v8  ;;  %2773 = vmatprep.mubr.msk.f32.mxu1 %vm3021_vm1, %v3020_v8 }
 0x213   :  { %2779 = vmatpush3.msra.mxu0 %v3192_v20  ;;  %2784 = vmatprep.mubr.msk.f32.mxu0 %vm3021_vm1, %v3020_v8 }
 0x214   :  { %2780 = vmatprep.subr.mxu0 %v3020_v8  ;;  %2787 = vmatprep.subr.mxu1 %v3020_v8 }
 0x215   :  { %2781 = vmatpush3.msra.mxu0 %v3201_v21 }
 0x216   :  { %2782 = vmatprep.subr.mxu0 %v3020_v8 }
 0x217   :  { %2783 = vmatpush3.msra.mxu0 %v3211_v22 }
 0x218   :  { %2798 = vmatprep.subr.mxu0 %v3020_v8 }
 0x2c8   :  { %v1029_v32 = vpop.f32.mrf.mxu0  ;;  %v1108_v33 = vpop.f32.mrf.mxu1 }
 0x2c9   :  { %v1033_v34 = vadd.f32 %v1029_v32, %v959_v31  ;;  %v1112_v39 = vadd.f32 %v1108_v33, %v1041_v38 }
 0x2ca   :  { %v2742_v35 = vpop.f32.mrf.mxu0  ;;  %v2753_v36 = vpop.f32.mrf.mxu1 }
 0x2cb   :  { %v2439_v37 = vmul.f32 -1.442695, %v1033_v34  ;;  %v2441_v43 = vmul.f32 -1.442695, %v1112_v39  ;;  %v1439_v35 = vld [vmem:[#allocation2 + $0x20] sm:$0xff] }
 0x2cd   :  { %2952 = vpow2.f32 %v2439_v37 }
 0x2ce   :  { %2954 = vpow2.f32 %v2441_v43  ;;  %v1521_v43 = vld [vmem:[#allocation3 + $0x20] sm:$0xff] }
 0x2d0   :  { %v1187_v40 = vpop.f32.mrf.mxu0 }
 0x2d1   :  { %v1188_v48 = vadd.f32 %v3314_v42, %v1187_v40 }
 0x2d2   :  { %v2764_v41 = vpop.f32.mrf.mxu0 }
 0x2da   :  { %v2953_v44 = vpop.eup %2952 }
 0x2db   :  { %v1037_v45 = vadd.f32 1.0, %v2953_v44  ;;  %v2955_v46 = vpop.eup %2954 }
 0x2dc   :  { %v1116_v47 = vadd.f32 1.0, %v2955_v46 }
 0x2dd   :  { %2956 = vrcp.f32 %v1037_v45 }
 0x2de   :  { %2958 = vrcp.f32 %v1116_v47 }
 0x2ea   :  { %v2957_v49 = vpop.eup %2956 }
 0x2eb   :  { %v1191_v50 = vmul.f32 %v2957_v49, %v1188_v48  ;;  %v2959_v53 = vpop.eup %2958 }
 0x2ec   :  { %v1194_v54 = vsub.f32 1.0, %v2959_v53  ;;  %v1196_v57 = vmul.f32 %v2959_v53, %v957_v30 }
 0x2ed   :  { %v1192_v52 = vadd.f32 %v1191_v50, %v1120_v51 }
 0x2ef   :  { %2960 = vtanh.f32 %v1192_v52 }
 0x2fc   :  { %v2961_v55 = vpop.eup %2960 }
 0x2fd   :  { %v1195_v56 = vmul.f32 %v2961_v55, %v1194_v54  ;;  %v1600_v55 = vld [vmem:[#allocation4 + $0x20] sm:$0xff] }
 0x2ff   :  { %v1197_v58 = vadd.f32 %v1196_v57, %v1195_v56 }
 0x301   :  { %2774 = vmatmul.mubr.msk.f32.vlgmr.msra.gmra.mxu1 %vm193_vm2, %v1197_v58  ;;  %2785 = vmatmul.mubr.msk.f32.vlgmr.msra.gmra.mxu0 %vm193_vm2, %v1197_v58 }
 0x302   :  { %2788 = vmatpush3.msra.mxu1 %v3216_v23  ;;  %2795 = vmatprep.mubr.msk.f32.mxu1 %vm3021_vm1, %v3020_v8 }
 0x303   :  { %2789 = vmatprep.subr.mxu1 %v3020_v8  ;;  %2799 = vmatpush3.msra.mxu0 %v3109_v6 }
 0x304   :  { %2790 = vmatpush3.msra.mxu1 %v3230_v24  ;;  %2800 = vmatprep.subr.mxu0 %v3020_v8 }
 0x305   :  { %2791 = vmatprep.subr.mxu1 %v3020_v8  ;;  %2801 = vmatpush3.msra.mxu0 %v3133_v11 }
 0x306   :  { %2792 = vmatpush3.msra.mxu1 %v3238_v25  ;;  %2802 = vmatprep.subr.mxu0 %v3020_v8 }
 0x307   :  { %2793 = vmatprep.subr.mxu1 %v3020_v8  ;;  %2803 = vmatpush3.msra.mxu0 %v3145_v13 }
 0x308   :  { %2794 = vmatpush3.msra.mxu1 %v3247_v26  ;;  %2804 = vmatprep.subr.mxu0 %v3020_v8 }
 0x309   :  { %2796 = vmatmul.mubr.msk.f32.vlgmr.msra.gmra.mxu1 %vm193_vm2, %v1197_v58  ;;  %2809 = vmatprep.subr.mxu1 %v3020_v8 }
 0x30a   :  { %2810 = vmatpush3.msra.mxu1 %v3184_v19  ;;  %2805 = vmatpush3.msra.mxu0 %v3159_v16 }
 0x30b   :  { %2811 = vmatprep.subr.mxu1 %v3020_v8  ;;  %2806 = vmatprep.mubr.msk.f32.mxu0 %vm3021_vm1, %v3020_v8 }
 0x30c   :  { %2812 = vmatpush3.msra.mxu1 %v3192_v20  ;;  %2817 = vmatprep.mubr.msk.f32.mxu1 %vm3021_vm1, %v3020_v8 }
 0x30d   :  { %2813 = vmatprep.subr.mxu1 %v3020_v8  ;;  %2820 = vmatprep.subr.mxu0 %v3020_v8 }
 0x30e   :  { %2814 = vmatpush3.msra.mxu1 %v3201_v21 }
 0x30f   :  { %2815 = vmatprep.subr.mxu1 %v3020_v8 }
 0x310   :  { %2816 = vmatpush3.msra.mxu1 %v3211_v22 }
 0x311   :  { %2831 = vmatprep.subr.mxu1 %v3020_v8 }
 0x3c1   :  { %v1269_v60 = vpop.f32.mrf.mxu1  ;;  %v1348_v61 = vpop.f32.mrf.mxu0 }
 0x3c2   :  { %v1273_v62 = vadd.f32 %v1269_v60, %v1199_v59  ;;  %v1352_v3 = vadd.f32 %v1348_v61, %v1281_v2  ;;  %v1761_v2 = vld [vmem:[#allocation3 + $0x28] sm:$0xff] }
 0x3c3   :  { %v2775_v63 = vpop.f32.mrf.mxu1  ;;  %v2786_v0 = vpop.f32.mrf.mxu0 }
 0x3c4   :  { %v2444_v1 = vmul.f32 -1.442695, %v1273_v62  ;;  %v2446_v7 = vmul.f32 -1.442695, %v1352_v3 }
 0x3c6   :  { %2962 = vpow2.f32 %v2444_v1 }
 0x3c7   :  { %2964 = vpow2.f32 %v2446_v7 }
 0x3c9   :  { %v1427_v4 = vpop.f32.mrf.mxu1 }
 0x3ca   :  { %v1428_v15 = vadd.f32 %v3314_v42, %v1427_v4 }
 0x3cb   :  { %v2797_v5 = vpop.f32.mrf.mxu1 }
 0x3d3   :  { %v2963_v9 = vpop.eup %2962 }
 0x3d4   :  { %v1277_v10 = vadd.f32 1.0, %v2963_v9  ;;  %v2965_v12 = vpop.eup %2964 }
 0x3d5   :  { %v1356_v14 = vadd.f32 1.0, %v2965_v12 }
 0x3d6   :  { %2966 = vrcp.f32 %v1277_v10 }
 0x3d7   :  { %2968 = vrcp.f32 %v1356_v14 }
 0x3e3   :  { %v2967_v17 = vpop.eup %2966 }
 0x3e4   :  { %v1431_v18 = vmul.f32 %v2967_v17, %v1428_v15  ;;  %v2969_v29 = vpop.eup %2968 }
 0x3e5   :  { %v1434_v30 = vsub.f32 1.0, %v2969_v29  ;;  %v1436_v33 = vmul.f32 %v2969_v29, %v1197_v58 }
 0x3e6   :  { %v1432_v28 = vadd.f32 %v1431_v18, %v1360_v27  ;;  %v1840_v27 = vld [vmem:[#allocation4 + $0x28] sm:$0xff] }
 0x3e8   :  { %2970 = vtanh.f32 %v1432_v28 }
 0x3f5   :  { %v2971_v31 = vpop.eup %2970 }
 0x3f6   :  { %v1435_v32 = vmul.f32 %v2971_v31, %v1434_v30 }
 0x3f8   :  { %v1437_v34 = vadd.f32 %v1436_v33, %v1435_v32 }
 0x3fa   :  { %2807 = vmatmul.mubr.msk.f32.vlgmr.msra.gmra.mxu0 %vm193_vm2, %v1437_v34  ;;  %2818 = vmatmul.mubr.msk.f32.vlgmr.msra.gmra.mxu1 %vm193_vm2, %v1437_v34 }
 0x3fb   :  { %2821 = vmatpush3.msra.mxu0 %v3216_v23  ;;  %2828 = vmatprep.mubr.msk.f32.mxu0 %vm3021_vm1, %v3020_v8 }
 0x3fc   :  { %2822 = vmatprep.subr.mxu0 %v3020_v8  ;;  %2832 = vmatpush3.msra.mxu1 %v3109_v6 }
 0x3fd   :  { %2823 = vmatpush3.msra.mxu0 %v3230_v24  ;;  %2833 = vmatprep.subr.mxu1 %v3020_v8 }
 0x3fe   :  { %2824 = vmatprep.subr.mxu0 %v3020_v8  ;;  %2834 = vmatpush3.msra.mxu1 %v3133_v11 }
 0x3ff   :  { %2825 = vmatpush3.msra.mxu0 %v3238_v25  ;;  %2835 = vmatprep.subr.mxu1 %v3020_v8 }
 0x400   :  { %2826 = vmatprep.subr.mxu0 %v3020_v8  ;;  %2836 = vmatpush3.msra.mxu1 %v3145_v13 }
 0x401   :  { %2827 = vmatpush3.msra.mxu0 %v3247_v26  ;;  %2837 = vmatprep.subr.mxu1 %v3020_v8 }
 0x402   :  { %2829 = vmatmul.mubr.msk.f32.vlgmr.msra.gmra.mxu0 %vm193_vm2, %v1437_v34  ;;  %2842 = vmatprep.subr.mxu0 %v3020_v8 }
 0x403   :  { %2843 = vmatpush3.msra.mxu0 %v3184_v19  ;;  %2838 = vmatpush3.msra.mxu1 %v3159_v16 }
 0x404   :  { %2844 = vmatprep.subr.mxu0 %v3020_v8  ;;  %2839 = vmatprep.mubr.msk.f32.mxu1 %vm3021_vm1, %v3020_v8 }
 0x405   :  { %2845 = vmatpush3.msra.mxu0 %v3192_v20  ;;  %2850 = vmatprep.mubr.msk.f32.mxu0 %vm3021_vm1, %v3020_v8 }
 0x406   :  { %2846 = vmatprep.subr.mxu0 %v3020_v8  ;;  %2853 = vmatprep.subr.mxu1 %v3020_v8 }
 0x407   :  { %2847 = vmatpush3.msra.mxu0 %v3201_v21 }
 0x408   :  { %2848 = vmatprep.subr.mxu0 %v3020_v8 }
 0x409   :  { %2849 = vmatpush3.msra.mxu0 %v3211_v22 }
 0x40a   :  { %2864 = vmatprep.subr.mxu0 %v3020_v8 }
 0x4ba   :  { %v1509_v36 = vpop.f32.mrf.mxu0  ;;  %v1588_v37 = vpop.f32.mrf.mxu1 }
 0x4bb   :  { %v1513_v38 = vadd.f32 %v1509_v36, %v1439_v35  ;;  %v1592_v44 = vadd.f32 %v1588_v37, %v1521_v43  ;;  %v3012_v35 = vld [vmem:[%s3562_s4 + $0x18] sm:$0xff]  ;;  %v3014_v36 = vld [vmem:[%s3562_s4 + $0x8] sm:$0xff] }
 0x4bc   :  { %v2808_v39 = vpop.f32.mrf.mxu0  ;;  %v2819_v40 = vpop.f32.mrf.mxu1 }
 0x4bd   :  { %v2449_v41 = vmul.f32 -1.442695, %v1513_v38  ;;  %v2451_v47 = vmul.f32 -1.442695, %v1592_v44  ;;  %v2001_v40 = vld [vmem:[#allocation3 + $0x30] sm:$0xff] }
 0x4bf   :  { %2972 = vpow2.f32 %v2449_v41 }
 0x4c0   :  { %2974 = vpow2.f32 %v2451_v47 }
 0x4c2   :  { %v1667_v45 = vpop.f32.mrf.mxu0 }
 0x4c3   :  { %v1668_v52 = vadd.f32 %v3314_v42, %v1667_v45 }
 0x4c4   :  { %v2830_v46 = vpop.f32.mrf.mxu0 }
 0x4cc   :  { %v2973_v48 = vpop.eup %2972 }
 0x4cd   :  { %v1517_v49 = vadd.f32 1.0, %v2973_v48  ;;  %v2975_v50 = vpop.eup %2974 }
 0x4ce   :  { %v1596_v51 = vadd.f32 1.0, %v2975_v50 }
 0x4cf   :  { %2976 = vrcp.f32 %v1517_v49 }
 0x4d0   :  { %2978 = vrcp.f32 %v1596_v51  ;;  %v2080_v51 = vld [vmem:[#allocation4 + $0x30] sm:$0xff] }
 0x4dc   :  { %v2977_v53 = vpop.eup %2976 }
 0x4dd   :  { %v1671_v54 = vmul.f32 %v2977_v53, %v1668_v52  ;;  %v2979_v57 = vpop.eup %2978 }
 0x4de   :  { %v1674_v58 = vsub.f32 1.0, %v2979_v57  ;;  %v1676_v61 = vmul.f32 %v2979_v57, %v1437_v34 }
 0x4df   :  { %v1672_v56 = vadd.f32 %v1671_v54, %v1600_v55 }
 0x4e1   :  { %2980 = vtanh.f32 %v1672_v56 }
 0x4ee   :  { %v2981_v59 = vpop.eup %2980 }
 0x4ef   :  { %v1675_v60 = vmul.f32 %v2981_v59, %v1674_v58  ;;  %v3016_v59 = vld [vmem:[%s3565_s6 + $0x18] sm:$0xff] }
 0x4f1   :  { %v1677_v62 = vadd.f32 %v1676_v61, %v1675_v60  ;;  %v3017_v60 = vld [vmem:[%s3565_s6 + $0x10] sm:$0xff]  ;;  %v3018_v61 = vld [vmem:[%s3565_s6 + $0x8] sm:$0xff] }
 0x4f3   :  { %2840 = vmatmul.mubr.msk.f32.vlgmr.msra.gmra.mxu1 %vm193_vm2, %v1677_v62  ;;  %2851 = vmatmul.mubr.msk.f32.vlgmr.msra.gmra.mxu0 %vm193_vm2, %v1677_v62 }
 0x4f4   :  { %2854 = vmatpush3.msra.mxu1 %v3216_v23  ;;  %2861 = vmatprep.mubr.msk.f32.mxu1 %vm3021_vm1, %v3020_v8 }
 0x4f5   :  { %2855 = vmatprep.subr.mxu1 %v3020_v8  ;;  %2865 = vmatpush3.msra.mxu0 %v3109_v6  ;;  %v1679_v6 = vld [vmem:[#allocation2 + $0x28] sm:$0xff] }
 0x4f6   :  { %2856 = vmatpush3.msra.mxu1 %v3230_v24  ;;  %2866 = vmatprep.subr.mxu0 %v3020_v8 }
 0x4f7   :  { %2857 = vmatprep.subr.mxu1 %v3020_v8  ;;  %2867 = vmatpush3.msra.mxu0 %v3133_v11 }
 0x4f8   :  { %2858 = vmatpush3.msra.mxu1 %v3238_v25  ;;  %2868 = vmatprep.subr.mxu0 %v3020_v8 }
 0x4f9   :  { %2859 = vmatprep.subr.mxu1 %v3020_v8  ;;  %2869 = vmatpush3.msra.mxu0 %v3145_v13 }
 0x4fa   :  { %2860 = vmatpush3.msra.mxu1 %v3247_v26  ;;  %2870 = vmatprep.subr.mxu0 %v3020_v8 }
 0x4fb   :  { %2862 = vmatmul.mubr.msk.f32.vlgmr.msra.gmra.mxu1 %vm193_vm2, %v1677_v62  ;;  %2875 = vmatprep.subr.mxu1 %v3020_v8 }
 0x4fc   :  { %2876 = vmatpush3.msra.mxu1 %v3184_v19  ;;  %2871 = vmatpush3.msra.mxu0 %v3159_v16 }
 0x4fd   :  { %2877 = vmatprep.subr.mxu1 %v3020_v8  ;;  %2872 = vmatprep.mubr.msk.f32.mxu0 %vm3021_vm1, %v3020_v8 }
 0x4fe   :  { %2878 = vmatpush3.msra.mxu1 %v3192_v20  ;;  %2883 = vmatprep.mubr.msk.f32.mxu1 %vm3021_vm1, %v3020_v8 }
 0x4ff   :  { %2879 = vmatprep.subr.mxu1 %v3020_v8  ;;  %2886 = vmatprep.subr.mxu0 %v3020_v8 }
 0x500   :  { %2880 = vmatpush3.msra.mxu1 %v3201_v21 }
 0x501   :  { %2881 = vmatprep.subr.mxu1 %v3020_v8 }
 0x502   :  { %2882 = vmatpush3.msra.mxu1 %v3211_v22 }
 0x503   :  { %2897 = vmatprep.subr.mxu1 %v3020_v8 }
 0x5b3   :  { %v1749_v11 = vpop.f32.mrf.mxu1  ;;  %v1828_v13 = vpop.f32.mrf.mxu0 }
 0x5b4   :  { %v1753_v16 = vadd.f32 %v1749_v11, %v1679_v6  ;;  %v1832_v3 = vadd.f32 %v1828_v13, %v1761_v2  ;;  %v2159_v6 = vld [vmem:[#allocation2 + $0x38] sm:$0xff] }
 0x5b5   :  { %v2841_v63 = vpop.f32.mrf.mxu1  ;;  %v2852_v0 = vpop.f32.mrf.mxu0  ;;  %v2241_v2 = vld [vmem:[#allocation3 + $0x38] sm:$0xff] }
 0x5b6   :  { %v2454_v1 = vmul.f32 -1.442695, %v1753_v16  ;;  %v2456_v7 = vmul.f32 -1.442695, %v1832_v3 }
 0x5b8   :  { %2982 = vpow2.f32 %v2454_v1 }
 0x5b9   :  { %2984 = vpow2.f32 %v2456_v7 }
 0x5bb   :  { %v1907_v4 = vpop.f32.mrf.mxu1 }
 0x5bc   :  { %v1908_v15 = vadd.f32 %v3314_v42, %v1907_v4 }
 0x5bd   :  { %v2863_v5 = vpop.f32.mrf.mxu1 }
 0x5c5   :  { %v2983_v9 = vpop.eup %2982 }
 0x5c6   :  { %v1757_v10 = vadd.f32 1.0, %v2983_v9  ;;  %v2985_v12 = vpop.eup %2984 }
 0x5c7   :  { %v1836_v14 = vadd.f32 1.0, %v2985_v12 }
 0x5c8   :  { %2986 = vrcp.f32 %v1757_v10 }
 0x5c9   :  { %2988 = vrcp.f32 %v1836_v14 }
 0x5d5   :  { %v2987_v17 = vpop.eup %2986 }
 0x5d6   :  { %v1911_v18 = vmul.f32 %v2987_v17, %v1908_v15  ;;  %v2989_v29 = vpop.eup %2988 }
 0x5d7   :  { %v1914_v30 = vsub.f32 1.0, %v2989_v29  ;;  %v1916_v33 = vmul.f32 %v2989_v29, %v1677_v62  ;;  %v3019_v62 = vld [vmem:[%s3565_s6] sm:$0xff] }
 0x5d8   :  { %v1912_v28 = vadd.f32 %v1911_v18, %v1840_v27  ;;  %v2320_v18 = vld [vmem:[#allocation4 + $0x38] sm:$0xff] }
 0x5da   :  { %2990 = vtanh.f32 %v1912_v28 }
 0x5e7   :  { %v2991_v31 = vpop.eup %2990 }
 0x5e8   :  { %v1915_v32 = vmul.f32 %v2991_v31, %v1914_v30 }
 0x5ea   :  { %v3487_v34 = vadd.f32 %v1916_v33, %v1915_v32 }
 0x5ec   :  { %2873 = vmatmul.mubr.msk.f32.vlgmr.msra.gmra.mxu0 %vm193_vm2, %v3487_v34  ;;  %2884 = vmatmul.mubr.msk.f32.vlgmr.msra.gmra.mxu1 %vm193_vm2, %v3487_v34 }
 0x5ed   :  { %2887 = vmatpush3.msra.mxu0 %v3216_v23  ;;  %2894 = vmatprep.mubr.msk.f32.mxu0 %vm3021_vm1, %v3020_v8  ;;  %v3013_v23 = vld [vmem:[%s3562_s4 + $0x10] sm:$0xff] }
 0x5ee   :  { %2888 = vmatprep.subr.mxu0 %v3020_v8  ;;  %2898 = vmatpush3.msra.mxu1 %v3012_v35 }
 0x5ef   :  { %2889 = vmatpush3.msra.mxu0 %v3230_v24  ;;  %2899 = vmatprep.subr.mxu1 %v3020_v8  ;;  %v3015_v24 = vld [vmem:[%s3562_s4] sm:$0xff] }
 0x5f0   :  { %2890 = vmatprep.subr.mxu0 %v3020_v8  ;;  %2900 = vmatpush3.msra.mxu1 %v3013_v23 }
 0x5f1   :  { %2891 = vmatpush3.msra.mxu0 %v3238_v25  ;;  %2901 = vmatprep.subr.mxu1 %v3020_v8 }
 0x5f2   :  { %2892 = vmatprep.subr.mxu0 %v3020_v8  ;;  %2902 = vmatpush3.msra.mxu1 %v3014_v36 }
 0x5f3   :  { %2893 = vmatpush3.msra.mxu0 %v3247_v26  ;;  %2903 = vmatprep.subr.mxu1 %v3020_v8 }
 0x5f4   :  { %2895 = vmatmul.mubr.msk.f32.vlgmr.msra.gmra.mxu0 %vm193_vm2, %v3487_v34  ;;  %2908 = vmatprep.subr.mxu0 %v3020_v8 }
 0x5f5   :  { %2909 = vmatpush3.msra.mxu0 %v3184_v19  ;;  %2904 = vmatpush3.msra.mxu1 %v3015_v24  ;;  %v1919_v19 = vld [vmem:[#allocation2 + $0x30] sm:$0xff] }
 0x5f6   :  { %2910 = vmatprep.subr.mxu0 %v3020_v8  ;;  %2905 = vmatprep.mubr.msk.f32.mxu1 %vm3021_vm1, %v3020_v8 }
 0x5f7   :  { %2911 = vmatpush3.msra.mxu0 %v3192_v20  ;;  %2916 = vmatprep.mubr.msk.f32.mxu0 %vm3021_vm1, %v3020_v8 }
 0x5f8   :  { %2912 = vmatprep.subr.mxu0 %v3020_v8  ;;  %2919 = vmatprep.subr.mxu1 %v3020_v8 }
 0x5f9   :  { %2913 = vmatpush3.msra.mxu0 %v3201_v21 }
 0x5fa   :  { %2914 = vmatprep.subr.mxu0 %v3020_v8 }
 0x5fb   :  { %2915 = vmatpush3.msra.mxu0 %v3211_v22 }
 0x6ac   :  { %v1989_v25 = vpop.f32.mrf.mxu0  ;;  %v2068_v26 = vpop.f32.mrf.mxu1 }
 0x6ad   :  { %v1993_v37 = vadd.f32 %v1989_v25, %v1919_v19  ;;  %v2072_v41 = vadd.f32 %v2068_v26, %v2001_v40 }
 0x6ae   :  { %v2874_v38 = vpop.f32.mrf.mxu0  ;;  %v2885_v39 = vpop.f32.mrf.mxu1 }
 0x6af   :  { %v2459_v20 = vmul.f32 -1.442695, %v1993_v37  ;;  %v2461_v45 = vmul.f32 -1.442695, %v2072_v41 }
 0x6b1   :  { %2992 = vpow2.f32 %v2459_v20 }
 0x6b2   :  { %2994 = vpow2.f32 %v2461_v45 }
 0x6b4   :  { %v2147_v43 = vpop.f32.mrf.mxu0 }
 0x6b5   :  { %v2148_v22 = vadd.f32 %v3314_v42, %v2147_v43 }
 0x6b6   :  { %v2896_v44 = vpop.f32.mrf.mxu0 }
 0x6be   :  { %v2993_v46 = vpop.eup %2992 }
 0x6bf   :  { %v1997_v21 = vadd.f32 1.0, %v2993_v46  ;;  %v2995_v47 = vpop.eup %2994 }
 0x6c0   :  { %v2076_v48 = vadd.f32 1.0, %v2995_v47 }
 0x6c1   :  { %2996 = vrcp.f32 %v1997_v21 }
 0x6c2   :  { %2998 = vrcp.f32 %v2076_v48 }
 0x6ce   :  { %v2997_v49 = vpop.eup %2996 }
 0x6cf   :  { %v2151_v50 = vmul.f32 %v2997_v49, %v2148_v22  ;;  %v2999_v53 = vpop.eup %2998 }
 0x6d0   :  { %v2154_v54 = vsub.f32 1.0, %v2999_v53  ;;  %v2156_v57 = vmul.f32 %v2999_v53, %v3487_v34 }
 0x6d1   :  { %v2152_v52 = vadd.f32 %v2151_v50, %v2080_v51 }
 0x6d3   :  { %3000 = vtanh.f32 %v2152_v52 }
 0x6e0   :  { %v3001_v55 = vpop.eup %3000 }
 0x6e1   :  { %v2155_v56 = vmul.f32 %v3001_v55, %v2154_v54 }
 0x6e3   :  { %v2157_v58 = vadd.f32 %v2156_v57, %v2155_v56 }
 0x6e5   :  { %2906 = vmatmul.mubr.msk.f32.vlgmr.msra.gmra.mxu1 %vm193_vm2, %v2157_v58  ;;  %2917 = vmatmul.mubr.msk.f32.vlgmr.msra.gmra.mxu0 %vm193_vm2, %v2157_v58 }
 0x6e6   :  { %2920 = vmatpush3.msra.mxu1 %v3016_v59  ;;  %2927 = vmatprep.mubr.msk.f32.mxu1 %vm3021_vm1, %v3020_v8 }
 0x6e7   :  { %2921 = vmatprep.subr.mxu1 %v3020_v8 }
 0x6e8   :  { %2922 = vmatpush3.msra.mxu1 %v3017_v60 }
 0x6e9   :  { %2923 = vmatprep.subr.mxu1 %v3020_v8 }
 0x6ea   :  { %2924 = vmatpush3.msra.mxu1 %v3018_v61 }
 0x6eb   :  { %2925 = vmatprep.subr.mxu1 %v3020_v8 }
 0x6ec   :  { %2926 = vmatpush3.msra.mxu1 %v3019_v62 }
 0x6ed   :  { %2928 = vmatmul.mubr.msk.f32.vlgmr.msra.gmra.mxu1 %vm193_vm2, %v2157_v58 }
 0x7a5   :  { %v2229_v11 = vpop.f32.mrf.mxu1  ;;  %v2308_v13 = vpop.f32.mrf.mxu0 }
 0x7a6   :  { %v2233_v16 = vadd.f32 %v2229_v11, %v2159_v6  ;;  %v2312_v3 = vadd.f32 %v2308_v13, %v2241_v2 }
 0x7a7   :  { %v2907_v63 = vpop.f32.mrf.mxu1  ;;  %v2918_v0 = vpop.f32.mrf.mxu0 }
 0x7a8   :  { %v2464_v1 = vmul.f32 -1.442695, %v2233_v16  ;;  %v2466_v8 = vmul.f32 -1.442695, %v2312_v3 }
 0x7aa   :  { %3002 = vpow2.f32 %v2464_v1 }
 0x7ab   :  { %3004 = vpow2.f32 %v2466_v8 }
 0x7ad   :  { %v2387_v4 = vpop.f32.mrf.mxu1 }
 0x7ae   :  { %v2388_v14 = vadd.f32 %v3314_v42, %v2387_v4 }
 0x7af   :  { %v2929_v5 = vpop.f32.mrf.mxu1 }
 0x7b7   :  { %v3003_v7 = vpop.eup %3002 }
 0x7b8   :  { %v2237_v9 = vadd.f32 1.0, %v3003_v7  ;;  %v3005_v10 = vpop.eup %3004 }
 0x7b9   :  { %v2316_v12 = vadd.f32 1.0, %v3005_v10 }
 0x7ba   :  { %3006 = vrcp.f32 %v2237_v9 }
 0x7bb   :  { %3008 = vrcp.f32 %v2316_v12 }
 0x7c7   :  { %v3007_v15 = vpop.eup %3006 }
 0x7c8   :  { %v2391_v17 = vmul.f32 %v3007_v15, %v2388_v14  ;;  %v3009_v28 = vpop.eup %3008 }
 0x7c9   :  { %v2394_v29 = vsub.f32 1.0, %v3009_v28  ;;  %v2396_v31 = vmul.f32 %v3009_v28, %v2157_v58 }
 0x7ca   :  { %v2392_v27 = vadd.f32 %v2391_v17, %v2320_v18 }
 0x7cc   :  { %3010 = vtanh.f32 %v2392_v27 }
 0x7d9   :  { %v3011_v30 = vpop.eup %3010 }
 0x7da   :  { %v2395_v32 = vmul.f32 %v3011_v30, %v2394_v29 }
 0x7dc   :  { %v2397_v33 = vadd.f32 %v2396_v31, %v2395_v32 }
 0x7de   :  { %2398 = vst.msk [vmem:[%s3570_s11] sm:$0xff] %vm193_vm2, %v2397_v33 }

// kernel: seq2seq_forward.4
= control target key start
LH: loop header
LB: loop body
LE: loop exit
PB: predicated region body
PF: predicated region fallthrough
CT: control target
= control target key end

     0   :  { %v3022_v0 = vmov 0.0   ;;  %vm62_vm0 = vcmask 261120   ;;  %vm3023_vm1 = vmmov 0   ;;  %vm308_vm2 = vcmask 130048   ;;  %s3605_s5 = inlined_call_operand.vmem [shape: f32[32,32], index: 5, kind: input, shape index: {}]   ;;  %s3606_s6 = inlined_call_operand.vmem [shape: f32[32,32], index: 6, kind: input, shape index: {}]   ;;  %s3607_s1 = inlined_call_operand.vmem [shape: f32[8,32], index: 1, kind: input, shape index: {}]   ;;  %s3608_s2 = inlined_call_operand.vmem [shape: f32[16,32], index: 2, kind: input, shape index: {}]   ;;  %s3609_s7 = inlined_call_operand.vmem [shape: f32[32,32], index: 7, kind: input, shape index: {}]   ;;  %s3610_s0 = inlined_call_operand.vmem [shape: f32[8,8,16], index: 0, kind: input, shape index: {}]   ;;  %s3611_s3 = inlined_call_operand.vmem [shape: f32[16,32], index: 3, kind: input, shape index: {}]   ;;  %s3612_s8 = inlined_call_operand.vmem [shape: f32[32,32], index: 8, kind: input, shape index: {}]   ;;  %s3613_s4 = inlined_call_operand.vmem [shape: f32[16,32], index: 4, kind: input, shape index: {}]   ;;  %s3614_s10 = inlined_call_operand.vmem [shape: f32[32,32], index: 10, kind: input, shape index: {}]   ;;  %s3615_s9 = inlined_call_operand.vmem [shape: f32[32,32], index: 9, kind: input, shape index: {}]   ;;  %s3616_s15 = inlined_call_operand.vmem [shape: f32[8,8,32], index: 15, kind: output, shape index: {}]   ;;  %s3617_s11 = inlined_call_operand.vmem [shape: f32[1,32], index: 11, kind: input, shape index: {}]   ;;  %s3618_s12 = inlined_call_operand.vmem [shape: f32[1,32], index: 12, kind: input, shape index: {}]   ;;  %s3619_s13 = inlined_call_operand.vmem [shape: f32[1,32], index: 13, kind: input, shape index: {}]   ;;  %s3620_s14 = inlined_call_operand.vmem [shape: f32[1,32], index: 14, kind: input, shape index: {}]  }
   0x1   :  { %2638 = vmatprep.subr.mxu0 %v3022_v0  ;;  %2649 = vmatprep.subr.mxu1 %v3022_v0  ;;  %v54_v1 = vld [vmem:[%s3605_s5 + $0x18] sm:$0xff]  ;;  %v53_v3 = vld [vmem:[%s3605_s5 + $0x10] sm:$0xff]  ;;  %v52_v5 = vld [vmem:[%s3605_s5 + $0x8] sm:$0xff]  ;;  %713 = vst.msk [vmem:[%s3616_s15] sm:$0xff] %vm62_vm0, %v3022_v0 }
   0x2   :  { %v139_v2 = vld [vmem:[%s3606_s6 + $0x18] sm:$0xff]  ;;  %2639 = vmatpush3.msra.mxu0 %v54_v1  ;;  %v138_v4 = vld [vmem:[%s3606_s6 + $0x10] sm:$0xff]  ;;  %v137_v6 = vld [vmem:[%s3606_s6 + $0x8] sm:$0xff]  ;;  %2646 = vmatprep.mubr.msk.f32.mxu0 %vm3023_vm1, %v3022_v0 }
   0x3   :  { %2650 = vmatpush3.msra.mxu1 %v139_v2  ;;  %2640 = vmatprep.subr.mxu0 %v3022_v0  ;;  %v51_v7 = vld [vmem:[%s3605_s5] sm:$0xff]  ;;  %v307_v10 = vld [vmem:[%s3608_s2 + $0x8] sm:$0xff]  ;;  %v220_v11 = vld [vmem:[%s3609_s7 + $0x18] sm:$0xff] }
   0x4   :  { %2651 = vmatprep.subr.mxu1 %v3022_v0  ;;  %2641 = vmatpush3.msra.mxu0 %v53_v3  ;;  %v136_v8 = vld [vmem:[%s3606_s6] sm:$0xff]  ;;  %v219_v13 = vld [vmem:[%s3609_s7 + $0x10] sm:$0xff]  ;;  %v299_v15 = vld [vmem:[%s3610_s0 + $0x8] sm:$0xff] }
   0x5   :  { %2652 = vmatpush3.msra.mxu1 %v138_v4  ;;  %2642 = vmatprep.subr.mxu0 %v3022_v0  ;;  %v3139_v9 = vld [vmem:[%s3607_s1] sm:$0xff]  ;;  %v218_v16 = vld [vmem:[%s3609_s7 + $0x8] sm:$0xff]  ;;  %v300_v18 = vld [vmem:[%s3610_s0 + $0x10] sm:$0xff] }
   0x6   :  { %2653 = vmatprep.subr.mxu1 %v3022_v0  ;;  %2643 = vmatpush3.msra.mxu0 %v52_v5  ;;  %v306_v12 = vld [vmem:[%s3608_s2] sm:$0xff]  ;;  %v455_v19 = vld [vmem:[%s3611_s3 + $0x8] sm:$0xff]  ;;  %v301_v20 = vld [vmem:[%s3610_s0 + $0x18] sm:$0xff] }
   0x7   :  { %2654 = vmatpush3.msra.mxu1 %v137_v6  ;;  %2644 = vmatprep.subr.mxu0 %v3022_v0  ;;  %v298_v14 = vld [vmem:[%s3610_s0] sm:$0xff]  ;;  %v303_v23 = vld [vmem:[%s3610_s0 + $0x28] sm:$0xff]  ;;  %v3207_v24 = vld [vmem:[%s3612_s8 + $0x18] sm:$0xff] }
   0x8   :  { %2655 = vmatprep.subr.mxu1 %v3022_v0  ;;  %2645 = vmatpush3.msra.mxu0 %v51_v7  ;;  %v217_v17 = vld [vmem:[%s3609_s7] sm:$0xff]  ;;  %v304_v25 = vld [vmem:[%s3610_s0 + $0x30] sm:$0xff]  ;;  %v578_v26 = vld [vmem:[%s3613_s4 + $0x8] sm:$0xff] }
   0x9   :  { %2656 = vmatpush3.msra.mxu1 %v136_v8  ;;  %2657 = vmatprep.mubr.msk.f32.mxu1 %vm3023_vm1, %v3022_v0  ;;  %v454_v21 = vld [vmem:[%s3611_s3] sm:$0xff]  ;;  %v305_v27 = vld [vmem:[%s3610_s0 + $0x38] sm:$0xff]  ;;  %v3228_v28 = vld [vmem:[%s3612_s8 + $0x10] sm:$0xff] }
   0xa   :  { %2647 = vmatmul.mubr.msk.f32.vlgmr.msra.gmra.mxu0 %vm62_vm0, %v3139_v9  ;;  %2658 = vmatmul.mubr.msk.f32.vlgmr.msra.gmra.mxu1 %vm62_vm0, %v3139_v9  ;;  %v302_v22 = vld [vmem:[%s3610_s0 + $0x20] sm:$0xff]  ;;  %v3241_v30 = vld [vmem:[%s3612_s8 + $0x8] sm:$0xff]  ;;  %v3251_v31 = vld [vmem:[%s3614_s10 + $0x18] sm:$0xff] }
   0xb   :  { %2660 = vmatprep.subr.mxu0 %v3022_v0  ;;  %2671 = vmatprep.subr.mxu1 %v307_v10  ;;  %v577_v29 = vld [vmem:[%s3613_s4] sm:$0xff]  ;;  %v3269_v33 = vld [vmem:[%s3614_s10 + $0x10] sm:$0xff]  ;;  %v3277_v34 = vld [vmem:[%s3615_s9 + $0x18] sm:$0xff] }
   0xc   :  { %2661 = vmatpush3.msra.mxu0 %v220_v11  ;;  %2672 = vmatpush3.msra.mxu1 %v307_v10  ;;  %v3258_v32 = vld [vmem:[%s3612_s8] sm:$0xff]  ;;  %v3286_v35 = vld [vmem:[%s3615_s9 + $0x10] sm:$0xff]  ;;  %v3296_v36 = vld [vmem:[%s3615_s9 + $0x8] sm:$0xff] }
   0xd   :  { %2662 = vmatprep.subr.mxu0 %v3022_v0  ;;  %2673 = vmatprep.subr.mxu1 %v306_v12  ;;  %v3304_v37 = vld [vmem:[%s3614_s10 + $0x8] sm:$0xff]  ;;  %v3310_v38 = vld [vmem:[%s3615_s9] sm:$0xff] }
   0xe   :  { %2663 = vmatpush3.msra.mxu0 %v219_v13  ;;  %2674 = vmatpush3.msra.mxu1 %v306_v12  ;;  %v3318_v39 = vld [vmem:[%s3614_s10] sm:$0xff] }
   0xf   :  { %2675 = vmatprep.mubr.msk.f32.mxu1 %vm308_vm2, %v298_v14  ;;  %2664 = vmatprep.subr.mxu0 %v3022_v0  ;;  %v2415_v40 = vld [vmem:[%s3617_s11] ss:$0 sm:$0xff] }
  0x10   :  { %2676 = vmatmul.mubr.msk.f32.vlgmr.msra.gmra.mxu1 %vm308_vm2, %v299_v15  ;;  %2665 = vmatpush3.msra.mxu0 %v218_v16  ;;  %v2417_v47 = vld [vmem:[%s3618_s12] ss:$0 sm:$0xff] }
  0x11   :  { %2666 = vmatprep.subr.mxu0 %v3022_v0  ;;  %2668 = vmatprep.mubr.msk.f32.mxu0 %vm3023_vm1, %v3022_v0  ;;  %v2419_v2 = vld [vmem:[%s3619_s13] ss:$0 sm:$0xff] }
  0x12   :  { %2667 = vmatpush3.msra.mxu0 %v217_v17  ;;  %2678 = vmatprep.mubr.msk.f32.mxu1 %vm308_vm2, %v300_v18 }
  0x13   :  { %2669 = vmatmul.mubr.msk.f32.vlgmr.msra.gmra.mxu0 %vm62_vm0, %v3139_v9  ;;  %2687 = vmatprep.subr.mxu0 %v455_v19 }
  0x14   :  { %2679 = vmatmul.mubr.msk.f32.gmra.mxu1 %vm308_vm2, %v301_v20  ;;  %2688 = vmatpush3.msra.mxu0 %v455_v19 }
  0x15   :  { %2689 = vmatprep.subr.mxu0 %v454_v21  ;;  %2681 = vmatprep.mubr.msk.f32.mxu1 %vm308_vm2, %v302_v22 }
  0x16   :  { %2690 = vmatpush3.msra.mxu0 %v454_v21  ;;  %2691 = vmatprep.mubr.msk.f32.mxu0 %vm308_vm2, %v298_v14 }
  0x17   :  { %2692 = vmatmul.mubr.msk.f32.vlgmr.msra.gmra.mxu0 %vm308_vm2, %v299_v15  ;;  %2719 = vmatprep.subr.mxu0 %v3022_v0 }
  0x18   :  { %2682 = vmatmul.mubr.msk.f32.gmra.mxu1 %vm308_vm2, %v303_v23  ;;  %2720 = vmatpush3.msra.mxu0 %v3207_v24 }
  0x19   :  { %2684 = vmatprep.mubr.msk.f32.mxu1 %vm308_vm2, %v304_v25  ;;  %2694 = vmatprep.mubr.msk.f32.mxu0 %vm308_vm2, %v300_v18 }
  0x1a   :  { %2703 = vmatprep.subr.mxu1 %v578_v26  ;;  %2721 = vmatprep.subr.mxu0 %v3022_v0 }
  0x1b   :  { %2695 = vmatmul.mubr.msk.f32.gmra.mxu0 %vm308_vm2, %v301_v20  ;;  %2704 = vmatpush3.msra.mxu1 %v578_v26 }
  0x1c   :  { %2685 = vmatmul.mubr.msk.f32.gmra.mxu1 %vm308_vm2, %v305_v27  ;;  %2722 = vmatpush3.msra.mxu0 %v3228_v28 }
  0x1d   :  { %2705 = vmatprep.subr.mxu1 %v577_v29  ;;  %2697 = vmatprep.mubr.msk.f32.mxu0 %vm308_vm2, %v302_v22 }
  0x1e   :  { %2706 = vmatpush3.msra.mxu1 %v577_v29  ;;  %2707 = vmatprep.mubr.msk.f32.mxu1 %vm308_vm2, %v298_v14 }
  0x1f   :  { %2698 = vmatmul.mubr.msk.f32.gmra.mxu0 %vm308_vm2, %v303_v23  ;;  %2723 = vmatprep.subr.mxu0 %v3022_v0 }
  0x20   :  { %2708 = vmatmul.mubr.msk.f32.vlgmr.msra.gmra.mxu1 %vm308_vm2, %v299_v15  ;;  %2724 = vmatpush3.msra.mxu0 %v3241_v30 }
  0x21   :  { %2700 = vmatprep.mubr.msk.f32.mxu0 %vm308_vm2, %v304_v25  ;;  %2710 = vmatprep.mubr.msk.f32.mxu1 %vm308_vm2, %v300_v18 }
  0x22   :  { %2725 = vmatprep.subr.mxu0 %v3022_v0  ;;  %2741 = vmatprep.subr.mxu1 %v3022_v0 }
  0x23   :  { %2701 = vmatmul.mubr.msk.f32.gmra.mxu0 %vm308_vm2, %v305_v27  ;;  %2742 = vmatpush3.msra.mxu1 %v3251_v31 }
  0x24   :  { %2711 = vmatmul.mubr.msk.f32.gmra.mxu1 %vm308_vm2, %v301_v20  ;;  %2726 = vmatpush3.msra.mxu0 %v3258_v32 }
  0x25   :  { %2713 = vmatprep.mubr.msk.f32.mxu1 %vm308_vm2, %v302_v22  ;;  %2727 = vmatprep.mubr.msk.f32.mxu0 %vm3023_vm1, %v3022_v0 }
  0x26   :  { %2730 = vmatprep.subr.mxu0 %v3022_v0  ;;  %2743 = vmatprep.subr.mxu1 %v3022_v0 }
  0x27   :  { %2728 = vmatmul.mubr.msk.f32.vlgmr.msra.gmra.mxu0 %vm62_vm0, %v3139_v9  ;;  %2744 = vmatpush3.msra.mxu1 %v3269_v33 }
  0x28   :  { %2714 = vmatmul.mubr.msk.f32.gmra.mxu1 %vm308_vm2, %v303_v23  ;;  %2731 = vmatpush3.msra.mxu0 %v3277_v34 }
  0x29   :  { %2732 = vmatprep.subr.mxu0 %v3022_v0  ;;  %2716 = vmatprep.mubr.msk.f32.mxu1 %vm308_vm2, %v304_v25 }
  0x2a   :  { %2733 = vmatpush3.msra.mxu0 %v3286_v35  ;;  %2738 = vmatprep.mubr.msk.f32.mxu0 %vm3023_vm1, %v3022_v0 }
  0x2b   :  { %2734 = vmatprep.subr.mxu0 %v3022_v0  ;;  %2745 = vmatprep.subr.mxu1 %v3022_v0 }
  0x2c   :  { %2717 = vmatmul.mubr.msk.f32.gmra.mxu1 %vm308_vm2, %v305_v27  ;;  %2735 = vmatpush3.msra.mxu0 %v3296_v36 }
  0x2d   :  { %2736 = vmatprep.subr.mxu0 %v3022_v0  ;;  %2746 = vmatpush3.msra.mxu1 %v3304_v37 }
  0x2e   :  { %2737 = vmatpush3.msra.mxu0 %v3310_v38  ;;  %2747 = vmatprep.subr.mxu1 %v3022_v0 }
  0x2f   :  { %2739 = vmatmul.mubr.msk.f32.vlgmr.msra.gmra.mxu0 %vm62_vm0, %v3139_v9  ;;  %2748 = vmatpush3.msra.mxu1 %v3318_v39 }
  0x30   :  { %2749 = vmatprep.mubr.msk.f32.mxu1 %vm3023_vm1, %v3022_v0  ;;  %2752 = vmatprep.subr.mxu0 %v3022_v0 }
  0x31   :  { %2750 = vmatmul.mubr.msk.f32.vlgmr.msra.gmra.mxu1 %vm62_vm0, %v3139_v9  ;;  %2753 = vmatpush3.msra.mxu0 %v3207_v24 }
  0x32   :  { %2763 = vmatprep.subr.mxu1 %v3022_v0  ;;  %2754 = vmatprep.subr.mxu0 %v3022_v0 }
  0x33   :  { %2764 = vmatpush3.msra.mxu1 %v3277_v34  ;;  %2755 = vmatpush3.msra.mxu0 %v3228_v28 }
  0x34   :  { %2765 = vmatprep.subr.mxu1 %v3022_v0  ;;  %2756 = vmatprep.subr.mxu0 %v3022_v0 }
  0x35   :  { %2766 = vmatpush3.msra.mxu1 %v3286_v35  ;;  %2757 = vmatpush3.msra.mxu0 %v3241_v30 }
  0x36   :  { %2767 = vmatprep.subr.mxu1 %v3022_v0  ;;  %2758 = vmatprep.subr.mxu0 %v3022_v0 }
  0x37   :  { %2768 = vmatpush3.msra.mxu1 %v3296_v36  ;;  %2759 = vmatpush3.msra.mxu0 %v3258_v32 }
  0x38   :  { %2769 = vmatprep.subr.mxu1 %v3022_v0  ;;  %2760 = vmatprep.mubr.msk.f32.mxu0 %vm3023_vm1, %v3022_v0 }
  0x39   :  { %2770 = vmatpush3.msra.mxu1 %v3310_v38  ;;  %2771 = vmatprep.mubr.msk.f32.mxu1 %vm3023_vm1, %v3022_v0 }
  0x3a   :  { %2774 = vmatprep.subr.mxu0 %v3022_v0  ;;  %2785 = vmatprep.subr.mxu1 %v3022_v0 }
  0xca   :  { %v132_v41 = vpop.f32.mrf.mxu0  ;;  %v213_v42 = vpop.f32.mrf.mxu1 }
  0xcb   :  { %v133_v45 = vadd.f32 %v2415_v40, %v132_v41  ;;  %v214_v51 = vadd.f32 %v2417_v47, %v213_v42 }
  0xcc   :  { %v2648_v43 = vpop.f32.mrf.mxu0  ;;  %v2659_v44 = vpop.f32.mrf.mxu1 }
  0xd0   :  { %v2677_v46 = vpop.f32.mrf.mxu1 }
  0xd1   :  { %v439_v48 = vadd.f32 %v2677_v46, %v133_v45 }
  0xd2   :  { %v399_v49 = vpop.f32.mrf.mxu1 }
  0xd3   :  { %447 = vst.msk [vmem:[#allocation2 + $0x8] sm:$0xff] %vm62_vm0, %v439_v48  ;;  %v294_v50 = vpop.f32.mrf.mxu0 }
  0xd4   :  { %v2680_v52 = vpop.f32.mrf.mxu1  ;;  %v295_v10 = vadd.f32 %v2419_v2, %v294_v50 }
  0xd5   :  { %v441_v53 = vadd.f32 %v2680_v52, %v133_v45  ;;  %v2670_v54 = vpop.f32.mrf.mxu0 }
  0xd6   :  { %v409_v55 = vpop.f32.mrf.mxu1 }
  0xd7   :  { %449 = vst.msk [vmem:[#allocation2 + $0x18] sm:$0xff] %vm62_vm0, %v441_v53  ;;  %v440_v56 = vadd.f32 %v409_v55, %v133_v45  ;;  %v2693_v57 = vpop.f32.mrf.mxu0 }
  0xd8   :  { %v2683_v58 = vpop.f32.mrf.mxu1  ;;  %v562_v59 = vadd.f32 %v2693_v57, %v214_v51 }
  0xd9   :  { %448 = vst.msk [vmem:[#allocation2 + $0x10] sm:$0xff] %vm62_vm0, %v440_v56  ;;  %v443_v60 = vadd.f32 %v2683_v58, %v133_v45  ;;  %v522_v61 = vpop.f32.mrf.mxu0 }
  0xda   :  { %570 = vst.msk [vmem:[#allocation3 + $0x8] sm:$0xff] %vm62_vm0, %v562_v59  ;;  %v419_v62 = vpop.f32.mrf.mxu1  ;;  %v715_v29 = vld [vmem:[#allocation2 + $0x8] sm:$0xff] }
  0xdb   :  { %451 = vst.msk [vmem:[#allocation2 + $0x28] sm:$0xff] %vm62_vm0, %v443_v60  ;;  %v442_v63 = vadd.f32 %v419_v62, %v133_v45  ;;  %v2696_v1 = vpop.f32.mrf.mxu0  ;;  %v3391_v62 = vld [vmem:[%s3620_s14] ss:$0 sm:$0xff] }
  0xdc   :  { %v2686_v3 = vpop.f32.mrf.mxu1  ;;  %v564_v4 = vadd.f32 %v2696_v1, %v214_v51 }
  0xdd   :  { %450 = vst.msk [vmem:[#allocation2 + $0x20] sm:$0xff] %vm62_vm0, %v442_v63  ;;  %v445_v5 = vadd.f32 %v2686_v3, %v133_v45  ;;  %v532_v6 = vpop.f32.mrf.mxu0 }
  0xde   :  { %572 = vst.msk [vmem:[#allocation3 + $0x18] sm:$0xff] %vm62_vm0, %v564_v4  ;;  %v429_v7 = vpop.f32.mrf.mxu1  ;;  %v563_v8 = vadd.f32 %v532_v6, %v214_v51 }
  0xdf   :  { %453 = vst.msk [vmem:[#allocation2 + $0x38] sm:$0xff] %vm62_vm0, %v445_v5  ;;  %v444_v11 = vadd.f32 %v429_v7, %v133_v45  ;;  %v2699_v12 = vpop.f32.mrf.mxu0 }
  0xe0   :  { %571 = vst.msk [vmem:[#allocation3 + $0x10] sm:$0xff] %vm62_vm0, %v563_v8  ;;  %v566_v13 = vadd.f32 %v2699_v12, %v214_v51  ;;  %v2709_v14 = vpop.f32.mrf.mxu1 }
  0xe1   :  { %452 = vst.msk [vmem:[#allocation2 + $0x30] sm:$0xff] %vm62_vm0, %v444_v11  ;;  %v685_v15 = vadd.f32 %v2709_v14, %v295_v10  ;;  %v542_v16 = vpop.f32.mrf.mxu0  ;;  %v794_v52 = vld [vmem:[#allocation3 + $0x8] sm:$0xff] }
  0xe2   :  { %574 = vst.msk [vmem:[#allocation3 + $0x28] sm:$0xff] %vm62_vm0, %v566_v13  ;;  %v565_v17 = vadd.f32 %v542_v16, %v214_v51  ;;  %v645_v18 = vpop.f32.mrf.mxu1 }
  0xe3   :  { %693 = vst.msk [vmem:[#allocation4 + $0x8] sm:$0xff] %vm62_vm0, %v685_v15  ;;  %v2702_v19 = vpop.f32.mrf.mxu0 }
  0xe4   :  { %573 = vst.msk [vmem:[#allocation3 + $0x20] sm:$0xff] %vm62_vm0, %v565_v17  ;;  %v568_v20 = vadd.f32 %v2702_v19, %v214_v51  ;;  %v2712_v21 = vpop.f32.mrf.mxu1 }
  0xe5   :  { %v687_v22 = vadd.f32 %v2712_v21, %v295_v10  ;;  %v552_v23 = vpop.f32.mrf.mxu0 }
  0xe6   :  { %576 = vst.msk [vmem:[#allocation3 + $0x38] sm:$0xff] %vm62_vm0, %v568_v20  ;;  %v567_v25 = vadd.f32 %v552_v23, %v214_v51  ;;  %v655_v26 = vpop.f32.mrf.mxu1 }
  0xe7   :  { %695 = vst.msk [vmem:[#allocation4 + $0x18] sm:$0xff] %vm62_vm0, %v687_v22  ;;  %v686_v27 = vadd.f32 %v655_v26, %v295_v10  ;;  %v782_v40 = vpop.f32.mrf.mxu0  ;;  %v1042_v19 = vld [vmem:[#allocation3 + $0x10] sm:$0xff] }
  0xe8   :  { %575 = vst.msk [vmem:[#allocation3 + $0x30] sm:$0xff] %vm62_vm0, %v567_v25  ;;  %v2715_v41 = vpop.f32.mrf.mxu1  ;;  %v786_v42 = vadd.f32 %v782_v40, %v715_v29 }
  0xe9   :  { %694 = vst.msk [vmem:[#allocation4 + $0x10] sm:$0xff] %vm62_vm0, %v686_v27  ;;  %v689_v43 = vadd.f32 %v2715_v41, %v295_v10  ;;  %v2729_v44 = vpop.f32.mrf.mxu0 }
  0xea   :  { %v2446_v45 = vmul.f32 -1.442695, %v786_v42  ;;  %v665_v46 = vpop.f32.mrf.mxu1  ;;  %v873_v4 = vld [vmem:[#allocation4 + $0x8] sm:$0xff] }
  0xeb   :  { %697 = vst.msk [vmem:[#allocation4 + $0x28] sm:$0xff] %vm62_vm0, %v689_v43  ;;  %v688_v47 = vadd.f32 %v665_v46, %v295_v10 }
  0xec   :  { %2952 = vpow2.f32 %v2446_v45  ;;  %v2718_v48 = vpop.f32.mrf.mxu1 }
  0xed   :  { %696 = vst.msk [vmem:[#allocation4 + $0x20] sm:$0xff] %vm62_vm0, %v688_v47  ;;  %v691_v49 = vadd.f32 %v2718_v48, %v295_v10 }
  0xee   :  { %v675_v50 = vpop.f32.mrf.mxu1 }
  0xef   :  { %699 = vst.msk [vmem:[#allocation4 + $0x38] sm:$0xff] %vm62_vm0, %v691_v49  ;;  %v690_v51 = vadd.f32 %v675_v50, %v295_v10  ;;  %v861_v53 = vpop.f32.mrf.mxu0 }
  0xf0   :  { %v865_v54 = vadd.f32 %v861_v53, %v794_v52  ;;  %v1121_v43 = vld [vmem:[#allocation4 + $0x10] sm:$0xff] }
  0xf1   :  { %698 = vst.msk [vmem:[#allocation4 + $0x30] sm:$0xff] %vm62_vm0, %v690_v51  ;;  %v2740_v55 = vpop.f32.mrf.mxu0  ;;  %v946_v56 = vpop.f32.mrf.mxu1  ;;  %v1202_v51 = vld [vmem:[#allocation2 + $0x18] sm:$0xff] }
  0xf2   :  { %v2448_v57 = vmul.f32 -1.442695, %v865_v54  ;;  %v947_v1 = vadd.f32 %v3391_v62, %v946_v56 }
  0xf3   :  { %v2751_v58 = vpop.f32.mrf.mxu1 }
  0xf4   :  { %2954 = vpow2.f32 %v2448_v57  ;;  %v1284_v58 = vld [vmem:[#allocation3 + $0x18] sm:$0xff] }
  0xf9   :  { %v2953_v59 = vpop.eup %2952 }
  0xfa   :  { %v790_v60 = vadd.f32 1.0, %v2953_v59 }
  0xfc   :  { %2956 = vrcp.f32 %v790_v60 }
 0x101   :  { %v2955_v61 = vpop.eup %2954 }
 0x102   :  { %v869_v63 = vadd.f32 1.0, %v2955_v61 }
 0x104   :  { %2958 = vrcp.f32 %v869_v63 }
 0x109   :  { %v2957_v2 = vpop.eup %2956 }
 0x10a   :  { %v950_v3 = vmul.f32 %v2957_v2, %v947_v1 }
 0x10c   :  { %v951_v5 = vadd.f32 %v950_v3, %v873_v4 }
 0x10e   :  { %2960 = vtanh.f32 %v951_v5 }
 0x111   :  { %v2959_v6 = vpop.eup %2958 }
 0x112   :  { %v953_v7 = vsub.f32 1.0, %v2959_v6  ;;  %v955_v11 = vmul.f32 %v2959_v6, %v3139_v9  ;;  %v960_v9 = vld [vmem:[#allocation2 + $0x10] sm:$0xff] }
 0x11b   :  { %v2961_v8 = vpop.eup %2960 }
 0x11c   :  { %v954_v10 = vmul.f32 %v2961_v8, %v953_v7  ;;  %v1363_v8 = vld [vmem:[#allocation4 + $0x18] sm:$0xff] }
 0x11e   :  { %v956_v12 = vadd.f32 %v955_v11, %v954_v10 }
 0x120   :  { %2451 = vst.msk [vmem:[%s3616_s15 + $0x8] sm:$0xff] %vm62_vm0, %v956_v12  ;;  %2761 = vmatmul.mubr.msk.f32.vlgmr.msra.gmra.mxu0 %vm62_vm0, %v956_v12  ;;  %2772 = vmatmul.mubr.msk.f32.vlgmr.msra.gmra.mxu1 %vm62_vm0, %v956_v12 }
 0x121   :  { %2775 = vmatpush3.msra.mxu0 %v3251_v31  ;;  %2782 = vmatprep.mubr.msk.f32.mxu0 %vm3023_vm1, %v3022_v0 }
 0x122   :  { %2776 = vmatprep.subr.mxu0 %v3022_v0  ;;  %2786 = vmatpush3.msra.mxu1 %v3207_v24 }
 0x123   :  { %2777 = vmatpush3.msra.mxu0 %v3269_v33  ;;  %2787 = vmatprep.subr.mxu1 %v3022_v0 }
 0x124   :  { %2778 = vmatprep.subr.mxu0 %v3022_v0  ;;  %2788 = vmatpush3.msra.mxu1 %v3228_v28 }
 0x125   :  { %2779 = vmatpush3.msra.mxu0 %v3304_v37  ;;  %2789 = vmatprep.subr.mxu1 %v3022_v0 }
 0x126   :  { %2780 = vmatprep.subr.mxu0 %v3022_v0  ;;  %2790 = vmatpush3.msra.mxu1 %v3241_v30 }
 0x127   :  { %2781 = vmatpush3.msra.mxu0 %v3318_v39  ;;  %2791 = vmatprep.subr.mxu1 %v3022_v0 }
 0x128   :  { %2783 = vmatmul.mubr.msk.f32.vlgmr.msra.gmra.mxu0 %vm62_vm0, %v956_v12  ;;  %2796 = vmatprep.subr.mxu0 %v3022_v0 }
 0x129   :  { %2797 = vmatpush3.msra.mxu0 %v3277_v34  ;;  %2792 = vmatpush3.msra.mxu1 %v3258_v32 }
 0x12a   :  { %2798 = vmatprep.subr.mxu0 %v3022_v0  ;;  %2793 = vmatprep.mubr.msk.f32.mxu1 %vm3023_vm1, %v3022_v0 }
 0x12b   :  { %2799 = vmatpush3.msra.mxu0 %v3286_v35  ;;  %2804 = vmatprep.mubr.msk.f32.mxu0 %vm3023_vm1, %v3022_v0 }
 0x12c   :  { %2800 = vmatprep.subr.mxu0 %v3022_v0  ;;  %2807 = vmatprep.subr.mxu1 %v3022_v0 }
 0x12d   :  { %2801 = vmatpush3.msra.mxu0 %v3296_v36 }
 0x12e   :  { %2802 = vmatprep.subr.mxu0 %v3022_v0 }
 0x12f   :  { %2803 = vmatpush3.msra.mxu0 %v3310_v38 }
 0x130   :  { %2818 = vmatprep.subr.mxu0 %v3022_v0 }
 0x1e0   :  { %v1030_v13 = vpop.f32.mrf.mxu0  ;;  %v1109_v14 = vpop.f32.mrf.mxu1 }
 0x1e1   :  { %v1034_v15 = vadd.f32 %v1030_v13, %v960_v9  ;;  %v1113_v20 = vadd.f32 %v1109_v14, %v1042_v19 }
 0x1e2   :  { %v2762_v16 = vpop.f32.mrf.mxu0  ;;  %v2773_v17 = vpop.f32.mrf.mxu1 }
 0x1e3   :  { %v2453_v18 = vmul.f32 -1.442695, %v1034_v15  ;;  %v2455_v23 = vmul.f32 -1.442695, %v1113_v20  ;;  %v1444_v16 = vld [vmem:[#allocation2 + $0x20] sm:$0xff] }
 0x1e5   :  { %2962 = vpow2.f32 %v2453_v18 }
 0x1e6   :  { %2964 = vpow2.f32 %v2455_v23  ;;  %v1526_v23 = vld [vmem:[#allocation3 + $0x20] sm:$0xff] }
 0x1e8   :  { %v1188_v21 = vpop.f32.mrf.mxu0 }
 0x1e9   :  { %v1189_v40 = vadd.f32 %v3391_v62, %v1188_v21 }
 0x1ea   :  { %v2784_v22 = vpop.f32.mrf.mxu0 }
 0x1f2   :  { %v2963_v25 = vpop.eup %2962 }
 0x1f3   :  { %v1038_v26 = vadd.f32 1.0, %v2963_v25  ;;  %v2965_v27 = vpop.eup %2964 }
 0x1f4   :  { %v1117_v29 = vadd.f32 1.0, %v2965_v27 }
 0x1f5   :  { %2966 = vrcp.f32 %v1038_v26 }
 0x1f6   :  { %2968 = vrcp.f32 %v1117_v29 }
 0x202   :  { %v2967_v41 = vpop.eup %2966 }
 0x203   :  { %v1192_v42 = vmul.f32 %v2967_v41, %v1189_v40  ;;  %v2969_v45 = vpop.eup %2968 }
 0x204   :  { %v1195_v46 = vsub.f32 1.0, %v2969_v45  ;;  %v1197_v49 = vmul.f32 %v2969_v45, %v956_v12 }
 0x205   :  { %v1193_v44 = vadd.f32 %v1192_v42, %v1121_v43 }
 0x207   :  { %2970 = vtanh.f32 %v1193_v44 }
 0x214   :  { %v2971_v47 = vpop.eup %2970 }
 0x215   :  { %v1196_v48 = vmul.f32 %v2971_v47, %v1195_v46  ;;  %v1605_v47 = vld [vmem:[#allocation4 + $0x20] sm:$0xff] }
 0x217   :  { %v1198_v50 = vadd.f32 %v1197_v49, %v1196_v48 }
 0x219   :  { %2457 = vst.msk [vmem:[%s3616_s15 + $0x10] sm:$0xff] %vm62_vm0, %v1198_v50  ;;  %2794 = vmatmul.mubr.msk.f32.vlgmr.msra.gmra.mxu1 %vm62_vm0, %v1198_v50  ;;  %2805 = vmatmul.mubr.msk.f32.vlgmr.msra.gmra.mxu0 %vm62_vm0, %v1198_v50 }
 0x21a   :  { %2808 = vmatpush3.msra.mxu1 %v3251_v31  ;;  %2815 = vmatprep.mubr.msk.f32.mxu1 %vm3023_vm1, %v3022_v0 }
 0x21b   :  { %2809 = vmatprep.subr.mxu1 %v3022_v0  ;;  %2819 = vmatpush3.msra.mxu0 %v3207_v24 }
 0x21c   :  { %2810 = vmatpush3.msra.mxu1 %v3269_v33  ;;  %2820 = vmatprep.subr.mxu0 %v3022_v0 }
 0x21d   :  { %2811 = vmatprep.subr.mxu1 %v3022_v0  ;;  %2821 = vmatpush3.msra.mxu0 %v3228_v28 }
 0x21e   :  { %2812 = vmatpush3.msra.mxu1 %v3304_v37  ;;  %2822 = vmatprep.subr.mxu0 %v3022_v0 }
 0x21f   :  { %2813 = vmatprep.subr.mxu1 %v3022_v0  ;;  %2823 = vmatpush3.msra.mxu0 %v3241_v30 }
 0x220   :  { %2814 = vmatpush3.msra.mxu1 %v3318_v39  ;;  %2824 = vmatprep.subr.mxu0 %v3022_v0 }
 0x221   :  { %2816 = vmatmul.mubr.msk.f32.vlgmr.msra.gmra.mxu1 %vm62_vm0, %v1198_v50  ;;  %2829 = vmatprep.subr.mxu1 %v3022_v0 }
 0x222   :  { %2830 = vmatpush3.msra.mxu1 %v3277_v34  ;;  %2825 = vmatpush3.msra.mxu0 %v3258_v32 }
 0x223   :  { %2831 = vmatprep.subr.mxu1 %v3022_v0  ;;  %2826 = vmatprep.mubr.msk.f32.mxu0 %vm3023_vm1, %v3022_v0 }
 0x224   :  { %2832 = vmatpush3.msra.mxu1 %v3286_v35  ;;  %2837 = vmatprep.mubr.msk.f32.mxu1 %vm3023_vm1, %v3022_v0 }
 0x225   :  { %2833 = vmatprep.subr.mxu1 %v3022_v0  ;;  %2840 = vmatprep.subr.mxu0 %v3022_v0 }
 0x226   :  { %2834 = vmatpush3.msra.mxu1 %v3296_v36 }
 0x227   :  { %2835 = vmatprep.subr.mxu1 %v3022_v0 }
 0x228   :  { %2836 = vmatpush3.msra.mxu1 %v3310_v38 }
 0x229   :  { %2851 = vmatprep.subr.mxu1 %v3022_v0 }
 0x2d9   :  { %v1272_v52 = vpop.f32.mrf.mxu1  ;;  %v1351_v53 = vpop.f32.mrf.mxu0 }
 0x2da   :  { %v1276_v54 = vadd.f32 %v1272_v52, %v1202_v51  ;;  %v1355_v59 = vadd.f32 %v1351_v53, %v1284_v58 }
 0x2db   :  { %v2795_v55 = vpop.f32.mrf.mxu1  ;;  %v2806_v56 = vpop.f32.mrf.mxu0 }
 0x2dc   :  { %v2459_v57 = vmul.f32 -1.442695, %v1276_v54  ;;  %v2461_v63 = vmul.f32 -1.442695, %v1355_v59  ;;  %v1686_v55 = vld [vmem:[#allocation2 + $0x28] sm:$0xff] }
 0x2de   :  { %2972 = vpow2.f32 %v2459_v57 }
 0x2df   :  { %2974 = vpow2.f32 %v2461_v63  ;;  %v1768_v63 = vld [vmem:[#allocation3 + $0x28] sm:$0xff] }
 0x2e1   :  { %v1430_v60 = vpop.f32.mrf.mxu1 }
 0x2e2   :  { %v1431_v5 = vadd.f32 %v3391_v62, %v1430_v60 }
 0x2e3   :  { %v2817_v61 = vpop.f32.mrf.mxu1 }
 0x2eb   :  { %v2973_v1 = vpop.eup %2972 }
 0x2ec   :  { %v1280_v2 = vadd.f32 1.0, %v2973_v1  ;;  %v2975_v3 = vpop.eup %2974 }
 0x2ed   :  { %v1359_v4 = vadd.f32 1.0, %v2975_v3 }
 0x2ee   :  { %2976 = vrcp.f32 %v1280_v2 }
 0x2ef   :  { %2978 = vrcp.f32 %v1359_v4 }
 0x2fb   :  { %v2977_v6 = vpop.eup %2976 }
 0x2fc   :  { %v1434_v7 = vmul.f32 %v2977_v6, %v1431_v5  ;;  %v2979_v11 = vpop.eup %2978 }
 0x2fd   :  { %v1437_v12 = vsub.f32 1.0, %v2979_v11  ;;  %v1439_v14 = vmul.f32 %v2979_v11, %v1198_v50 }
 0x2fe   :  { %v1435_v10 = vadd.f32 %v1434_v7, %v1363_v8 }
 0x300   :  { %2980 = vtanh.f32 %v1435_v10 }
 0x30d   :  { %v2981_v9 = vpop.eup %2980 }
 0x30e   :  { %v1438_v13 = vmul.f32 %v2981_v9, %v1437_v12  ;;  %v1847_v9 = vld [vmem:[#allocation4 + $0x28] sm:$0xff] }
 0x310   :  { %v1440_v15 = vadd.f32 %v1439_v14, %v1438_v13 }
 0x312   :  { %2463 = vst.msk [vmem:[%s3616_s15 + $0x18] sm:$0xff] %vm62_vm0, %v1440_v15  ;;  %2827 = vmatmul.mubr.msk.f32.vlgmr.msra.gmra.mxu0 %vm62_vm0, %v1440_v15  ;;  %2838 = vmatmul.mubr.msk.f32.vlgmr.msra.gmra.mxu1 %vm62_vm0, %v1440_v15 }
 0x313   :  { %2841 = vmatpush3.msra.mxu0 %v3251_v31  ;;  %2848 = vmatprep.mubr.msk.f32.mxu0 %vm3023_vm1, %v3022_v0 }
 0x314   :  { %2842 = vmatprep.subr.mxu0 %v3022_v0  ;;  %2852 = vmatpush3.msra.mxu1 %v3207_v24 }
 0x315   :  { %2843 = vmatpush3.msra.mxu0 %v3269_v33  ;;  %2853 = vmatprep.subr.mxu1 %v3022_v0 }
 0x316   :  { %2844 = vmatprep.subr.mxu0 %v3022_v0  ;;  %2854 = vmatpush3.msra.mxu1 %v3228_v28 }
 0x317   :  { %2845 = vmatpush3.msra.mxu0 %v3304_v37  ;;  %2855 = vmatprep.subr.mxu1 %v3022_v0 }
 0x318   :  { %2846 = vmatprep.subr.mxu0 %v3022_v0  ;;  %2856 = vmatpush3.msra.mxu1 %v3241_v30 }
 0x319   :  { %2847 = vmatpush3.msra.mxu0 %v3318_v39  ;;  %2857 = vmatprep.subr.mxu1 %v3022_v0 }
 0x31a   :  { %2849 = vmatmul.mubr.msk.f32.vlgmr.msra.gmra.mxu0 %vm62_vm0, %v1440_v15  ;;  %2862 = vmatprep.subr.mxu0 %v3022_v0 }
 0x31b   :  { %2863 = vmatpush3.msra.mxu0 %v3277_v34  ;;  %2858 = vmatpush3.msra.mxu1 %v3258_v32 }
 0x31c   :  { %2864 = vmatprep.subr.mxu0 %v3022_v0  ;;  %2859 = vmatprep.mubr.msk.f32.mxu1 %vm3023_vm1, %v3022_v0 }
 0x31d   :  { %2865 = vmatpush3.msra.mxu0 %v3286_v35  ;;  %2870 = vmatprep.mubr.msk.f32.mxu0 %vm3023_vm1, %v3022_v0 }
 0x31e   :  { %2866 = vmatprep.subr.mxu0 %v3022_v0  ;;  %2873 = vmatprep.subr.mxu1 %v3022_v0 }
 0x31f   :  { %2867 = vmatpush3.msra.mxu0 %v3296_v36 }
 0x320   :  { %2868 = vmatprep.subr.mxu0 %v3022_v0 }
 0x321   :  { %2869 = vmatpush3.msra.mxu0 %v3310_v38 }
 0x322   :  { %2884 = vmatprep.subr.mxu0 %v3022_v0 }
 0x3d2   :  { %v1514_v17 = vpop.f32.mrf.mxu0  ;;  %v1593_v18 = vpop.f32.mrf.mxu1 }
 0x3d3   :  { %v1518_v19 = vadd.f32 %v1514_v17, %v1444_v16  ;;  %v1597_v25 = vadd.f32 %v1593_v18, %v1526_v23 }
 0x3d4   :  { %v2828_v20 = vpop.f32.mrf.mxu0  ;;  %v2839_v21 = vpop.f32.mrf.mxu1 }
 0x3d5   :  { %v2465_v22 = vmul.f32 -1.442695, %v1518_v19  ;;  %v2467_v29 = vmul.f32 -1.442695, %v1597_v25  ;;  %v2010_v21 = vld [vmem:[#allocation3 + $0x30] sm:$0xff] }
 0x3d7   :  { %2982 = vpow2.f32 %v2465_v22 }
 0x3d8   :  { %2984 = vpow2.f32 %v2467_v29 }
 0x3da   :  { %v1672_v26 = vpop.f32.mrf.mxu0 }
 0x3db   :  { %v1673_v44 = vadd.f32 %v3391_v62, %v1672_v26 }
 0x3dc   :  { %v2850_v27 = vpop.f32.mrf.mxu0 }
 0x3e4   :  { %v2983_v40 = vpop.eup %2982 }
 0x3e5   :  { %v1522_v41 = vadd.f32 1.0, %v2983_v40  ;;  %v2985_v42 = vpop.eup %2984 }
 0x3e6   :  { %v1601_v43 = vadd.f32 1.0, %v2985_v42 }
 0x3e7   :  { %2986 = vrcp.f32 %v1522_v41 }
 0x3e8   :  { %2988 = vrcp.f32 %v1601_v43  ;;  %v2089_v43 = vld [vmem:[#allocation4 + $0x30] sm:$0xff] }
 0x3f4   :  { %v2987_v45 = vpop.eup %2986 }
 0x3f5   :  { %v1676_v46 = vmul.f32 %v2987_v45, %v1673_v44  ;;  %v2989_v49 = vpop.eup %2988 }
 0x3f6   :  { %v1679_v50 = vsub.f32 1.0, %v2989_v49  ;;  %v1681_v53 = vmul.f32 %v2989_v49, %v1440_v15 }
 0x3f7   :  { %v1677_v48 = vadd.f32 %v1676_v46, %v1605_v47 }
 0x3f9   :  { %2990 = vtanh.f32 %v1677_v48 }
 0x406   :  { %v2991_v51 = vpop.eup %2990 }
 0x407   :  { %v1680_v52 = vmul.f32 %v2991_v51, %v1679_v50  ;;  %v2170_v51 = vld [vmem:[#allocation2 + $0x38] sm:$0xff] }
 0x409   :  { %v1682_v54 = vadd.f32 %v1681_v53, %v1680_v52 }
 0x40b   :  { %2469 = vst.msk [vmem:[%s3616_s15 + $0x20] sm:$0xff] %vm62_vm0, %v1682_v54  ;;  %2860 = vmatmul.mubr.msk.f32.vlgmr.msra.gmra.mxu1 %vm62_vm0, %v1682_v54  ;;  %2871 = vmatmul.mubr.msk.f32.vlgmr.msra.gmra.mxu0 %vm62_vm0, %v1682_v54 }
 0x40c   :  { %2874 = vmatpush3.msra.mxu1 %v3251_v31  ;;  %2881 = vmatprep.mubr.msk.f32.mxu1 %vm3023_vm1, %v3022_v0 }
 0x40d   :  { %2875 = vmatprep.subr.mxu1 %v3022_v0  ;;  %2885 = vmatpush3.msra.mxu0 %v3207_v24 }
 0x40e   :  { %2876 = vmatpush3.msra.mxu1 %v3269_v33  ;;  %2886 = vmatprep.subr.mxu0 %v3022_v0 }
 0x40f   :  { %2877 = vmatprep.subr.mxu1 %v3022_v0  ;;  %2887 = vmatpush3.msra.mxu0 %v3228_v28 }
 0x410   :  { %2878 = vmatpush3.msra.mxu1 %v3304_v37  ;;  %2888 = vmatprep.subr.mxu0 %v3022_v0 }
 0x411   :  { %2879 = vmatprep.subr.mxu1 %v3022_v0  ;;  %2889 = vmatpush3.msra.mxu0 %v3241_v30 }
 0x412   :  { %2880 = vmatpush3.msra.mxu1 %v3318_v39  ;;  %2890 = vmatprep.subr.mxu0 %v3022_v0 }
 0x413   :  { %2882 = vmatmul.mubr.msk.f32.vlgmr.msra.gmra.mxu1 %vm62_vm0, %v1682_v54  ;;  %2895 = vmatprep.subr.mxu1 %v3022_v0 }
 0x414   :  { %2896 = vmatpush3.msra.mxu1 %v3277_v34  ;;  %2891 = vmatpush3.msra.mxu0 %v3258_v32 }
 0x415   :  { %2897 = vmatprep.subr.mxu1 %v3022_v0  ;;  %2892 = vmatprep.mubr.msk.f32.mxu0 %vm3023_vm1, %v3022_v0 }
 0x416   :  { %2898 = vmatpush3.msra.mxu1 %v3286_v35  ;;  %2903 = vmatprep.mubr.msk.f32.mxu1 %vm3023_vm1, %v3022_v0 }
 0x417   :  { %2899 = vmatprep.subr.mxu1 %v3022_v0  ;;  %2906 = vmatprep.subr.mxu0 %v3022_v0 }
 0x418   :  { %2900 = vmatpush3.msra.mxu1 %v3296_v36 }
 0x419   :  { %2901 = vmatprep.subr.mxu1 %v3022_v0 }
 0x41a   :  { %2902 = vmatpush3.msra.mxu1 %v3310_v38 }
 0x41b   :  { %2917 = vmatprep.subr.mxu1 %v3022_v0 }
 0x4cb   :  { %v1756_v56 = vpop.f32.mrf.mxu1  ;;  %v1835_v57 = vpop.f32.mrf.mxu0 }
 0x4cc   :  { %v1760_v58 = vadd.f32 %v1756_v56, %v1686_v55  ;;  %v1839_v1 = vadd.f32 %v1835_v57, %v1768_v63  ;;  %v2252_v57 = vld [vmem:[#allocation3 + $0x38] sm:$0xff] }
 0x4cd   :  { %v2861_v59 = vpop.f32.mrf.mxu1  ;;  %v2872_v60 = vpop.f32.mrf.mxu0 }
 0x4ce   :  { %v2471_v61 = vmul.f32 -1.442695, %v1760_v58  ;;  %v2473_v4 = vmul.f32 -1.442695, %v1839_v1 }
 0x4d0   :  { %2992 = vpow2.f32 %v2471_v61 }
 0x4d1   :  { %2994 = vpow2.f32 %v2473_v4 }
 0x4d3   :  { %v1914_v2 = vpop.f32.mrf.mxu1 }
 0x4d4   :  { %v1915_v10 = vadd.f32 %v3391_v62, %v1914_v2 }
 0x4d5   :  { %v2883_v3 = vpop.f32.mrf.mxu1 }
 0x4d6   :  { %v2331_v3 = vld [vmem:[#allocation4 + $0x38] sm:$0xff] }
 0x4dd   :  { %v2993_v5 = vpop.eup %2992 }
 0x4de   :  { %v1764_v6 = vadd.f32 1.0, %v2993_v5  ;;  %v2995_v7 = vpop.eup %2994 }
 0x4df   :  { %v1843_v8 = vadd.f32 1.0, %v2995_v7 }
 0x4e0   :  { %2996 = vrcp.f32 %v1764_v6 }
 0x4e1   :  { %2998 = vrcp.f32 %v1843_v8 }
 0x4ed   :  { %v2997_v11 = vpop.eup %2996 }
 0x4ee   :  { %v1918_v12 = vmul.f32 %v2997_v11, %v1915_v10  ;;  %v2999_v14 = vpop.eup %2998 }
 0x4ef   :  { %v1921_v15 = vsub.f32 1.0, %v2999_v14  ;;  %v1923_v18 = vmul.f32 %v2999_v14, %v1682_v54 }
 0x4f0   :  { %v1919_v13 = vadd.f32 %v1918_v12, %v1847_v9 }
 0x4f2   :  { %3000 = vtanh.f32 %v1919_v13 }
 0x4ff   :  { %v3001_v16 = vpop.eup %3000 }
 0x500   :  { %v1922_v17 = vmul.f32 %v3001_v16, %v1921_v15 }
 0x502   :  { %v1924_v19 = vadd.f32 %v1923_v18, %v1922_v17 }
 0x504   :  { %2475 = vst.msk [vmem:[%s3616_s15 + $0x28] sm:$0xff] %vm62_vm0, %v1924_v19  ;;  %2893 = vmatmul.mubr.msk.f32.vlgmr.msra.gmra.mxu0 %vm62_vm0, %v1924_v19  ;;  %2904 = vmatmul.mubr.msk.f32.vlgmr.msra.gmra.mxu1 %vm62_vm0, %v1924_v19 }
 0x505   :  { %2907 = vmatpush3.msra.mxu0 %v3251_v31  ;;  %2914 = vmatprep.mubr.msk.f32.mxu0 %vm3023_vm1, %v3022_v0 }
 0x506   :  { %2908 = vmatprep.subr.mxu0 %v3022_v0  ;;  %2918 = vmatpush3.msra.mxu1 %v3207_v24  ;;  %v1928_v24 = vld [vmem:[#allocation2 + $0x30] sm:$0xff] }
 0x507   :  { %2909 = vmatpush3.msra.mxu0 %v3269_v33  ;;  %2919 = vmatprep.subr.mxu1 %v3022_v0 }
 0x508   :  { %2910 = vmatprep.subr.mxu0 %v3022_v0  ;;  %2920 = vmatpush3.msra.mxu1 %v3228_v28 }
 0x509   :  { %2911 = vmatpush3.msra.mxu0 %v3304_v37  ;;  %2921 = vmatprep.subr.mxu1 %v3022_v0 }
 0x50a   :  { %2912 = vmatprep.subr.mxu0 %v3022_v0  ;;  %2922 = vmatpush3.msra.mxu1 %v3241_v30 }
 0x50b   :  { %2913 = vmatpush3.msra.mxu0 %v3318_v39  ;;  %2923 = vmatprep.subr.mxu1 %v3022_v0 }
 0x50c   :  { %2915 = vmatmul.mubr.msk.f32.vlgmr.msra.gmra.mxu0 %vm62_vm0, %v1924_v19  ;;  %2928 = vmatprep.subr.mxu0 %v3022_v0 }
 0x50d   :  { %2929 = vmatpush3.msra.mxu0 %v3277_v34  ;;  %2924 = vmatpush3.msra.mxu1 %v3258_v32 }
 0x50e   :  { %2930 = vmatprep.subr.mxu0 %v3022_v0  ;;  %2925 = vmatprep.mubr.msk.f32.mxu1 %vm3023_vm1, %v3022_v0 }
 0x50f   :  { %2931 = vmatpush3.msra.mxu0 %v3286_v35  ;;  %2936 = vmatprep.mubr.msk.f32.mxu0 %vm3023_vm1, %v3022_v0 }
 0x510   :  { %2932 = vmatprep.subr.mxu0 %v3022_v0  ;;  %2939 = vmatprep.subr.mxu1 %v3022_v0 }
 0x511   :  { %2933 = vmatpush3.msra.mxu0 %v3296_v36 }
 0x512   :  { %2934 = vmatprep.subr.mxu0 %v3022_v0 }
 0x513   :  { %2935 = vmatpush3.msra.mxu0 %v3310_v38 }
 0x5c4   :  { %v1998_v28 = vpop.f32.mrf.mxu0  ;;  %v2077_v30 = vpop.f32.mrf.mxu1 }
 0x5c5   :  { %v2002_v32 = vadd.f32 %v1998_v28, %v1928_v24  ;;  %v2081_v22 = vadd.f32 %v2077_v30, %v2010_v21 }
 0x5c6   :  { %v2894_v34 = vpop.f32.mrf.mxu0  ;;  %v2905_v20 = vpop.f32.mrf.mxu1 }
 0x5c7   :  { %v2477_v35 = vmul.f32 -1.442695, %v2002_v32  ;;  %v2479_v26 = vmul.f32 -1.442695, %v2081_v22 }
 0x5c9   :  { %3002 = vpow2.f32 %v2477_v35 }
 0x5ca   :  { %3004 = vpow2.f32 %v2479_v26 }
 0x5cc   :  { %v2156_v23 = vpop.f32.mrf.mxu0 }
 0x5cd   :  { %v2157_v38 = vadd.f32 %v3391_v62, %v2156_v23 }
 0x5ce   :  { %v2916_v25 = vpop.f32.mrf.mxu0 }
 0x5d6   :  { %v3003_v27 = vpop.eup %3002 }
 0x5d7   :  { %v2006_v36 = vadd.f32 1.0, %v3003_v27  ;;  %v3005_v29 = vpop.eup %3004 }
 0x5d8   :  { %v2085_v40 = vadd.f32 1.0, %v3005_v29 }
 0x5d9   :  { %3006 = vrcp.f32 %v2006_v36 }
 0x5da   :  { %3008 = vrcp.f32 %v2085_v40 }
 0x5e6   :  { %v3007_v41 = vpop.eup %3006 }
 0x5e7   :  { %v2160_v42 = vmul.f32 %v3007_v41, %v2157_v38  ;;  %v3009_v45 = vpop.eup %3008 }
 0x5e8   :  { %v2163_v46 = vsub.f32 1.0, %v3009_v45  ;;  %v2165_v49 = vmul.f32 %v3009_v45, %v1924_v19 }
 0x5e9   :  { %v2161_v44 = vadd.f32 %v2160_v42, %v2089_v43 }
 0x5eb   :  { %3010 = vtanh.f32 %v2161_v44 }
 0x5f8   :  { %v3011_v47 = vpop.eup %3010 }
 0x5f9   :  { %v2164_v48 = vmul.f32 %v3011_v47, %v2163_v46 }
 0x5fb   :  { %v2166_v50 = vadd.f32 %v2165_v49, %v2164_v48 }
 0x5fd   :  { %2481 = vst.msk [vmem:[%s3616_s15 + $0x30] sm:$0xff] %vm62_vm0, %v2166_v50  ;;  %2926 = vmatmul.mubr.msk.f32.vlgmr.msra.gmra.mxu1 %vm62_vm0, %v2166_v50  ;;  %2937 = vmatmul.mubr.msk.f32.vlgmr.msra.gmra.mxu0 %vm62_vm0, %v2166_v50 }
 0x5fe   :  { %2940 = vmatpush3.msra.mxu1 %v3251_v31  ;;  %2947 = vmatprep.mubr.msk.f32.mxu1 %vm3023_vm1, %v3022_v0 }
 0x5ff   :  { %2941 = vmatprep.subr.mxu1 %v3022_v0 }
 0x600   :  { %2942 = vmatpush3.msra.mxu1 %v3269_v33 }
 0x601   :  { %2943 = vmatprep.subr.mxu1 %v3022_v0 }
 0x602   :  { %2944 = vmatpush3.msra.mxu1 %v3304_v37 }
 0x603   :  { %2945 = vmatprep.subr.mxu1 %v3022_v0 }
 0x604   :  { %2946 = vmatpush3.msra.mxu1 %v3318_v39 }
 0x605   :  { %2948 = vmatmul.mubr.msk.f32.vlgmr.msra.gmra.mxu1 %vm62_vm0, %v2166_v50 }
 0x6bd   :  { %v2240_v52 = vpop.f32.mrf.mxu1  ;;  %v2319_v31 = vpop.f32.mrf.mxu0 }
 0x6be   :  { %v2244_v53 = vadd.f32 %v2240_v52, %v2170_v51  ;;  %v2323_v33 = vadd.f32 %v2319_v31, %v2252_v57 }
 0x6bf   :  { %v2927_v54 = vpop.f32.mrf.mxu1  ;;  %v2938_v55 = vpop.f32.mrf.mxu0 }
 0x6c0   :  { %v2483_v56 = vmul.f32 -1.442695, %v2244_v53  ;;  %v2485_v60 = vmul.f32 -1.442695, %v2323_v33 }
 0x6c2   :  { %3012 = vpow2.f32 %v2483_v56 }
 0x6c3   :  { %3014 = vpow2.f32 %v2485_v60 }
 0x6c5   :  { %v2398_v58 = vpop.f32.mrf.mxu1 }
 0x6c6   :  { %v2399_v63 = vadd.f32 %v3391_v62, %v2398_v58 }
 0x6c7   :  { %v2949_v59 = vpop.f32.mrf.mxu1 }
 0x6cf   :  { %v3013_v37 = vpop.eup %3012 }
 0x6d0   :  { %v2248_v0 = vadd.f32 1.0, %v3013_v37  ;;  %v3015_v39 = vpop.eup %3014 }
 0x6d1   :  { %v2327_v61 = vadd.f32 1.0, %v3015_v39 }
 0x6d2   :  { %3016 = vrcp.f32 %v2248_v0 }
 0x6d3   :  { %3018 = vrcp.f32 %v2327_v61 }
 0x6df   :  { %v3017_v1 = vpop.eup %3016 }
 0x6e0   :  { %v2402_v2 = vmul.f32 %v3017_v1, %v2399_v63  ;;  %v3019_v5 = vpop.eup %3018 }
 0x6e1   :  { %v2405_v6 = vsub.f32 1.0, %v3019_v5  ;;  %v2407_v8 = vmul.f32 %v3019_v5, %v2166_v50 }
 0x6e2   :  { %v2403_v4 = vadd.f32 %v2402_v2, %v2331_v3 }
 0x6e4   :  { %3020 = vtanh.f32 %v2403_v4 }
 0x6f1   :  { %v3021_v7 = vpop.eup %3020 }
 0x6f2   :  { %v2406_v10 = vmul.f32 %v3021_v7, %v2405_v6 }
 0x6f4   :  { %v2408_v11 = vadd.f32 %v2407_v8, %v2406_v10 }
 0x6f6   :  { %2487 = vst.msk [vmem:[%s3616_s15 + $0x38] sm:$0xff] %vm62_vm0, %v2408_v11 }

</bundles_post_ra>
